<compile_context>
chip_gen: v6e
topology: v6e:2x2x1
jax: 0.10.0
libtpu: 0.0.40
codegen_flags: <defaults>
</compile_context>

<pallas_src>
import random

import jax
import jax.numpy as jnp
from jax import lax
from jax.experimental import pallas as pl
from jax.experimental.pallas import tpu as pltpu


# ----------------------------------------------------------------------------- helpers

def _round_up(x, m):
    return ((x + m - 1) // m) * m


def _lstm_gates(gates, c_prev, H):
    # PyTorch gate order i, f, g, o as lane slices; only the g slice needs tanh.
    sg = jax.nn.sigmoid(gates)
    i = sg[:, 0:H]
    f = sg[:, H:2 * H]
    o = sg[:, 3 * H:4 * H]
    g = jnp.tanh(gates[:, 2 * H:3 * H])
    c_new = f * c_prev + i * g
    h_new = o * jnp.tanh(c_new)
    return h_new, c_new


# ----------------------------------------------------------------------------- kernels

def bilstm_encoder_kernel(xproj_ref, whh_ref, h_all_ref, c_fin_ref):
    # One grid step per direction; the time recurrence is a fully unrolled in-kernel loop.
    #   xproj_ref: (1, S, B, 4H)  precomputed x @ W_ih + b (backward dir time-reversed)
    #   whh_ref:   (1, H, 4H)
    S = xproj_ref.shape[1]
    B = xproj_ref.shape[2]
    H = whh_ref.shape[1]
    whh = whh_ref[0]
    h = jnp.zeros((B, H), jnp.float32)
    c = jnp.zeros((B, H), jnp.float32)
    for t in range(S):                      # static trip count -> full unroll
        gates = xproj_ref[0, t] + jnp.dot(h, whh, preferred_element_type=jnp.float32)
        h, c = _lstm_gates(gates, c, H)
        h_all_ref[0, t] = h                 # resident block, static index store
    c_fin_ref[0] = c


def decoder_kernel(flags_ref, target_ref,                    # SMEM int32: (T-1,), (T, B)
                   h_in_ref, c_in_ref, enc_ref,              # (B,2H), (B,2H), (B,S,2H)
                   fch_w_ref, fch_b_ref, fcc_w_ref, fcc_b_ref,
                   weh_ref, wee_ref, be_ref, emb_ref,
                   dec_w_ref, dec_b_ref, fco_w_ref, fco_b_ref,
                   out_ref):                                 # (T-1, B, Vp)
    n_steps, B, Vp = out_ref.shape
    H = fch_w_ref.shape[1]
    V = emb_ref.shape[0]

    # resident operands loaded once
    enc = enc_ref[...]                                       # (B, S, 2H)
    weh = weh_ref[...]                                       # (1, H)
    be = be_ref[...]                                         # (1, 1)
    emb_tbl = emb_ref[...]                                   # (V, E)
    dec_w = dec_w_ref[...]
    dec_b = dec_b_ref[...]
    fco_w = fco_w_ref[...]
    fco_b = fco_b_ref[...]

    # decoder initial hidden / cell (previously two separate `linear` pallas_calls)
    h = jnp.dot(h_in_ref[...], fch_w_ref[...],
                preferred_element_type=jnp.float32) + fch_b_ref[...]       # (B, H)
    c = jnp.dot(c_in_ref[...], fcc_w_ref[...],
                preferred_element_type=jnp.float32) + fcc_b_ref[...]       # (B, H)

    # step-invariant attention term: enc @ w_ee  ->  (B, S)
    ee = jnp.sum(enc * wee_ref[...][None], axis=-1)

    def tgt_vec(t):
        # build a (B,1) int32 token vector from SMEM target scalars (splat + concat)
        return jnp.concatenate(
            [jnp.full((1, 1), target_ref[t, b], dtype=jnp.int32) for b in range(B)],
            axis=0)

    x = tgt_vec(0)                                           # x = target[0]

    for g in range(n_steps):                                 # fully unrolled decode loop
        # embedding lookup via one-hot matmul (stays vectorised in VMEM)
        one_hot = (lax.broadcasted_iota(jnp.int32, (B, V), 1) == x).astype(jnp.float32)
        emb = jnp.dot(one_hot, emb_tbl, preferred_element_type=jnp.float32)   # (B, E)

        # attention: energy = relu(h@w_eh + enc@w_ee + b), softmax over S, context
        e_h = jnp.sum(h * weh, axis=1, keepdims=True)                         # (B, 1)
        energy = jnp.maximum(ee + e_h + be, 0.0)                              # (B, S)
        m = jnp.max(energy, axis=1, keepdims=True)
        p = jnp.exp(energy - m)
        attn = p / jnp.sum(p, axis=1, keepdims=True)                          # (B, S)
        ctx = jnp.sum(attn[:, :, None] * enc, axis=1)                         # (B, 2H)

        # fused LSTM cell: cat(ctx, emb, h) @ [W_ih ; W_hh] + b  -> one MXU push
        rnn_in = jnp.concatenate([ctx, emb, h], axis=1)
        gates = jnp.dot(rnn_in, dec_w, preferred_element_type=jnp.float32) + dec_b
        h, c = _lstm_gates(gates, c, H)

        # output projection (vocab padded to 128-lane multiple; pad bias = -1e30)
        logits = jnp.dot(h, fco_w, preferred_element_type=jnp.float32) + fco_b  # (B, Vp)
        out_ref[g] = logits

        # next token: teacher forcing vs first-argmax of logits
        mx = jnp.max(logits, axis=1, keepdims=True)
        iot = lax.broadcasted_iota(jnp.int32, (B, Vp), 1)
        best = jnp.min(jnp.where(logits == mx, iot, Vp), axis=1, keepdims=True)  # (B, 1)
        tf = jnp.full((B, 1), flags_ref[g], dtype=jnp.int32)
        x = jnp.where(tf == 1, tgt_vec(g + 1), best)


# ----------------------------------------------------------------------------- wrappers

def bilstm_encoder(xproj2, whh2):
    # xproj2: (2, S, B, 4H) (backward direction already time-reversed); whh2: (2, H, 4H)
    _, S, B, H4 = xproj2.shape
    H = H4 // 4
    return pl.pallas_call(
        bilstm_encoder_kernel,
        out_shape=(
            jax.ShapeDtypeStruct((2, S, B, H), jnp.float32),   # h at every step
            jax.ShapeDtypeStruct((2, B, H), jnp.float32),      # final cell state
        ),
        grid=(2,),
        in_specs=[
            pl.BlockSpec((1, S, B, H4), lambda d: (d, 0, 0, 0)),
            pl.BlockSpec((1, H, H4), lambda d: (d, 0, 0)),
        ],
        out_specs=(
            pl.BlockSpec((1, S, B, H), lambda d: (d, 0, 0, 0)),
            pl.BlockSpec((1, B, H), lambda d: (d, 0, 0)),
        ),
        compiler_params=pltpu.CompilerParams(dimension_semantics=("parallel",)),
    )(xproj2, whh2)


def fused_decoder(flags, target, h_last, c_last, enc_bsh,
                  fc_hid_w, fc_hid_b, fc_cell_w, fc_cell_b,
                  weh, wee, be, emb_trg, dec_w, dec_b, fco_w, fco_b):
    T, B = target.shape
    n_steps = T - 1
    Vp = fco_w.shape[1]
    smem = lambda: pl.BlockSpec(memory_space=pltpu.MemorySpace.SMEM)
    vmem = lambda: pl.BlockSpec(memory_space=pltpu.MemorySpace.VMEM)
    return pl.pallas_call(
        decoder_kernel,
        out_shape=jax.ShapeDtypeStruct((n_steps, B, Vp), jnp.float32),
        in_specs=[smem(), smem()] + [vmem() for _ in range(15)],
        out_specs=vmem(),
    )(flags, target, h_last, c_last, enc_bsh,
      fc_hid_w, fc_hid_b, fc_cell_w, fc_cell_b,
      weh, wee, be, emb_trg, dec_w, dec_b, fco_w, fco_b)


# ----------------------------------------------------------------------------- model

def make_params(key, src_vocab, trg_vocab, E, H):
    def init(k, shape):
        return jax.random.normal(k, shape, dtype=jnp.float32) * 0.1

    ks = jax.random.split(key, 20)
    p = {}
    # encoder
    p["emb_src"] = init(ks[0], (src_vocab, E))
    p["enc_f_wih"] = init(ks[1], (E, 4 * H))
    p["enc_f_whh"] = init(ks[2], (H, 4 * H))
    p["enc_f_b"] = init(ks[3], (1, 4 * H))
    p["enc_b_wih"] = init(ks[4], (E, 4 * H))
    p["enc_b_whh"] = init(ks[5], (H, 4 * H))
    p["enc_b_b"] = init(ks[6], (1, 4 * H))
    p["fc_hid_w"] = init(ks[7], (2 * H, H))
    p["fc_hid_b"] = init(ks[8], (1, H))
    p["fc_cell_w"] = init(ks[9], (2 * H, H))
    p["fc_cell_b"] = init(ks[10], (1, H))
    # decoder
    p["emb_trg"] = init(ks[11], (trg_vocab, E))
    p["att_weh"] = init(ks[12], (H, 1))
    p["att_wee"] = init(ks[13], (2 * H, 1))
    p["att_be"] = init(ks[14], (1, 1))
    p["dec_wih"] = init(ks[15], (2 * H + E, 4 * H))
    p["dec_whh"] = init(ks[16], (H, 4 * H))
    p["dec_b"] = init(ks[17], (1, 4 * H))
    p["fc_out_w"] = init(ks[18], (H, trg_vocab))
    p["fc_out_b"] = init(ks[19], (1, trg_vocab))
    return p


def prepare_params(p):
    # One-time weight packing (hoisted out of the per-call forward).
    H = p["enc_f_whh"].shape[0]
    V = p["fc_out_w"].shape[1]
    Vp = _round_up(V, 128)
    q = {}
    q["emb_src"] = p["emb_src"]
    q["w_ih"] = jnp.concatenate([p["enc_f_wih"], p["enc_b_wih"]], axis=1)     # (E, 8H)
    q["b_ih"] = jnp.concatenate([p["enc_f_b"], p["enc_b_b"]], axis=1)         # (1, 8H)
    q["whh2"] = jnp.stack([p["enc_f_whh"], p["enc_b_whh"]], axis=0)           # (2, H, 4H)
    q["fc_hid_w"], q["fc_hid_b"] = p["fc_hid_w"], p["fc_hid_b"]
    q["fc_cell_w"], q["fc_cell_b"] = p["fc_cell_w"], p["fc_cell_b"]
    q["weh"] = p["att_weh"].reshape(1, H)
    q["wee"] = p["att_wee"].reshape(1, 2 * H)
    q["be"] = p["att_be"]
    q["emb_trg"] = p["emb_trg"]
    q["dec_w"] = jnp.concatenate([p["dec_wih"], p["dec_whh"]], axis=0)        # (2H+E+H, 4H)
    q["dec_b"] = p["dec_b"]
    q["fco_w"] = jnp.pad(p["fc_out_w"], ((0, 0), (0, Vp - V)))                # lane-dense vocab
    q["fco_b"] = jnp.pad(p["fc_out_b"], ((0, 0), (0, Vp - V)), constant_values=-1e30)
    return q


def seq2seq_attention_forward(q, source, target, tf_flags):
    S, B = source.shape
    E = q["emb_src"].shape[1]
    H = q["whh2"].shape[1]
    V = q["emb_trg"].shape[0]

    # ---------------- encoder ----------------
    emb = jnp.take(q["emb_src"], source, axis=0)                              # (S, B, E)
    # hoisted input projection for BOTH directions in one XLA matmul
    xproj = (jnp.dot(emb.reshape(S * B, E), q["w_ih"]) + q["b_ih"]).reshape(S, B, 8 * H)
    xproj2 = jnp.stack([xproj[:, :, :4 * H], xproj[::-1, :, 4 * H:]], axis=0)  # (2,S,B,4H)

    h_all, c_fin = bilstm_encoder(xproj2, q["whh2"])                          # (2,S,B,H),(2,B,H)

    enc_bsh = jnp.transpose(
        jnp.concatenate([h_all[0], h_all[1][::-1]], axis=-1), (1, 0, 2))      # (B, S, 2H)
    h_last = jnp.concatenate([h_all[0, -1], h_all[1, -1]], axis=1)            # (B, 2H)
    c_last = jnp.concatenate([c_fin[0], c_fin[1]], axis=1)                    # (B, 2H)

    # ---------------- decoder (all T-1 steps fused in one kernel) ----------------
    dec_out = fused_decoder(tf_flags, target.astype(jnp.int32),
                            h_last, c_last, enc_bsh,
                            q["fc_hid_w"], q["fc_hid_b"],
                            q["fc_cell_w"], q["fc_cell_b"],
                            q["weh"], q["wee"], q["be"], q["emb_trg"],
                            q["dec_w"], q["dec_b"], q["fco_w"], q["fco_b"])    # (T-1,B,Vp)

    outputs = jnp.concatenate(
        [jnp.zeros((1, B, V), jnp.float32), dec_out[:, :, :V]], axis=0)        # (T, B, V)
    return outputs


forward_jit = jax.jit(seq2seq_attention_forward)


# ----------------------------------------------------------------------------- main

if __name__ == "__main__":
    random.seed(0)  # deterministic teacher forcing decisions

    B = 2          # batch
    S = 8          # source length
    T = 8          # target length
    E = 16         # embedding dim
    H = 32         # hidden dim
    SRC_VOCAB = 50
    TRG_VOCAB = 64
    RATIO = 0.5

    key = jax.random.PRNGKey(0)
    kp, ks, kt = jax.random.split(key, 3)

    params = make_params(kp, SRC_VOCAB, TRG_VOCAB, E, H)
    packed = prepare_params(params)          # one-time weight packing (outside forward)

    source = jax.random.randint(ks, (S, B), 0, SRC_VOCAB, dtype=jnp.int32)
    target = jax.random.randint(kt, (T, B), 0, TRG_VOCAB, dtype=jnp.int32)

    # teacher-forcing decisions drawn once on the host, same semantics as the
    # per-step random.random() < ratio of the PyTorch module
    tf_flags = jnp.array([1 if random.random() < RATIO else 0 for _ in range(T - 1)],
                         dtype=jnp.int32)

    outputs = forward_jit(packed, source, target, tf_flags)
    jax.block_until_ready(outputs)

    assert outputs.shape == (T, B, TRG_VOCAB)
    assert bool(jnp.all(outputs[0] == 0.0))  # outputs[0] never written, like the PyTorch module
    print("KERNEL_OK")
</pallas_src>

<mosaic_0001>
module attributes {stable_mosaic.version = 11 : i64} {
  func.func @bilstm_encoder_kernel(%arg0: i32, %arg1: memref<1x8x2x128xf32, #tpu.memory_space<vmem>>, %arg2: memref<1x32x128xf32, #tpu.memory_space<vmem>>, %arg3: memref<1x8x2x32xf32, #tpu.memory_space<vmem>>, %arg4: memref<1x2x32xf32, #tpu.memory_space<vmem>>) attributes {dimension_semantics = [#tpu.dimension_semantics<parallel>], iteration_bounds = array<i64: 2>, scalar_prefetch = 0 : i64, scratch_operands = 0 : i64, tpu.core_type = #tpu.core_type<tc>, window_params = [{transform_indices = @transform_0, window_bounds = array<i64: 1, 8, 2, 128>}, {transform_indices = @transform_1, window_bounds = array<i64: 1, 32, 128>}, {transform_indices = @transform_2, window_bounds = array<i64: 1, 8, 2, 32>}, {transform_indices = @transform_3, window_bounds = array<i64: 1, 2, 32>}]} {
    %c0 = arith.constant 0 : index
    %c0_0 = arith.constant 0 : index
    %c0_1 = arith.constant 0 : index
    %0 = vector.load %arg2[%c0, %c0_0, %c0_1] : memref<1x32x128xf32, #tpu.memory_space<vmem>>, vector<1x32x128xf32>
    %1 = vector.shape_cast %0 : vector<1x32x128xf32> to vector<32x128xf32>
    %cst = arith.constant 0.000000e+00 : f32
    %2 = vector.broadcast %cst : f32 to vector<2x32xf32>
    %cst_2 = arith.constant 0.000000e+00 : f32
    %3 = vector.broadcast %cst_2 : f32 to vector<2x32xf32>
    %c0_3 = arith.constant 0 : index
    %c0_4 = arith.constant 0 : index
    %c0_5 = arith.constant 0 : index
    %c0_6 = arith.constant 0 : index
    %4 = vector.load %arg1[%c0_3, %c0_4, %c0_5, %c0_6] : memref<1x8x2x128xf32, #tpu.memory_space<vmem>>, vector<1x1x2x128xf32>
    %5 = vector.shape_cast %4 : vector<1x1x2x128xf32> to vector<2x128xf32>
    %cst_7 = arith.constant dense<0.000000e+00> : vector<2x128xf32>
    %6 = tpu.matmul %2, %1, %cst_7 {dimension_numbers = #tpu.dot_dimension_numbers<[1], [0], [0], [1], [0, 0, 1, 1], [], []>} : vector<2x32xf32>, vector<32x128xf32>, vector<2x128xf32> -> vector<2x128xf32>
    %7 = arith.addf %5, %6 : vector<2x128xf32>
    %8 = arith.negf %7 : vector<2x128xf32>
    %9 = math.exp %8 : vector<2x128xf32>
    %cst_8 = arith.constant 1.000000e+00 : f32
    %10 = vector.broadcast %cst_8 : f32 to vector<2x128xf32>
    %11 = arith.addf %10, %9 : vector<2x128xf32>
    %12 = arith.divf %10, %11 : vector<2x128xf32>
    %13 = vector.extract_strided_slice %12 {offsets = [0, 0], sizes = [2, 32], strides = [1, 1]} : vector<2x128xf32> to vector<2x32xf32>
    %14 = vector.extract_strided_slice %12 {offsets = [0, 32], sizes = [2, 32], strides = [1, 1]} : vector<2x128xf32> to vector<2x32xf32>
    %15 = vector.extract_strided_slice %12 {offsets = [0, 96], sizes = [2, 32], strides = [1, 1]} : vector<2x128xf32> to vector<2x32xf32>
    %16 = vector.extract_strided_slice %7 {offsets = [0, 64], sizes = [2, 32], strides = [1, 1]} : vector<2x128xf32> to vector<2x32xf32>
    %17 = math.tanh %16 : vector<2x32xf32>
    %18 = arith.mulf %14, %3 : vector<2x32xf32>
    %19 = arith.mulf %13, %17 : vector<2x32xf32>
    %20 = arith.addf %18, %19 : vector<2x32xf32>
    %21 = math.tanh %20 : vector<2x32xf32>
    %22 = arith.mulf %15, %21 : vector<2x32xf32>
    %c0_9 = arith.constant 0 : index
    %c0_10 = arith.constant 0 : index
    %c0_11 = arith.constant 0 : index
    %c0_12 = arith.constant 0 : index
    %23 = vector.load %arg3[%c0_9, %c0_10, %c0_11, %c0_12] : memref<1x8x2x32xf32, #tpu.memory_space<vmem>>, vector<1x1x2x32xf32>
    %24 = vector.shape_cast %23 : vector<1x1x2x32xf32> to vector<2x32xf32>
    %25 = vector.shape_cast %22 : vector<2x32xf32> to vector<1x1x2x32xf32>
    tpu.vector_store %arg3[%c0_9, %c0_10, %c0_11, %c0_12], %25 {strides = array<i32>} : memref<1x8x2x32xf32, #tpu.memory_space<vmem>>, vector<1x1x2x32xf32>,
    %c0_13 = arith.constant 0 : index
    %c1 = arith.constant 1 : index
    %c0_14 = arith.constant 0 : index
    %c0_15 = arith.constant 0 : index
    %26 = vector.load %arg1[%c0_13, %c1, %c0_14, %c0_15] : memref<1x8x2x128xf32, #tpu.memory_space<vmem>>, vector<1x1x2x128xf32>
    %27 = vector.shape_cast %26 : vector<1x1x2x128xf32> to vector<2x128xf32>
    %cst_16 = arith.constant dense<0.000000e+00> : vector<2x128xf32>
    %28 = tpu.matmul %22, %1, %cst_16 {dimension_numbers = #tpu.dot_dimension_numbers<[1], [0], [0], [1], [0, 0, 1, 1], [], []>} : vector<2x32xf32>, vector<32x128xf32>, vector<2x128xf32> -> vector<2x128xf32>
    %29 = arith.addf %27, %28 : vector<2x128xf32>
    %30 = arith.negf %29 : vector<2x128xf32>
    %31 = math.exp %30 : vector<2x128xf32>
    %cst_17 = arith.constant 1.000000e+00 : f32
    %32 = vector.broadcast %cst_17 : f32 to vector<2x128xf32>
    %33 = arith.addf %32, %31 : vector<2x128xf32>
    %34 = arith.divf %32, %33 : vector<2x128xf32>
    %35 = vector.extract_strided_slice %34 {offsets = [0, 0], sizes = [2, 32], strides = [1, 1]} : vector<2x128xf32> to vector<2x32xf32>
    %36 = vector.extract_strided_slice %34 {offsets = [0, 32], sizes = [2, 32], strides = [1, 1]} : vector<2x128xf32> to vector<2x32xf32>
    %37 = vector.extract_strided_slice %34 {offsets = [0, 96], sizes = [2, 32], strides = [1, 1]} : vector<2x128xf32> to vector<2x32xf32>
    %38 = vector.extract_strided_slice %29 {offsets = [0, 64], sizes = [2, 32], strides = [1, 1]} : vector<2x128xf32> to vector<2x32xf32>
    %39 = math.tanh %38 : vector<2x32xf32>
    %40 = arith.mulf %36, %20 : vector<2x32xf32>
    %41 = arith.mulf %35, %39 : vector<2x32xf32>
    %42 = arith.addf %40, %41 : vector<2x32xf32>
    %43 = math.tanh %42 : vector<2x32xf32>
    %44 = arith.mulf %37, %43 : vector<2x32xf32>
    %c0_18 = arith.constant 0 : index
    %c1_19 = arith.constant 1 : index
    %c0_20 = arith.constant 0 : index
    %c0_21 = arith.constant 0 : index
    %45 = vector.load %arg3[%c0_18, %c1_19, %c0_20, %c0_21] : memref<1x8x2x32xf32, #tpu.memory_space<vmem>>, vector<1x1x2x32xf32>
    %46 = vector.shape_cast %45 : vector<1x1x2x32xf32> to vector<2x32xf32>
    %47 = vector.shape_cast %44 : vector<2x32xf32> to vector<1x1x2x32xf32>
    tpu.vector_store %arg3[%c0_18, %c1_19, %c0_20, %c0_21], %47 {strides = array<i32>} : memref<1x8x2x32xf32, #tpu.memory_space<vmem>>, vector<1x1x2x32xf32>,
    %c0_22 = arith.constant 0 : index
    %c2 = arith.constant 2 : index
    %c0_23 = arith.constant 0 : index
    %c0_24 = arith.constant 0 : index
    %48 = vector.load %arg1[%c0_22, %c2, %c0_23, %c0_24] : memref<1x8x2x128xf32, #tpu.memory_space<vmem>>, vector<1x1x2x128xf32>
    %49 = vector.shape_cast %48 : vector<1x1x2x128xf32> to vector<2x128xf32>
    %cst_25 = arith.constant dense<0.000000e+00> : vector<2x128xf32>
    %50 = tpu.matmul %44, %1, %cst_25 {dimension_numbers = #tpu.dot_dimension_numbers<[1], [0], [0], [1], [0, 0, 1, 1], [], []>} : vector<2x32xf32>, vector<32x128xf32>, vector<2x128xf32> -> vector<2x128xf32>
    %51 = arith.addf %49, %50 : vector<2x128xf32>
    %52 = arith.negf %51 : vector<2x128xf32>
    %53 = math.exp %52 : vector<2x128xf32>
    %cst_26 = arith.constant 1.000000e+00 : f32
    %54 = vector.broadcast %cst_26 : f32 to vector<2x128xf32>
    %55 = arith.addf %54, %53 : vector<2x128xf32>
    %56 = arith.divf %54, %55 : vector<2x128xf32>
    %57 = vector.extract_strided_slice %56 {offsets = [0, 0], sizes = [2, 32], strides = [1, 1]} : vector<2x128xf32> to vector<2x32xf32>
    %58 = vector.extract_strided_slice %56 {offsets = [0, 32], sizes = [2, 32], strides = [1, 1]} : vector<2x128xf32> to vector<2x32xf32>
    %59 = vector.extract_strided_slice %56 {offsets = [0, 96], sizes = [2, 32], strides = [1, 1]} : vector<2x128xf32> to vector<2x32xf32>
    %60 = vector.extract_strided_slice %51 {offsets = [0, 64], sizes = [2, 32], strides = [1, 1]} : vector<2x128xf32> to vector<2x32xf32>
    %61 = math.tanh %60 : vector<2x32xf32>
    %62 = arith.mulf %58, %42 : vector<2x32xf32>
    %63 = arith.mulf %57, %61 : vector<2x32xf32>
    %64 = arith.addf %62, %63 : vector<2x32xf32>
    %65 = math.tanh %64 : vector<2x32xf32>
    %66 = arith.mulf %59, %65 : vector<2x32xf32>
    %c0_27 = arith.constant 0 : index
    %c2_28 = arith.constant 2 : index
    %c0_29 = arith.constant 0 : index
    %c0_30 = arith.constant 0 : index
    %67 = vector.load %arg3[%c0_27, %c2_28, %c0_29, %c0_30] : memref<1x8x2x32xf32, #tpu.memory_space<vmem>>, vector<1x1x2x32xf32>
    %68 = vector.shape_cast %67 : vector<1x1x2x32xf32> to vector<2x32xf32>
    %69 = vector.shape_cast %66 : vector<2x32xf32> to vector<1x1x2x32xf32>
    tpu.vector_store %arg3[%c0_27, %c2_28, %c0_29, %c0_30], %69 {strides = array<i32>} : memref<1x8x2x32xf32, #tpu.memory_space<vmem>>, vector<1x1x2x32xf32>,
    %c0_31 = arith.constant 0 : index
    %c3 = arith.constant 3 : index
    %c0_32 = arith.constant 0 : index
    %c0_33 = arith.constant 0 : index
    %70 = vector.load %arg1[%c0_31, %c3, %c0_32, %c0_33] : memref<1x8x2x128xf32, #tpu.memory_space<vmem>>, vector<1x1x2x128xf32>
    %71 = vector.shape_cast %70 : vector<1x1x2x128xf32> to vector<2x128xf32>
    %cst_34 = arith.constant dense<0.000000e+00> : vector<2x128xf32>
    %72 = tpu.matmul %66, %1, %cst_34 {dimension_numbers = #tpu.dot_dimension_numbers<[1], [0], [0], [1], [0, 0, 1, 1], [], []>} : vector<2x32xf32>, vector<32x128xf32>, vector<2x128xf32> -> vector<2x128xf32>
    %73 = arith.addf %71, %72 : vector<2x128xf32>
    %74 = arith.negf %73 : vector<2x128xf32>
    %75 = math.exp %74 : vector<2x128xf32>
    %cst_35 = arith.constant 1.000000e+00 : f32
    %76 = vector.broadcast %cst_35 : f32 to vector<2x128xf32>
    %77 = arith.addf %76, %75 : vector<2x128xf32>
    %78 = arith.divf %76, %77 : vector<2x128xf32>
    %79 = vector.extract_strided_slice %78 {offsets = [0, 0], sizes = [2, 32], strides = [1, 1]} : vector<2x128xf32> to vector<2x32xf32>
    %80 = vector.extract_strided_slice %78 {offsets = [0, 32], sizes = [2, 32], strides = [1, 1]} : vector<2x128xf32> to vector<2x32xf32>
    %81 = vector.extract_strided_slice %78 {offsets = [0, 96], sizes = [2, 32], strides = [1, 1]} : vector<2x128xf32> to vector<2x32xf32>
    %82 = vector.extract_strided_slice %73 {offsets = [0, 64], sizes = [2, 32], strides = [1, 1]} : vector<2x128xf32> to vector<2x32xf32>
    %83 = math.tanh %82 : vector<2x32xf32>
    %84 = arith.mulf %80, %64 : vector<2x32xf32>
    %85 = arith.mulf %79, %83 : vector<2x32xf32>
    %86 = arith.addf %84, %85 : vector<2x32xf32>
    %87 = math.tanh %86 : vector<2x32xf32>
    %88 = arith.mulf %81, %87 : vector<2x32xf32>
    %c0_36 = arith.constant 0 : index
    %c3_37 = arith.constant 3 : index
    %c0_38 = arith.constant 0 : index
    %c0_39 = arith.constant 0 : index
    %89 = vector.load %arg3[%c0_36, %c3_37, %c0_38, %c0_39] : memref<1x8x2x32xf32, #tpu.memory_space<vmem>>, vector<1x1x2x32xf32>
    %90 = vector.shape_cast %89 : vector<1x1x2x32xf32> to vector<2x32xf32>
    %91 = vector.shape_cast %88 : vector<2x32xf32> to vector<1x1x2x32xf32>
    tpu.vector_store %arg3[%c0_36, %c3_37, %c0_38, %c0_39], %91 {strides = array<i32>} : memref<1x8x2x32xf32, #tpu.memory_space<vmem>>, vector<1x1x2x32xf32>,
    %c0_40 = arith.constant 0 : index
    %c4 = arith.constant 4 : index
    %c0_41 = arith.constant 0 : index
    %c0_42 = arith.constant 0 : index
    %92 = vector.load %arg1[%c0_40, %c4, %c0_41, %c0_42] : memref<1x8x2x128xf32, #tpu.memory_space<vmem>>, vector<1x1x2x128xf32>
    %93 = vector.shape_cast %92 : vector<1x1x2x128xf32> to vector<2x128xf32>
    %cst_43 = arith.constant dense<0.000000e+00> : vector<2x128xf32>
    %94 = tpu.matmul %88, %1, %cst_43 {dimension_numbers = #tpu.dot_dimension_numbers<[1], [0], [0], [1], [0, 0, 1, 1], [], []>} : vector<2x32xf32>, vector<32x128xf32>, vector<2x128xf32> -> vector<2x128xf32>
    %95 = arith.addf %93, %94 : vector<2x128xf32>
    %96 = arith.negf %95 : vector<2x128xf32>
    %97 = math.exp %96 : vector<2x128xf32>
    %cst_44 = arith.constant 1.000000e+00 : f32
    %98 = vector.broadcast %cst_44 : f32 to vector<2x128xf32>
    %99 = arith.addf %98, %97 : vector<2x128xf32>
    %100 = arith.divf %98, %99 : vector<2x128xf32>
    %101 = vector.extract_strided_slice %100 {offsets = [0, 0], sizes = [2, 32], strides = [1, 1]} : vector<2x128xf32> to vector<2x32xf32>
    %102 = vector.extract_strided_slice %100 {offsets = [0, 32], sizes = [2, 32], strides = [1, 1]} : vector<2x128xf32> to vector<2x32xf32>
    %103 = vector.extract_strided_slice %100 {offsets = [0, 96], sizes = [2, 32], strides = [1, 1]} : vector<2x128xf32> to vector<2x32xf32>
    %104 = vector.extract_strided_slice %95 {offsets = [0, 64], sizes = [2, 32], strides = [1, 1]} : vector<2x128xf32> to vector<2x32xf32>
    %105 = math.tanh %104 : vector<2x32xf32>
    %106 = arith.mulf %102, %86 : vector<2x32xf32>
    %107 = arith.mulf %101, %105 : vector<2x32xf32>
    %108 = arith.addf %106, %107 : vector<2x32xf32>
    %109 = math.tanh %108 : vector<2x32xf32>
    %110 = arith.mulf %103, %109 : vector<2x32xf32>
    %c0_45 = arith.constant 0 : index
    %c4_46 = arith.constant 4 : index
    %c0_47 = arith.constant 0 : index
    %c0_48 = arith.constant 0 : index
    %111 = vector.load %arg3[%c0_45, %c4_46, %c0_47, %c0_48] : memref<1x8x2x32xf32, #tpu.memory_space<vmem>>, vector<1x1x2x32xf32>
    %112 = vector.shape_cast %111 : vector<1x1x2x32xf32> to vector<2x32xf32>
    %113 = vector.shape_cast %110 : vector<2x32xf32> to vector<1x1x2x32xf32>
    tpu.vector_store %arg3[%c0_45, %c4_46, %c0_47, %c0_48], %113 {strides = array<i32>} : memref<1x8x2x32xf32, #tpu.memory_space<vmem>>, vector<1x1x2x32xf32>,
    %c0_49 = arith.constant 0 : index
    %c5 = arith.constant 5 : index
    %c0_50 = arith.constant 0 : index
    %c0_51 = arith.constant 0 : index
    %114 = vector.load %arg1[%c0_49, %c5, %c0_50, %c0_51] : memref<1x8x2x128xf32, #tpu.memory_space<vmem>>, vector<1x1x2x128xf32>
    %115 = vector.shape_cast %114 : vector<1x1x2x128xf32> to vector<2x128xf32>
    %cst_52 = arith.constant dense<0.000000e+00> : vector<2x128xf32>
    %116 = tpu.matmul %110, %1, %cst_52 {dimension_numbers = #tpu.dot_dimension_numbers<[1], [0], [0], [1], [0, 0, 1, 1], [], []>} : vector<2x32xf32>, vector<32x128xf32>, vector<2x128xf32> -> vector<2x128xf32>
    %117 = arith.addf %115, %116 : vector<2x128xf32>
    %118 = arith.negf %117 : vector<2x128xf32>
    %119 = math.exp %118 : vector<2x128xf32>
    %cst_53 = arith.constant 1.000000e+00 : f32
    %120 = vector.broadcast %cst_53 : f32 to vector<2x128xf32>
    %121 = arith.addf %120, %119 : vector<2x128xf32>
    %122 = arith.divf %120, %121 : vector<2x128xf32>
    %123 = vector.extract_strided_slice %122 {offsets = [0, 0], sizes = [2, 32], strides = [1, 1]} : vector<2x128xf32> to vector<2x32xf32>
    %124 = vector.extract_strided_slice %122 {offsets = [0, 32], sizes = [2, 32], strides = [1, 1]} : vector<2x128xf32> to vector<2x32xf32>
    %125 = vector.extract_strided_slice %122 {offsets = [0, 96], sizes = [2, 32], strides = [1, 1]} : vector<2x128xf32> to vector<2x32xf32>
    %126 = vector.extract_strided_slice %117 {offsets = [0, 64], sizes = [2, 32], strides = [1, 1]} : vector<2x128xf32> to vector<2x32xf32>
    %127 = math.tanh %126 : vector<2x32xf32>
    %128 = arith.mulf %124, %108 : vector<2x32xf32>
    %129 = arith.mulf %123, %127 : vector<2x32xf32>
    %130 = arith.addf %128, %129 : vector<2x32xf32>
    %131 = math.tanh %130 : vector<2x32xf32>
    %132 = arith.mulf %125, %131 : vector<2x32xf32>
    %c0_54 = arith.constant 0 : index
    %c5_55 = arith.constant 5 : index
    %c0_56 = arith.constant 0 : index
    %c0_57 = arith.constant 0 : index
    %133 = vector.load %arg3[%c0_54, %c5_55, %c0_56, %c0_57] : memref<1x8x2x32xf32, #tpu.memory_space<vmem>>, vector<1x1x2x32xf32>
    %134 = vector.shape_cast %133 : vector<1x1x2x32xf32> to vector<2x32xf32>
    %135 = vector.shape_cast %132 : vector<2x32xf32> to vector<1x1x2x32xf32>
    tpu.vector_store %arg3[%c0_54, %c5_55, %c0_56, %c0_57], %135 {strides = array<i32>} : memref<1x8x2x32xf32, #tpu.memory_space<vmem>>, vector<1x1x2x32xf32>,
    %c0_58 = arith.constant 0 : index
    %c6 = arith.constant 6 : index
    %c0_59 = arith.constant 0 : index
    %c0_60 = arith.constant 0 : index
    %136 = vector.load %arg1[%c0_58, %c6, %c0_59, %c0_60] : memref<1x8x2x128xf32, #tpu.memory_space<vmem>>, vector<1x1x2x128xf32>
    %137 = vector.shape_cast %136 : vector<1x1x2x128xf32> to vector<2x128xf32>
    %cst_61 = arith.constant dense<0.000000e+00> : vector<2x128xf32>
    %138 = tpu.matmul %132, %1, %cst_61 {dimension_numbers = #tpu.dot_dimension_numbers<[1], [0], [0], [1], [0, 0, 1, 1], [], []>} : vector<2x32xf32>, vector<32x128xf32>, vector<2x128xf32> -> vector<2x128xf32>
    %139 = arith.addf %137, %138 : vector<2x128xf32>
    %140 = arith.negf %139 : vector<2x128xf32>
    %141 = math.exp %140 : vector<2x128xf32>
    %cst_62 = arith.constant 1.000000e+00 : f32
    %142 = vector.broadcast %cst_62 : f32 to vector<2x128xf32>
    %143 = arith.addf %142, %141 : vector<2x128xf32>
    %144 = arith.divf %142, %143 : vector<2x128xf32>
    %145 = vector.extract_strided_slice %144 {offsets = [0, 0], sizes = [2, 32], strides = [1, 1]} : vector<2x128xf32> to vector<2x32xf32>
    %146 = vector.extract_strided_slice %144 {offsets = [0, 32], sizes = [2, 32], strides = [1, 1]} : vector<2x128xf32> to vector<2x32xf32>
    %147 = vector.extract_strided_slice %144 {offsets = [0, 96], sizes = [2, 32], strides = [1, 1]} : vector<2x128xf32> to vector<2x32xf32>
    %148 = vector.extract_strided_slice %139 {offsets = [0, 64], sizes = [2, 32], strides = [1, 1]} : vector<2x128xf32> to vector<2x32xf32>
    %149 = math.tanh %148 : vector<2x32xf32>
    %150 = arith.mulf %146, %130 : vector<2x32xf32>
    %151 = arith.mulf %145, %149 : vector<2x32xf32>
    %152 = arith.addf %150, %151 : vector<2x32xf32>
    %153 = math.tanh %152 : vector<2x32xf32>
    %154 = arith.mulf %147, %153 : vector<2x32xf32>
    %c0_63 = arith.constant 0 : index
    %c6_64 = arith.constant 6 : index
    %c0_65 = arith.constant 0 : index
    %c0_66 = arith.constant 0 : index
    %155 = vector.load %arg3[%c0_63, %c6_64, %c0_65, %c0_66] : memref<1x8x2x32xf32, #tpu.memory_space<vmem>>, vector<1x1x2x32xf32>
    %156 = vector.shape_cast %155 : vector<1x1x2x32xf32> to vector<2x32xf32>
    %157 = vector.shape_cast %154 : vector<2x32xf32> to vector<1x1x2x32xf32>
    tpu.vector_store %arg3[%c0_63, %c6_64, %c0_65, %c0_66], %157 {strides = array<i32>} : memref<1x8x2x32xf32, #tpu.memory_space<vmem>>, vector<1x1x2x32xf32>,
    %c0_67 = arith.constant 0 : index
    %c7 = arith.constant 7 : index
    %c0_68 = arith.constant 0 : index
    %c0_69 = arith.constant 0 : index
    %158 = vector.load %arg1[%c0_67, %c7, %c0_68, %c0_69] : memref<1x8x2x128xf32, #tpu.memory_space<vmem>>, vector<1x1x2x128xf32>
    %159 = vector.shape_cast %158 : vector<1x1x2x128xf32> to vector<2x128xf32>
    %cst_70 = arith.constant dense<0.000000e+00> : vector<2x128xf32>
    %160 = tpu.matmul %154, %1, %cst_70 {dimension_numbers = #tpu.dot_dimension_numbers<[1], [0], [0], [1], [0, 0, 1, 1], [], []>} : vector<2x32xf32>, vector<32x128xf32>, vector<2x128xf32> -> vector<2x128xf32>
    %161 = arith.addf %159, %160 : vector<2x128xf32>
    %162 = arith.negf %161 : vector<2x128xf32>
    %163 = math.exp %162 : vector<2x128xf32>
    %cst_71 = arith.constant 1.000000e+00 : f32
    %164 = vector.broadcast %cst_71 : f32 to vector<2x128xf32>
    %165 = arith.addf %164, %163 : vector<2x128xf32>
    %166 = arith.divf %164, %165 : vector<2x128xf32>
    %167 = vector.extract_strided_slice %166 {offsets = [0, 0], sizes = [2, 32], strides = [1, 1]} : vector<2x128xf32> to vector<2x32xf32>
    %168 = vector.extract_strided_slice %166 {offsets = [0, 32], sizes = [2, 32], strides = [1, 1]} : vector<2x128xf32> to vector<2x32xf32>
    %169 = vector.extract_strided_slice %166 {offsets = [0, 96], sizes = [2, 32], strides = [1, 1]} : vector<2x128xf32> to vector<2x32xf32>
    %170 = vector.extract_strided_slice %161 {offsets = [0, 64], sizes = [2, 32], strides = [1, 1]} : vector<2x128xf32> to vector<2x32xf32>
    %171 = math.tanh %170 : vector<2x32xf32>
    %172 = arith.mulf %168, %152 : vector<2x32xf32>
    %173 = arith.mulf %167, %171 : vector<2x32xf32>
    %174 = arith.addf %172, %173 : vector<2x32xf32>
    %175 = math.tanh %174 : vector<2x32xf32>
    %176 = arith.mulf %169, %175 : vector<2x32xf32>
    %c0_72 = arith.constant 0 : index
    %c7_73 = arith.constant 7 : index
    %c0_74 = arith.constant 0 : index
    %c0_75 = arith.constant 0 : index
    %177 = vector.load %arg3[%c0_72, %c7_73, %c0_74, %c0_75] : memref<1x8x2x32xf32, #tpu.memory_space<vmem>>, vector<1x1x2x32xf32>
    %178 = vector.shape_cast %177 : vector<1x1x2x32xf32> to vector<2x32xf32>
    %179 = vector.shape_cast %176 : vector<2x32xf32> to vector<1x1x2x32xf32>
    tpu.vector_store %arg3[%c0_72, %c7_73, %c0_74, %c0_75], %179 {strides = array<i32>} : memref<1x8x2x32xf32, #tpu.memory_space<vmem>>, vector<1x1x2x32xf32>,
    %c0_76 = arith.constant 0 : index
    %c0_77 = arith.constant 0 : index
    %c0_78 = arith.constant 0 : index
    %180 = vector.load %arg4[%c0_76, %c0_77, %c0_78] : memref<1x2x32xf32, #tpu.memory_space<vmem>>, vector<1x2x32xf32>
    %181 = vector.shape_cast %180 : vector<1x2x32xf32> to vector<2x32xf32>
    %182 = vector.shape_cast %174 : vector<2x32xf32> to vector<1x2x32xf32>
    tpu.vector_store %arg4[%c0_76, %c0_77, %c0_78], %182 {strides = array<i32>} : memref<1x2x32xf32, #tpu.memory_space<vmem>>, vector<1x2x32xf32>,
    return
  }
  func.func @transform_0(%arg0: i32) -> (i32, i32, i32, i32) {
    %c0_i32 = arith.constant 0 : i32
    %c0_i32_0 = arith.constant 0 : i32
    %c0_i32_1 = arith.constant 0 : i32
    %c0_i32_2 = arith.constant 0 : i32
    return %arg0, %c0_i32, %c0_i32_0, %c0_i32_1 : i32, i32, i32, i32
  }
  func.func @transform_1(%arg0: i32) -> (i32, i32, i32) {
    %c0_i32 = arith.constant 0 : i32
    %c0_i32_0 = arith.constant 0 : i32
    %c0_i32_1 = arith.constant 0 : i32
    return %arg0, %c0_i32, %c0_i32_0 : i32, i32, i32
  }
  func.func @transform_2(%arg0: i32) -> (i32, i32, i32, i32) {
    %c0_i32 = arith.constant 0 : i32
    %c0_i32_0 = arith.constant 0 : i32
    %c0_i32_1 = arith.constant 0 : i32
    %c0_i32_2 = arith.constant 0 : i32
    return %arg0, %c0_i32, %c0_i32_0, %c0_i32_1 : i32, i32, i32, i32
  }
  func.func @transform_3(%arg0: i32) -> (i32, i32, i32) {
    %c0_i32 = arith.constant 0 : i32
    %c0_i32_0 = arith.constant 0 : i32
    %c0_i32_1 = arith.constant 0 : i32
    return %arg0, %c0_i32, %c0_i32_0 : i32, i32, i32
  }
}

module attributes {stable_mosaic.version = 11 : i64} {
  func.func @decoder_kernel(%arg0: memref<7xi32, #tpu.memory_space<smem>>, %arg1: memref<8x2xi32, #tpu.memory_space<smem>>, %arg2: memref<2x64xf32, #tpu.memory_space<vmem>>, %arg3: memref<2x64xf32, #tpu.memory_space<vmem>>, %arg4: memref<2x8x64xf32, #tpu.memory_space<vmem>>, %arg5: memref<64x32xf32, #tpu.memory_space<vmem>>, %arg6: memref<1x32xf32, #tpu.memory_space<vmem>>, %arg7: memref<64x32xf32, #tpu.memory_space<vmem>>, %arg8: memref<1x32xf32, #tpu.memory_space<vmem>>, %arg9: memref<1x32xf32, #tpu.memory_space<vmem>>, %arg10: memref<1x64xf32, #tpu.memory_space<vmem>>, %arg11: memref<1x1xf32, #tpu.memory_space<vmem>>, %arg12: memref<64x16xf32, #tpu.memory_space<vmem>>, %arg13: memref<112x128xf32, #tpu.memory_space<vmem>>, %arg14: memref<1x128xf32, #tpu.memory_space<vmem>>, %arg15: memref<32x128xf32, #tpu.memory_space<vmem>>, %arg16: memref<1x128xf32, #tpu.memory_space<vmem>>, %arg17: memref<7x2x128xf32, #tpu.memory_space<vmem>>) attributes {dimension_semantics = [], scalar_prefetch = 0 : i64, scratch_operands = 0 : i64, tpu.core_type = #tpu.core_type<tc>} {
    %c0 = arith.constant 0 : index
    %c0_0 = arith.constant 0 : index
    %c0_1 = arith.constant 0 : index
    %0 = vector.load %arg4[%c0, %c0_0, %c0_1] : memref<2x8x64xf32, #tpu.memory_space<vmem>>, vector<2x8x64xf32>
    %c0_2 = arith.constant 0 : index
    %c0_3 = arith.constant 0 : index
    %1 = vector.load %arg9[%c0_2, %c0_3] : memref<1x32xf32, #tpu.memory_space<vmem>>, vector<1x32xf32>
    %c0_4 = arith.constant 0 : index
    %c0_5 = arith.constant 0 : index
    %2 = vector.load %arg11[%c0_4, %c0_5] : memref<1x1xf32, #tpu.memory_space<vmem>>, vector<1x1xf32>
    %c0_6 = arith.constant 0 : index
    %c0_7 = arith.constant 0 : index
    %3 = vector.load %arg12[%c0_6, %c0_7] : memref<64x16xf32, #tpu.memory_space<vmem>>, vector<64x16xf32>
    %c0_8 = arith.constant 0 : index
    %c0_9 = arith.constant 0 : index
    %4 = vector.load %arg13[%c0_8, %c0_9] : memref<112x128xf32, #tpu.memory_space<vmem>>, vector<112x128xf32>
    %c0_10 = arith.constant 0 : index
    %c0_11 = arith.constant 0 : index
    %5 = vector.load %arg14[%c0_10, %c0_11] : memref<1x128xf32, #tpu.memory_space<vmem>>, vector<1x128xf32>
    %c0_12 = arith.constant 0 : index
    %c0_13 = arith.constant 0 : index
    %6 = vector.load %arg15[%c0_12, %c0_13] : memref<32x128xf32, #tpu.memory_space<vmem>>, vector<32x128xf32>
    %c0_14 = arith.constant 0 : index
    %c0_15 = arith.constant 0 : index
    %7 = vector.load %arg16[%c0_14, %c0_15] : memref<1x128xf32, #tpu.memory_space<vmem>>, vector<1x128xf32>
    %c0_16 = arith.constant 0 : index
    %c0_17 = arith.constant 0 : index
    %8 = vector.load %arg2[%c0_16, %c0_17] : memref<2x64xf32, #tpu.memory_space<vmem>>, vector<2x64xf32>
    %c0_18 = arith.constant 0 : index
    %c0_19 = arith.constant 0 : index
    %9 = vector.load %arg5[%c0_18, %c0_19] : memref<64x32xf32, #tpu.memory_space<vmem>>, vector<64x32xf32>
    %cst = arith.constant dense<0.000000e+00> : vector<2x32xf32>
    %10 = tpu.matmul %8, %9, %cst {dimension_numbers = #tpu.dot_dimension_numbers<[1], [0], [0], [1], [0, 0, 1, 1], [], []>} : vector<2x64xf32>, vector<64x32xf32>, vector<2x32xf32> -> vector<2x32xf32>
    %c0_20 = arith.constant 0 : index
    %c0_21 = arith.constant 0 : index
    %11 = vector.load %arg6[%c0_20, %c0_21] : memref<1x32xf32, #tpu.memory_space<vmem>>, vector<1x32xf32>
    %12 = vector.broadcast %11 : vector<1x32xf32> to vector<2x32xf32>
    %13 = arith.addf %10, %12 : vector<2x32xf32>
    %c0_22 = arith.constant 0 : index
    %c0_23 = arith.constant 0 : index
    %14 = vector.load %arg3[%c0_22, %c0_23] : memref<2x64xf32, #tpu.memory_space<vmem>>, vector<2x64xf32>
    %c0_24 = arith.constant 0 : index
    %c0_25 = arith.constant 0 : index
    %15 = vector.load %arg7[%c0_24, %c0_25] : memref<64x32xf32, #tpu.memory_space<vmem>>, vector<64x32xf32>
    %cst_26 = arith.constant dense<0.000000e+00> : vector<2x32xf32>
    %16 = tpu.matmul %14, %15, %cst_26 {dimension_numbers = #tpu.dot_dimension_numbers<[1], [0], [0], [1], [0, 0, 1, 1], [], []>} : vector<2x64xf32>, vector<64x32xf32>, vector<2x32xf32> -> vector<2x32xf32>
    %c0_27 = arith.constant 0 : index
    %c0_28 = arith.constant 0 : index
    %17 = vector.load %arg8[%c0_27, %c0_28] : memref<1x32xf32, #tpu.memory_space<vmem>>, vector<1x32xf32>
    %18 = vector.broadcast %17 : vector<1x32xf32> to vector<2x32xf32>
    %19 = arith.addf %16, %18 : vector<2x32xf32>
    %c0_29 = arith.constant 0 : index
    %c0_30 = arith.constant 0 : index
    %20 = vector.load %arg10[%c0_29, %c0_30] : memref<1x64xf32, #tpu.memory_space<vmem>>, vector<1x64xf32>
    %21 = vector.shape_cast %20 : vector<1x64xf32> to vector<1x1x64xf32>
    %22 = vector.broadcast %21 : vector<1x1x64xf32> to vector<2x8x64xf32>
    %23 = arith.mulf %0, %22 : vector<2x8x64xf32>
    %cst_31 = arith.constant dense<0.000000e+00> : vector<2x8xf32>
    %24 = vector.multi_reduction <add>, %23, %cst_31 [2] : vector<2x8x64xf32> to vector<2x8xf32>
    %c0_32 = arith.constant 0 : index
    %c0_33 = arith.constant 0 : index
    %25 = memref.load %arg1[%c0_32, %c0_33] : memref<8x2xi32, #tpu.memory_space<smem>>
    %26 = vector.broadcast %25 : i32 to vector<1x1xi32>
    %c0_34 = arith.constant 0 : index
    %c1 = arith.constant 1 : index
    %27 = memref.load %arg1[%c0_34, %c1] : memref<8x2xi32, #tpu.memory_space<smem>>
    %28 = vector.broadcast %27 : i32 to vector<1x1xi32>
    %29 = tpu.concatenate %26, %28 in 0 : vector<1x1xi32>, vector<1x1xi32> -> vector<2x1xi32>
    %30 = tpu.iota {dimensions = array<i32: 1>} : vector<2x64xi32>
    %31 = vector.broadcast %29 : vector<2x1xi32> to vector<2x64xi32>
    %32 = arith.cmpi eq, %30, %31 : vector<2x64xi32>
    %33 = arith.extui %32 : vector<2x64xi1> to vector<2x64xi32>
    %34 = arith.sitofp %33 : vector<2x64xi32> to vector<2x64xf32>
    %cst_35 = arith.constant dense<0.000000e+00> : vector<2x16xf32>
    %35 = tpu.matmul %34, %3, %cst_35 {dimension_numbers = #tpu.dot_dimension_numbers<[1], [0], [0], [1], [0, 0, 1, 1], [], []>} : vector<2x64xf32>, vector<64x16xf32>, vector<2x16xf32> -> vector<2x16xf32>
    %36 = vector.broadcast %1 : vector<1x32xf32> to vector<2x32xf32>
    %37 = arith.mulf %13, %36 : vector<2x32xf32>
    %cst_36 = arith.constant dense<0.000000e+00> : vector<2xf32>
    %38 = vector.multi_reduction <add>, %37, %cst_36 [1] : vector<2x32xf32> to vector<2xf32>
    %39 = vector.shape_cast %38 : vector<2xf32> to vector<2x1xf32>
    %40 = vector.broadcast %39 : vector<2x1xf32> to vector<2x8xf32>
    %41 = arith.addf %24, %40 : vector<2x8xf32>
    %42 = vector.broadcast %2 : vector<1x1xf32> to vector<2x8xf32>
    %43 = arith.addf %41, %42 : vector<2x8xf32>
    %cst_37 = arith.constant 0.000000e+00 : f32
    %44 = vector.broadcast %cst_37 : f32 to vector<2x8xf32>
    %45 = arith.maximumf %43, %44 : vector<2x8xf32>
    %cst_38 = arith.constant dense<0xFF800000> : vector<2xf32>
    %46 = vector.multi_reduction <maximumf>, %45, %cst_38 [1] : vector<2x8xf32> to vector<2xf32>
    %47 = vector.shape_cast %46 : vector<2xf32> to vector<2x1xf32>
    %48 = vector.broadcast %47 : vector<2x1xf32> to vector<2x8xf32>
    %49 = arith.subf %45, %48 : vector<2x8xf32>
    %50 = math.exp %49 : vector<2x8xf32>
    %cst_39 = arith.constant dense<0.000000e+00> : vector<2xf32>
    %51 = vector.multi_reduction <add>, %50, %cst_39 [1] : vector<2x8xf32> to vector<2xf32>
    %52 = vector.shape_cast %51 : vector<2xf32> to vector<2x1xf32>
    %53 = vector.broadcast %52 : vector<2x1xf32> to vector<2x8xf32>
    %54 = arith.divf %50, %53 : vector<2x8xf32>
    %55 = vector.shape_cast %54 : vector<2x8xf32> to vector<2x8x1xf32>
    %56 = vector.broadcast %55 : vector<2x8x1xf32> to vector<2x8x64xf32>
    %57 = arith.mulf %56, %0 : vector<2x8x64xf32>
    %cst_40 = arith.constant dense<0.000000e+00> : vector<2x64xf32>
    %58 = vector.multi_reduction <add>, %57, %cst_40 [1] : vector<2x8x64xf32> to vector<2x64xf32>
    %59 = tpu.concatenate %58, %35, %13 in 1 : vector<2x64xf32>, vector<2x16xf32>, vector<2x32xf32> -> vector<2x112xf32>
    %cst_41 = arith.constant dense<0.000000e+00> : vector<2x128xf32>
    %60 = tpu.matmul %59, %4, %cst_41 {dimension_numbers = #tpu.dot_dimension_numbers<[1], [0], [0], [1], [0, 0, 1, 1], [], []>} : vector<2x112xf32>, vector<112x128xf32>, vector<2x128xf32> -> vector<2x128xf32>
    %61 = vector.broadcast %5 : vector<1x128xf32> to vector<2x128xf32>
    %62 = arith.addf %60, %61 : vector<2x128xf32>
    %63 = arith.negf %62 : vector<2x128xf32>
    %64 = math.exp %63 : vector<2x128xf32>
    %cst_42 = arith.constant 1.000000e+00 : f32
    %65 = vector.broadcast %cst_42 : f32 to vector<2x128xf32>
    %66 = arith.addf %65, %64 : vector<2x128xf32>
    %67 = arith.divf %65, %66 : vector<2x128xf32>
    %68 = vector.extract_strided_slice %67 {offsets = [0, 0], sizes = [2, 32], strides = [1, 1]} : vector<2x128xf32> to vector<2x32xf32>
    %69 = vector.extract_strided_slice %67 {offsets = [0, 32], sizes = [2, 32], strides = [1, 1]} : vector<2x128xf32> to vector<2x32xf32>
    %70 = vector.extract_strided_slice %67 {offsets = [0, 96], sizes = [2, 32], strides = [1, 1]} : vector<2x128xf32> to vector<2x32xf32>
    %71 = vector.extract_strided_slice %62 {offsets = [0, 64], sizes = [2, 32], strides = [1, 1]} : vector<2x128xf32> to vector<2x32xf32>
    %72 = math.tanh %71 : vector<2x32xf32>
    %73 = arith.mulf %69, %19 : vector<2x32xf32>
    %74 = arith.mulf %68, %72 : vector<2x32xf32>
    %75 = arith.addf %73, %74 : vector<2x32xf32>
    %76 = math.tanh %75 : vector<2x32xf32>
    %77 = arith.mulf %70, %76 : vector<2x32xf32>
    %cst_43 = arith.constant dense<0.000000e+00> : vector<2x128xf32>
    %78 = tpu.matmul %77, %6, %cst_43 {dimension_numbers = #tpu.dot_dimension_numbers<[1], [0], [0], [1], [0, 0, 1, 1], [], []>} : vector<2x32xf32>, vector<32x128xf32>, vector<2x128xf32> -> vector<2x128xf32>
    %79 = vector.broadcast %7 : vector<1x128xf32> to vector<2x128xf32>
    %80 = arith.addf %78, %79 : vector<2x128xf32>
    %c0_44 = arith.constant 0 : index
    %c0_45 = arith.constant 0 : index
    %c0_46 = arith.constant 0 : index
    %81 = vector.load %arg17[%c0_44, %c0_45, %c0_46] : memref<7x2x128xf32, #tpu.memory_space<vmem>>, vector<1x2x128xf32>
    %82 = vector.shape_cast %81 : vector<1x2x128xf32> to vector<2x128xf32>
    %83 = vector.shape_cast %80 : vector<2x128xf32> to vector<1x2x128xf32>
    tpu.vector_store %arg17[%c0_44, %c0_45, %c0_46], %83 {strides = array<i32>} : memref<7x2x128xf32, #tpu.memory_space<vmem>>, vector<1x2x128xf32>,
    %cst_47 = arith.constant dense<0xFF800000> : vector<2xf32>
    %84 = vector.multi_reduction <maximumf>, %80, %cst_47 [1] : vector<2x128xf32> to vector<2xf32>
    %85 = vector.shape_cast %84 : vector<2xf32> to vector<2x1xf32>
    %86 = tpu.iota {dimensions = array<i32: 1>} : vector<2x128xi32>
    %87 = vector.broadcast %85 : vector<2x1xf32> to vector<2x128xf32>
    %88 = arith.cmpf oeq, %80, %87 : vector<2x128xf32>
    %c128_i32 = arith.constant 128 : i32
    %89 = vector.broadcast %c128_i32 : i32 to vector<2x128xi32>
    %90 = arith.select %88, %86, %89 : vector<2x128xi1>, vector<2x128xi32>
    %cst_48 = arith.constant dense<2147483647> : vector<2xi32>
    %91 = vector.multi_reduction <minsi>, %90, %cst_48 [1] : vector<2x128xi32> to vector<2xi32>
    %92 = vector.shape_cast %91 : vector<2xi32> to vector<2x1xi32>
    %c0_49 = arith.constant 0 : index
    %93 = memref.load %arg0[%c0_49] : memref<7xi32, #tpu.memory_space<smem>>
    %94 = vector.broadcast %93 : i32 to vector<2x1xi32>
    %c1_i32 = arith.constant 1 : i32
    %95 = vector.broadcast %c1_i32 : i32 to vector<2x1xi32>
    %96 = arith.cmpi eq, %94, %95 : vector<2x1xi32>
    %c1_50 = arith.constant 1 : index
    %c0_51 = arith.constant 0 : index
    %97 = memref.load %arg1[%c1_50, %c0_51] : memref<8x2xi32, #tpu.memory_space<smem>>
    %98 = vector.broadcast %97 : i32 to vector<1x1xi32>
    %c1_52 = arith.constant 1 : index
    %c1_53 = arith.constant 1 : index
    %99 = memref.load %arg1[%c1_52, %c1_53] : memref<8x2xi32, #tpu.memory_space<smem>>
    %100 = vector.broadcast %99 : i32 to vector<1x1xi32>
    %101 = tpu.concatenate %98, %100 in 0 : vector<1x1xi32>, vector<1x1xi32> -> vector<2x1xi32>
    %102 = arith.select %96, %101, %92 : vector<2x1xi1>, vector<2x1xi32>
    %103 = tpu.iota {dimensions = array<i32: 1>} : vector<2x64xi32>
    %104 = vector.broadcast %102 : vector<2x1xi32> to vector<2x64xi32>
    %105 = arith.cmpi eq, %103, %104 : vector<2x64xi32>
    %106 = arith.extui %105 : vector<2x64xi1> to vector<2x64xi32>
    %107 = arith.sitofp %106 : vector<2x64xi32> to vector<2x64xf32>
    %cst_54 = arith.constant dense<0.000000e+00> : vector<2x16xf32>
    %108 = tpu.matmul %107, %3, %cst_54 {dimension_numbers = #tpu.dot_dimension_numbers<[1], [0], [0], [1], [0, 0, 1, 1], [], []>} : vector<2x64xf32>, vector<64x16xf32>, vector<2x16xf32> -> vector<2x16xf32>
    %109 = vector.broadcast %1 : vector<1x32xf32> to vector<2x32xf32>
    %110 = arith.mulf %77, %109 : vector<2x32xf32>
    %cst_55 = arith.constant dense<0.000000e+00> : vector<2xf32>
    %111 = vector.multi_reduction <add>, %110, %cst_55 [1] : vector<2x32xf32> to vector<2xf32>
    %112 = vector.shape_cast %111 : vector<2xf32> to vector<2x1xf32>
    %113 = vector.broadcast %112 : vector<2x1xf32> to vector<2x8xf32>
    %114 = arith.addf %24, %113 : vector<2x8xf32>
    %115 = vector.broadcast %2 : vector<1x1xf32> to vector<2x8xf32>
    %116 = arith.addf %114, %115 : vector<2x8xf32>
    %cst_56 = arith.constant 0.000000e+00 : f32
    %117 = vector.broadcast %cst_56 : f32 to vector<2x8xf32>
    %118 = arith.maximumf %116, %117 : vector<2x8xf32>
    %cst_57 = arith.constant dense<0xFF800000> : vector<2xf32>
    %119 = vector.multi_reduction <maximumf>, %118, %cst_57 [1] : vector<2x8xf32> to vector<2xf32>
    %120 = vector.shape_cast %119 : vector<2xf32> to vector<2x1xf32>
    %121 = vector.broadcast %120 : vector<2x1xf32> to vector<2x8xf32>
    %122 = arith.subf %118, %121 : vector<2x8xf32>
    %123 = math.exp %122 : vector<2x8xf32>
    %cst_58 = arith.constant dense<0.000000e+00> : vector<2xf32>
    %124 = vector.multi_reduction <add>, %123, %cst_58 [1] : vector<2x8xf32> to vector<2xf32>
    %125 = vector.shape_cast %124 : vector<2xf32> to vector<2x1xf32>
    %126 = vector.broadcast %125 : vector<2x1xf32> to vector<2x8xf32>
    %127 = arith.divf %123, %126 : vector<2x8xf32>
    %128 = vector.shape_cast %127 : vector<2x8xf32> to vector<2x8x1xf32>
    %129 = vector.broadcast %128 : vector<2x8x1xf32> to vector<2x8x64xf32>
    %130 = arith.mulf %129, %0 : vector<2x8x64xf32>
    %cst_59 = arith.constant dense<0.000000e+00> : vector<2x64xf32>
    %131 = vector.multi_reduction <add>, %130, %cst_59 [1] : vector<2x8x64xf32> to vector<2x64xf32>
    %132 = tpu.concatenate %131, %108, %77 in 1 : vector<2x64xf32>, vector<2x16xf32>, vector<2x32xf32> -> vector<2x112xf32>
    %cst_60 = arith.constant dense<0.000000e+00> : vector<2x128xf32>
    %133 = tpu.matmul %132, %4, %cst_60 {dimension_numbers = #tpu.dot_dimension_numbers<[1], [0], [0], [1], [0, 0, 1, 1], [], []>} : vector<2x112xf32>, vector<112x128xf32>, vector<2x128xf32> -> vector<2x128xf32>
    %134 = vector.broadcast %5 : vector<1x128xf32> to vector<2x128xf32>
    %135 = arith.addf %133, %134 : vector<2x128xf32>
    %136 = arith.negf %135 : vector<2x128xf32>
    %137 = math.exp %136 : vector<2x128xf32>
    %cst_61 = arith.constant 1.000000e+00 : f32
    %138 = vector.broadcast %cst_61 : f32 to vector<2x128xf32>
    %139 = arith.addf %138, %137 : vector<2x128xf32>
    %140 = arith.divf %138, %139 : vector<2x128xf32>
    %141 = vector.extract_strided_slice %140 {offsets = [0, 0], sizes = [2, 32], strides = [1, 1]} : vector<2x128xf32> to vector<2x32xf32>
    %142 = vector.extract_strided_slice %140 {offsets = [0, 32], sizes = [2, 32], strides = [1, 1]} : vector<2x128xf32> to vector<2x32xf32>
    %143 = vector.extract_strided_slice %140 {offsets = [0, 96], sizes = [2, 32], strides = [1, 1]} : vector<2x128xf32> to vector<2x32xf32>
    %144 = vector.extract_strided_slice %135 {offsets = [0, 64], sizes = [2, 32], strides = [1, 1]} : vector<2x128xf32> to vector<2x32xf32>
    %145 = math.tanh %144 : vector<2x32xf32>
    %146 = arith.mulf %142, %75 : vector<2x32xf32>
    %147 = arith.mulf %141, %145 : vector<2x32xf32>
    %148 = arith.addf %146, %147 : vector<2x32xf32>
    %149 = math.tanh %148 : vector<2x32xf32>
    %150 = arith.mulf %143, %149 : vector<2x32xf32>
    %cst_62 = arith.constant dense<0.000000e+00> : vector<2x128xf32>
    %151 = tpu.matmul %150, %6, %cst_62 {dimension_numbers = #tpu.dot_dimension_numbers<[1], [0], [0], [1], [0, 0, 1, 1], [], []>} : vector<2x32xf32>, vector<32x128xf32>, vector<2x128xf32> -> vector<2x128xf32>
    %152 = vector.broadcast %7 : vector<1x128xf32> to vector<2x128xf32>
    %153 = arith.addf %151, %152 : vector<2x128xf32>
    %c1_63 = arith.constant 1 : index
    %c0_64 = arith.constant 0 : index
    %c0_65 = arith.constant 0 : index
    %154 = vector.load %arg17[%c1_63, %c0_64, %c0_65] : memref<7x2x128xf32, #tpu.memory_space<vmem>>, vector<1x2x128xf32>
    %155 = vector.shape_cast %154 : vector<1x2x128xf32> to vector<2x128xf32>
    %156 = vector.shape_cast %153 : vector<2x128xf32> to vector<1x2x128xf32>
    tpu.vector_store %arg17[%c1_63, %c0_64, %c0_65], %156 {strides = array<i32>} : memref<7x2x128xf32, #tpu.memory_space<vmem>>, vector<1x2x128xf32>,
    %cst_66 = arith.constant dense<0xFF800000> : vector<2xf32>
    %157 = vector.multi_reduction <maximumf>, %153, %cst_66 [1] : vector<2x128xf32> to vector<2xf32>
    %158 = vector.shape_cast %157 : vector<2xf32> to vector<2x1xf32>
    %159 = tpu.iota {dimensions = array<i32: 1>} : vector<2x128xi32>
    %160 = vector.broadcast %158 : vector<2x1xf32> to vector<2x128xf32>
    %161 = arith.cmpf oeq, %153, %160 : vector<2x128xf32>
    %c128_i32_67 = arith.constant 128 : i32
    %162 = vector.broadcast %c128_i32_67 : i32 to vector<2x128xi32>
    %163 = arith.select %161, %159, %162 : vector<2x128xi1>, vector<2x128xi32>
    %cst_68 = arith.constant dense<2147483647> : vector<2xi32>
    %164 = vector.multi_reduction <minsi>, %163, %cst_68 [1] : vector<2x128xi32> to vector<2xi32>
    %165 = vector.shape_cast %164 : vector<2xi32> to vector<2x1xi32>
    %c1_69 = arith.constant 1 : index
    %166 = memref.load %arg0[%c1_69] : memref<7xi32, #tpu.memory_space<smem>>
    %167 = vector.broadcast %166 : i32 to vector<2x1xi32>
    %c1_i32_70 = arith.constant 1 : i32
    %168 = vector.broadcast %c1_i32_70 : i32 to vector<2x1xi32>
    %169 = arith.cmpi eq, %167, %168 : vector<2x1xi32>
    %c2 = arith.constant 2 : index
    %c0_71 = arith.constant 0 : index
    %170 = memref.load %arg1[%c2, %c0_71] : memref<8x2xi32, #tpu.memory_space<smem>>
    %171 = vector.broadcast %170 : i32 to vector<1x1xi32>
    %c2_72 = arith.constant 2 : index
    %c1_73 = arith.constant 1 : index
    %172 = memref.load %arg1[%c2_72, %c1_73] : memref<8x2xi32, #tpu.memory_space<smem>>
    %173 = vector.broadcast %172 : i32 to vector<1x1xi32>
    %174 = tpu.concatenate %171, %173 in 0 : vector<1x1xi32>, vector<1x1xi32> -> vector<2x1xi32>
    %175 = arith.select %169, %174, %165 : vector<2x1xi1>, vector<2x1xi32>
    %176 = tpu.iota {dimensions = array<i32: 1>} : vector<2x64xi32>
    %177 = vector.broadcast %175 : vector<2x1xi32> to vector<2x64xi32>
    %178 = arith.cmpi eq, %176, %177 : vector<2x64xi32>
    %179 = arith.extui %178 : vector<2x64xi1> to vector<2x64xi32>
    %180 = arith.sitofp %179 : vector<2x64xi32> to vector<2x64xf32>
    %cst_74 = arith.constant dense<0.000000e+00> : vector<2x16xf32>
    %181 = tpu.matmul %180, %3, %cst_74 {dimension_numbers = #tpu.dot_dimension_numbers<[1], [0], [0], [1], [0, 0, 1, 1], [], []>} : vector<2x64xf32>, vector<64x16xf32>, vector<2x16xf32> -> vector<2x16xf32>
    %182 = vector.broadcast %1 : vector<1x32xf32> to vector<2x32xf32>
    %183 = arith.mulf %150, %182 : vector<2x32xf32>
    %cst_75 = arith.constant dense<0.000000e+00> : vector<2xf32>
    %184 = vector.multi_reduction <add>, %183, %cst_75 [1] : vector<2x32xf32> to vector<2xf32>
    %185 = vector.shape_cast %184 : vector<2xf32> to vector<2x1xf32>
    %186 = vector.broadcast %185 : vector<2x1xf32> to vector<2x8xf32>
    %187 = arith.addf %24, %186 : vector<2x8xf32>
    %188 = vector.broadcast %2 : vector<1x1xf32> to vector<2x8xf32>
    %189 = arith.addf %187, %188 : vector<2x8xf32>
    %cst_76 = arith.constant 0.000000e+00 : f32
    %190 = vector.broadcast %cst_76 : f32 to vector<2x8xf32>
    %191 = arith.maximumf %189, %190 : vector<2x8xf32>
    %cst_77 = arith.constant dense<0xFF800000> : vector<2xf32>
    %192 = vector.multi_reduction <maximumf>, %191, %cst_77 [1] : vector<2x8xf32> to vector<2xf32>
    %193 = vector.shape_cast %192 : vector<2xf32> to vector<2x1xf32>
    %194 = vector.broadcast %193 : vector<2x1xf32> to vector<2x8xf32>
    %195 = arith.subf %191, %194 : vector<2x8xf32>
    %196 = math.exp %195 : vector<2x8xf32>
    %cst_78 = arith.constant dense<0.000000e+00> : vector<2xf32>
    %197 = vector.multi_reduction <add>, %196, %cst_78 [1] : vector<2x8xf32> to vector<2xf32>
    %198 = vector.shape_cast %197 : vector<2xf32> to vector<2x1xf32>
    %199 = vector.broadcast %198 : vector<2x1xf32> to vector<2x8xf32>
    %200 = arith.divf %196, %199 : vector<2x8xf32>
    %201 = vector.shape_cast %200 : vector<2x8xf32> to vector<2x8x1xf32>
    %202 = vector.broadcast %201 : vector<2x8x1xf32> to vector<2x8x64xf32>
    %203 = arith.mulf %202, %0 : vector<2x8x64xf32>
    %cst_79 = arith.constant dense<0.000000e+00> : vector<2x64xf32>
    %204 = vector.multi_reduction <add>, %203, %cst_79 [1] : vector<2x8x64xf32> to vector<2x64xf32>
    %205 = tpu.concatenate %204, %181, %150 in 1 : vector<2x64xf32>, vector<2x16xf32>, vector<2x32xf32> -> vector<2x112xf32>
    %cst_80 = arith.constant dense<0.000000e+00> : vector<2x128xf32>
    %206 = tpu.matmul %205, %4, %cst_80 {dimension_numbers = #tpu.dot_dimension_numbers<[1], [0], [0], [1], [0, 0, 1, 1], [], []>} : vector<2x112xf32>, vector<112x128xf32>, vector<2x128xf32> -> vector<2x128xf32>
    %207 = vector.broadcast %5 : vector<1x128xf32> to vector<2x128xf32>
    %208 = arith.addf %206, %207 : vector<2x128xf32>
    %209 = arith.negf %208 : vector<2x128xf32>
    %210 = math.exp %209 : vector<2x128xf32>
    %cst_81 = arith.constant 1.000000e+00 : f32
    %211 = vector.broadcast %cst_81 : f32 to vector<2x128xf32>
    %212 = arith.addf %211, %210 : vector<2x128xf32>
    %213 = arith.divf %211, %212 : vector<2x128xf32>
    %214 = vector.extract_strided_slice %213 {offsets = [0, 0], sizes = [2, 32], strides = [1, 1]} : vector<2x128xf32> to vector<2x32xf32>
    %215 = vector.extract_strided_slice %213 {offsets = [0, 32], sizes = [2, 32], strides = [1, 1]} : vector<2x128xf32> to vector<2x32xf32>
    %216 = vector.extract_strided_slice %213 {offsets = [0, 96], sizes = [2, 32], strides = [1, 1]} : vector<2x128xf32> to vector<2x32xf32>
    %217 = vector.extract_strided_slice %208 {offsets = [0, 64], sizes = [2, 32], strides = [1, 1]} : vector<2x128xf32> to vector<2x32xf32>
    %218 = math.tanh %217 : vector<2x32xf32>
    %219 = arith.mulf %215, %148 : vector<2x32xf32>
    %220 = arith.mulf %214, %218 : vector<2x32xf32>
    %221 = arith.addf %219, %220 : vector<2x32xf32>
    %222 = math.tanh %221 : vector<2x32xf32>
    %223 = arith.mulf %216, %222 : vector<2x32xf32>
    %cst_82 = arith.constant dense<0.000000e+00> : vector<2x128xf32>
    %224 = tpu.matmul %223, %6, %cst_82 {dimension_numbers = #tpu.dot_dimension_numbers<[1], [0], [0], [1], [0, 0, 1, 1], [], []>} : vector<2x32xf32>, vector<32x128xf32>, vector<2x128xf32> -> vector<2x128xf32>
    %225 = vector.broadcast %7 : vector<1x128xf32> to vector<2x128xf32>
    %226 = arith.addf %224, %225 : vector<2x128xf32>
    %c2_83 = arith.constant 2 : index
    %c0_84 = arith.constant 0 : index
    %c0_85 = arith.constant 0 : index
    %227 = vector.load %arg17[%c2_83, %c0_84, %c0_85] : memref<7x2x128xf32, #tpu.memory_space<vmem>>, vector<1x2x128xf32>
    %228 = vector.shape_cast %227 : vector<1x2x128xf32> to vector<2x128xf32>
    %229 = vector.shape_cast %226 : vector<2x128xf32> to vector<1x2x128xf32>
    tpu.vector_store %arg17[%c2_83, %c0_84, %c0_85], %229 {strides = array<i32>} : memref<7x2x128xf32, #tpu.memory_space<vmem>>, vector<1x2x128xf32>,
    %cst_86 = arith.constant dense<0xFF800000> : vector<2xf32>
    %230 = vector.multi_reduction <maximumf>, %226, %cst_86 [1] : vector<2x128xf32> to vector<2xf32>
    %231 = vector.shape_cast %230 : vector<2xf32> to vector<2x1xf32>
    %232 = tpu.iota {dimensions = array<i32: 1>} : vector<2x128xi32>
    %233 = vector.broadcast %231 : vector<2x1xf32> to vector<2x128xf32>
    %234 = arith.cmpf oeq, %226, %233 : vector<2x128xf32>
    %c128_i32_87 = arith.constant 128 : i32
    %235 = vector.broadcast %c128_i32_87 : i32 to vector<2x128xi32>
    %236 = arith.select %234, %232, %235 : vector<2x128xi1>, vector<2x128xi32>
    %cst_88 = arith.constant dense<2147483647> : vector<2xi32>
    %237 = vector.multi_reduction <minsi>, %236, %cst_88 [1] : vector<2x128xi32> to vector<2xi32>
    %238 = vector.shape_cast %237 : vector<2xi32> to vector<2x1xi32>
    %c2_89 = arith.constant 2 : index
    %239 = memref.load %arg0[%c2_89] : memref<7xi32, #tpu.memory_space<smem>>
    %240 = vector.broadcast %239 : i32 to vector<2x1xi32>
    %c1_i32_90 = arith.constant 1 : i32
    %241 = vector.broadcast %c1_i32_90 : i32 to vector<2x1xi32>
    %242 = arith.cmpi eq, %240, %241 : vector<2x1xi32>
    %c3 = arith.constant 3 : index
    %c0_91 = arith.constant 0 : index
    %243 = memref.load %arg1[%c3, %c0_91] : memref<8x2xi32, #tpu.memory_space<smem>>
    %244 = vector.broadcast %243 : i32 to vector<1x1xi32>
    %c3_92 = arith.constant 3 : index
    %c1_93 = arith.constant 1 : index
    %245 = memref.load %arg1[%c3_92, %c1_93] : memref<8x2xi32, #tpu.memory_space<smem>>
    %246 = vector.broadcast %245 : i32 to vector<1x1xi32>
    %247 = tpu.concatenate %244, %246 in 0 : vector<1x1xi32>, vector<1x1xi32> -> vector<2x1xi32>
    %248 = arith.select %242, %247, %238 : vector<2x1xi1>, vector<2x1xi32>
    %249 = tpu.iota {dimensions = array<i32: 1>} : vector<2x64xi32>
    %250 = vector.broadcast %248 : vector<2x1xi32> to vector<2x64xi32>
    %251 = arith.cmpi eq, %249, %250 : vector<2x64xi32>
    %252 = arith.extui %251 : vector<2x64xi1> to vector<2x64xi32>
    %253 = arith.sitofp %252 : vector<2x64xi32> to vector<2x64xf32>
    %cst_94 = arith.constant dense<0.000000e+00> : vector<2x16xf32>
    %254 = tpu.matmul %253, %3, %cst_94 {dimension_numbers = #tpu.dot_dimension_numbers<[1], [0], [0], [1], [0, 0, 1, 1], [], []>} : vector<2x64xf32>, vector<64x16xf32>, vector<2x16xf32> -> vector<2x16xf32>
    %255 = vector.broadcast %1 : vector<1x32xf32> to vector<2x32xf32>
    %256 = arith.mulf %223, %255 : vector<2x32xf32>
    %cst_95 = arith.constant dense<0.000000e+00> : vector<2xf32>
    %257 = vector.multi_reduction <add>, %256, %cst_95 [1] : vector<2x32xf32> to vector<2xf32>
    %258 = vector.shape_cast %257 : vector<2xf32> to vector<2x1xf32>
    %259 = vector.broadcast %258 : vector<2x1xf32> to vector<2x8xf32>
    %260 = arith.addf %24, %259 : vector<2x8xf32>
    %261 = vector.broadcast %2 : vector<1x1xf32> to vector<2x8xf32>
    %262 = arith.addf %260, %261 : vector<2x8xf32>
    %cst_96 = arith.constant 0.000000e+00 : f32
    %263 = vector.broadcast %cst_96 : f32 to vector<2x8xf32>
    %264 = arith.maximumf %262, %263 : vector<2x8xf32>
    %cst_97 = arith.constant dense<0xFF800000> : vector<2xf32>
    %265 = vector.multi_reduction <maximumf>, %264, %cst_97 [1] : vector<2x8xf32> to vector<2xf32>
    %266 = vector.shape_cast %265 : vector<2xf32> to vector<2x1xf32>
    %267 = vector.broadcast %266 : vector<2x1xf32> to vector<2x8xf32>
    %268 = arith.subf %264, %267 : vector<2x8xf32>
    %269 = math.exp %268 : vector<2x8xf32>
    %cst_98 = arith.constant dense<0.000000e+00> : vector<2xf32>
    %270 = vector.multi_reduction <add>, %269, %cst_98 [1] : vector<2x8xf32> to vector<2xf32>
    %271 = vector.shape_cast %270 : vector<2xf32> to vector<2x1xf32>
    %272 = vector.broadcast %271 : vector<2x1xf32> to vector<2x8xf32>
    %273 = arith.divf %269, %272 : vector<2x8xf32>
    %274 = vector.shape_cast %273 : vector<2x8xf32> to vector<2x8x1xf32>
    %275 = vector.broadcast %274 : vector<2x8x1xf32> to vector<2x8x64xf32>
    %276 = arith.mulf %275, %0 : vector<2x8x64xf32>
    %cst_99 = arith.constant dense<0.000000e+00> : vector<2x64xf32>
    %277 = vector.multi_reduction <add>, %276, %cst_99 [1] : vector<2x8x64xf32> to vector<2x64xf32>
    %278 = tpu.concatenate %277, %254, %223 in 1 : vector<2x64xf32>, vector<2x16xf32>, vector<2x32xf32> -> vector<2x112xf32>
    %cst_100 = arith.constant dense<0.000000e+00> : vector<2x128xf32>
    %279 = tpu.matmul %278, %4, %cst_100 {dimension_numbers = #tpu.dot_dimension_numbers<[1], [0], [0], [1], [0, 0, 1, 1], [], []>} : vector<2x112xf32>, vector<112x128xf32>, vector<2x128xf32> -> vector<2x128xf32>
    %280 = vector.broadcast %5 : vector<1x128xf32> to vector<2x128xf32>
    %281 = arith.addf %279, %280 : vector<2x128xf32>
    %282 = arith.negf %281 : vector<2x128xf32>
    %283 = math.exp %282 : vector<2x128xf32>
    %cst_101 = arith.constant 1.000000e+00 : f32
    %284 = vector.broadcast %cst_101 : f32 to vector<2x128xf32>
    %285 = arith.addf %284, %283 : vector<2x128xf32>
    %286 = arith.divf %284, %285 : vector<2x128xf32>
    %287 = vector.extract_strided_slice %286 {offsets = [0, 0], sizes = [2, 32], strides = [1, 1]} : vector<2x128xf32> to vector<2x32xf32>
    %288 = vector.extract_strided_slice %286 {offsets = [0, 32], sizes = [2, 32], strides = [1, 1]} : vector<2x128xf32> to vector<2x32xf32>
    %289 = vector.extract_strided_slice %286 {offsets = [0, 96], sizes = [2, 32], strides = [1, 1]} : vector<2x128xf32> to vector<2x32xf32>
    %290 = vector.extract_strided_slice %281 {offsets = [0, 64], sizes = [2, 32], strides = [1, 1]} : vector<2x128xf32> to vector<2x32xf32>
    %291 = math.tanh %290 : vector<2x32xf32>
    %292 = arith.mulf %288, %221 : vector<2x32xf32>
    %293 = arith.mulf %287, %291 : vector<2x32xf32>
    %294 = arith.addf %292, %293 : vector<2x32xf32>
    %295 = math.tanh %294 : vector<2x32xf32>
    %296 = arith.mulf %289, %295 : vector<2x32xf32>
    %cst_102 = arith.constant dense<0.000000e+00> : vector<2x128xf32>
    %297 = tpu.matmul %296, %6, %cst_102 {dimension_numbers = #tpu.dot_dimension_numbers<[1], [0], [0], [1], [0, 0, 1, 1], [], []>} : vector<2x32xf32>, vector<32x128xf32>, vector<2x128xf32> -> vector<2x128xf32>
    %298 = vector.broadcast %7 : vector<1x128xf32> to vector<2x128xf32>
    %299 = arith.addf %297, %298 : vector<2x128xf32>
    %c3_103 = arith.constant 3 : index
    %c0_104 = arith.constant 0 : index
    %c0_105 = arith.constant 0 : index
    %300 = vector.load %arg17[%c3_103, %c0_104, %c0_105] : memref<7x2x128xf32, #tpu.memory_space<vmem>>, vector<1x2x128xf32>
    %301 = vector.shape_cast %300 : vector<1x2x128xf32> to vector<2x128xf32>
    %302 = vector.shape_cast %299 : vector<2x128xf32> to vector<1x2x128xf32>
    tpu.vector_store %arg17[%c3_103, %c0_104, %c0_105], %302 {strides = array<i32>} : memref<7x2x128xf32, #tpu.memory_space<vmem>>, vector<1x2x128xf32>,
    %cst_106 = arith.constant dense<0xFF800000> : vector<2xf32>
    %303 = vector.multi_reduction <maximumf>, %299, %cst_106 [1] : vector<2x128xf32> to vector<2xf32>
    %304 = vector.shape_cast %303 : vector<2xf32> to vector<2x1xf32>
    %305 = tpu.iota {dimensions = array<i32: 1>} : vector<2x128xi32>
    %306 = vector.broadcast %304 : vector<2x1xf32> to vector<2x128xf32>
    %307 = arith.cmpf oeq, %299, %306 : vector<2x128xf32>
    %c128_i32_107 = arith.constant 128 : i32
    %308 = vector.broadcast %c128_i32_107 : i32 to vector<2x128xi32>
    %309 = arith.select %307, %305, %308 : vector<2x128xi1>, vector<2x128xi32>
    %cst_108 = arith.constant dense<2147483647> : vector<2xi32>
    %310 = vector.multi_reduction <minsi>, %309, %cst_108 [1] : vector<2x128xi32> to vector<2xi32>
    %311 = vector.shape_cast %310 : vector<2xi32> to vector<2x1xi32>
    %c3_109 = arith.constant 3 : index
    %312 = memref.load %arg0[%c3_109] : memref<7xi32, #tpu.memory_space<smem>>
    %313 = vector.broadcast %312 : i32 to vector<2x1xi32>
    %c1_i32_110 = arith.constant 1 : i32
    %314 = vector.broadcast %c1_i32_110 : i32 to vector<2x1xi32>
    %315 = arith.cmpi eq, %313, %314 : vector<2x1xi32>
    %c4 = arith.constant 4 : index
    %c0_111 = arith.constant 0 : index
    %316 = memref.load %arg1[%c4, %c0_111] : memref<8x2xi32, #tpu.memory_space<smem>>
    %317 = vector.broadcast %316 : i32 to vector<1x1xi32>
    %c4_112 = arith.constant 4 : index
    %c1_113 = arith.constant 1 : index
    %318 = memref.load %arg1[%c4_112, %c1_113] : memref<8x2xi32, #tpu.memory_space<smem>>
    %319 = vector.broadcast %318 : i32 to vector<1x1xi32>
    %320 = tpu.concatenate %317, %319 in 0 : vector<1x1xi32>, vector<1x1xi32> -> vector<2x1xi32>
    %321 = arith.select %315, %320, %311 : vector<2x1xi1>, vector<2x1xi32>
    %322 = tpu.iota {dimensions = array<i32: 1>} : vector<2x64xi32>
    %323 = vector.broadcast %321 : vector<2x1xi32> to vector<2x64xi32>
    %324 = arith.cmpi eq, %322, %323 : vector<2x64xi32>
    %325 = arith.extui %324 : vector<2x64xi1> to vector<2x64xi32>
    %326 = arith.sitofp %325 : vector<2x64xi32> to vector<2x64xf32>
    %cst_114 = arith.constant dense<0.000000e+00> : vector<2x16xf32>
    %327 = tpu.matmul %326, %3, %cst_114 {dimension_numbers = #tpu.dot_dimension_numbers<[1], [0], [0], [1], [0, 0, 1, 1], [], []>} : vector<2x64xf32>, vector<64x16xf32>, vector<2x16xf32> -> vector<2x16xf32>
    %328 = vector.broadcast %1 : vector<1x32xf32> to vector<2x32xf32>
    %329 = arith.mulf %296, %328 : vector<2x32xf32>
    %cst_115 = arith.constant dense<0.000000e+00> : vector<2xf32>
    %330 = vector.multi_reduction <add>, %329, %cst_115 [1] : vector<2x32xf32> to vector<2xf32>
    %331 = vector.shape_cast %330 : vector<2xf32> to vector<2x1xf32>
    %332 = vector.broadcast %331 : vector<2x1xf32> to vector<2x8xf32>
    %333 = arith.addf %24, %332 : vector<2x8xf32>
    %334 = vector.broadcast %2 : vector<1x1xf32> to vector<2x8xf32>
    %335 = arith.addf %333, %334 : vector<2x8xf32>
    %cst_116 = arith.constant 0.000000e+00 : f32
    %336 = vector.broadcast %cst_116 : f32 to vector<2x8xf32>
    %337 = arith.maximumf %335, %336 : vector<2x8xf32>
    %cst_117 = arith.constant dense<0xFF800000> : vector<2xf32>
    %338 = vector.multi_reduction <maximumf>, %337, %cst_117 [1] : vector<2x8xf32> to vector<2xf32>
    %339 = vector.shape_cast %338 : vector<2xf32> to vector<2x1xf32>
    %340 = vector.broadcast %339 : vector<2x1xf32> to vector<2x8xf32>
    %341 = arith.subf %337, %340 : vector<2x8xf32>
    %342 = math.exp %341 : vector<2x8xf32>
    %cst_118 = arith.constant dense<0.000000e+00> : vector<2xf32>
    %343 = vector.multi_reduction <add>, %342, %cst_118 [1] : vector<2x8xf32> to vector<2xf32>
    %344 = vector.shape_cast %343 : vector<2xf32> to vector<2x1xf32>
    %345 = vector.broadcast %344 : vector<2x1xf32> to vector<2x8xf32>
    %346 = arith.divf %342, %345 : vector<2x8xf32>
    %347 = vector.shape_cast %346 : vector<2x8xf32> to vector<2x8x1xf32>
    %348 = vector.broadcast %347 : vector<2x8x1xf32> to vector<2x8x64xf32>
    %349 = arith.mulf %348, %0 : vector<2x8x64xf32>
    %cst_119 = arith.constant dense<0.000000e+00> : vector<2x64xf32>
    %350 = vector.multi_reduction <add>, %349, %cst_119 [1] : vector<2x8x64xf32> to vector<2x64xf32>
    %351 = tpu.concatenate %350, %327, %296 in 1 : vector<2x64xf32>, vector<2x16xf32>, vector<2x32xf32> -> vector<2x112xf32>
    %cst_120 = arith.constant dense<0.000000e+00> : vector<2x128xf32>
    %352 = tpu.matmul %351, %4, %cst_120 {dimension_numbers = #tpu.dot_dimension_numbers<[1], [0], [0], [1], [0, 0, 1, 1], [], []>} : vector<2x112xf32>, vector<112x128xf32>, vector<2x128xf32> -> vector<2x128xf32>
    %353 = vector.broadcast %5 : vector<1x128xf32> to vector<2x128xf32>
    %354 = arith.addf %352, %353 : vector<2x128xf32>
    %355 = arith.negf %354 : vector<2x128xf32>
    %356 = math.exp %355 : vector<2x128xf32>
    %cst_121 = arith.constant 1.000000e+00 : f32
    %357 = vector.broadcast %cst_121 : f32 to vector<2x128xf32>
    %358 = arith.addf %357, %356 : vector<2x128xf32>
    %359 = arith.divf %357, %358 : vector<2x128xf32>
    %360 = vector.extract_strided_slice %359 {offsets = [0, 0], sizes = [2, 32], strides = [1, 1]} : vector<2x128xf32> to vector<2x32xf32>
    %361 = vector.extract_strided_slice %359 {offsets = [0, 32], sizes = [2, 32], strides = [1, 1]} : vector<2x128xf32> to vector<2x32xf32>
    %362 = vector.extract_strided_slice %359 {offsets = [0, 96], sizes = [2, 32], strides = [1, 1]} : vector<2x128xf32> to vector<2x32xf32>
    %363 = vector.extract_strided_slice %354 {offsets = [0, 64], sizes = [2, 32], strides = [1, 1]} : vector<2x128xf32> to vector<2x32xf32>
    %364 = math.tanh %363 : vector<2x32xf32>
    %365 = arith.mulf %361, %294 : vector<2x32xf32>
    %366 = arith.mulf %360, %364 : vector<2x32xf32>
    %367 = arith.addf %365, %366 : vector<2x32xf32>
    %368 = math.tanh %367 : vector<2x32xf32>
    %369 = arith.mulf %362, %368 : vector<2x32xf32>
    %cst_122 = arith.constant dense<0.000000e+00> : vector<2x128xf32>
    %370 = tpu.matmul %369, %6, %cst_122 {dimension_numbers = #tpu.dot_dimension_numbers<[1], [0], [0], [1], [0, 0, 1, 1], [], []>} : vector<2x32xf32>, vector<32x128xf32>, vector<2x128xf32> -> vector<2x128xf32>
    %371 = vector.broadcast %7 : vector<1x128xf32> to vector<2x128xf32>
    %372 = arith.addf %370, %371 : vector<2x128xf32>
    %c4_123 = arith.constant 4 : index
    %c0_124 = arith.constant 0 : index
    %c0_125 = arith.constant 0 : index
    %373 = vector.load %arg17[%c4_123, %c0_124, %c0_125] : memref<7x2x128xf32, #tpu.memory_space<vmem>>, vector<1x2x128xf32>
    %374 = vector.shape_cast %373 : vector<1x2x128xf32> to vector<2x128xf32>
    %375 = vector.shape_cast %372 : vector<2x128xf32> to vector<1x2x128xf32>
    tpu.vector_store %arg17[%c4_123, %c0_124, %c0_125], %375 {strides = array<i32>} : memref<7x2x128xf32, #tpu.memory_space<vmem>>, vector<1x2x128xf32>,
    %cst_126 = arith.constant dense<0xFF800000> : vector<2xf32>
    %376 = vector.multi_reduction <maximumf>, %372, %cst_126 [1] : vector<2x128xf32> to vector<2xf32>
    %377 = vector.shape_cast %376 : vector<2xf32> to vector<2x1xf32>
    %378 = tpu.iota {dimensions = array<i32: 1>} : vector<2x128xi32>
    %379 = vector.broadcast %377 : vector<2x1xf32> to vector<2x128xf32>
    %380 = arith.cmpf oeq, %372, %379 : vector<2x128xf32>
    %c128_i32_127 = arith.constant 128 : i32
    %381 = vector.broadcast %c128_i32_127 : i32 to vector<2x128xi32>
    %382 = arith.select %380, %378, %381 : vector<2x128xi1>, vector<2x128xi32>
    %cst_128 = arith.constant dense<2147483647> : vector<2xi32>
    %383 = vector.multi_reduction <minsi>, %382, %cst_128 [1] : vector<2x128xi32> to vector<2xi32>
    %384 = vector.shape_cast %383 : vector<2xi32> to vector<2x1xi32>
    %c4_129 = arith.constant 4 : index
    %385 = memref.load %arg0[%c4_129] : memref<7xi32, #tpu.memory_space<smem>>
    %386 = vector.broadcast %385 : i32 to vector<2x1xi32>
    %c1_i32_130 = arith.constant 1 : i32
    %387 = vector.broadcast %c1_i32_130 : i32 to vector<2x1xi32>
    %388 = arith.cmpi eq, %386, %387 : vector<2x1xi32>
    %c5 = arith.constant 5 : index
    %c0_131 = arith.constant 0 : index
    %389 = memref.load %arg1[%c5, %c0_131] : memref<8x2xi32, #tpu.memory_space<smem>>
    %390 = vector.broadcast %389 : i32 to vector<1x1xi32>
    %c5_132 = arith.constant 5 : index
    %c1_133 = arith.constant 1 : index
    %391 = memref.load %arg1[%c5_132, %c1_133] : memref<8x2xi32, #tpu.memory_space<smem>>
    %392 = vector.broadcast %391 : i32 to vector<1x1xi32>
    %393 = tpu.concatenate %390, %392 in 0 : vector<1x1xi32>, vector<1x1xi32> -> vector<2x1xi32>
    %394 = arith.select %388, %393, %384 : vector<2x1xi1>, vector<2x1xi32>
    %395 = tpu.iota {dimensions = array<i32: 1>} : vector<2x64xi32>
    %396 = vector.broadcast %394 : vector<2x1xi32> to vector<2x64xi32>
    %397 = arith.cmpi eq, %395, %396 : vector<2x64xi32>
    %398 = arith.extui %397 : vector<2x64xi1> to vector<2x64xi32>
    %399 = arith.sitofp %398 : vector<2x64xi32> to vector<2x64xf32>
    %cst_134 = arith.constant dense<0.000000e+00> : vector<2x16xf32>
    %400 = tpu.matmul %399, %3, %cst_134 {dimension_numbers = #tpu.dot_dimension_numbers<[1], [0], [0], [1], [0, 0, 1, 1], [], []>} : vector<2x64xf32>, vector<64x16xf32>, vector<2x16xf32> -> vector<2x16xf32>
    %401 = vector.broadcast %1 : vector<1x32xf32> to vector<2x32xf32>
    %402 = arith.mulf %369, %401 : vector<2x32xf32>
    %cst_135 = arith.constant dense<0.000000e+00> : vector<2xf32>
    %403 = vector.multi_reduction <add>, %402, %cst_135 [1] : vector<2x32xf32> to vector<2xf32>
    %404 = vector.shape_cast %403 : vector<2xf32> to vector<2x1xf32>
    %405 = vector.broadcast %404 : vector<2x1xf32> to vector<2x8xf32>
    %406 = arith.addf %24, %405 : vector<2x8xf32>
    %407 = vector.broadcast %2 : vector<1x1xf32> to vector<2x8xf32>
    %408 = arith.addf %406, %407 : vector<2x8xf32>
    %cst_136 = arith.constant 0.000000e+00 : f32
    %409 = vector.broadcast %cst_136 : f32 to vector<2x8xf32>
    %410 = arith.maximumf %408, %409 : vector<2x8xf32>
    %cst_137 = arith.constant dense<0xFF800000> : vector<2xf32>
    %411 = vector.multi_reduction <maximumf>, %410, %cst_137 [1] : vector<2x8xf32> to vector<2xf32>
    %412 = vector.shape_cast %411 : vector<2xf32> to vector<2x1xf32>
    %413 = vector.broadcast %412 : vector<2x1xf32> to vector<2x8xf32>
    %414 = arith.subf %410, %413 : vector<2x8xf32>
    %415 = math.exp %414 : vector<2x8xf32>
    %cst_138 = arith.constant dense<0.000000e+00> : vector<2xf32>
    %416 = vector.multi_reduction <add>, %415, %cst_138 [1] : vector<2x8xf32> to vector<2xf32>
    %417 = vector.shape_cast %416 : vector<2xf32> to vector<2x1xf32>
    %418 = vector.broadcast %417 : vector<2x1xf32> to vector<2x8xf32>
    %419 = arith.divf %415, %418 : vector<2x8xf32>
    %420 = vector.shape_cast %419 : vector<2x8xf32> to vector<2x8x1xf32>
    %421 = vector.broadcast %420 : vector<2x8x1xf32> to vector<2x8x64xf32>
    %422 = arith.mulf %421, %0 : vector<2x8x64xf32>
    %cst_139 = arith.constant dense<0.000000e+00> : vector<2x64xf32>
    %423 = vector.multi_reduction <add>, %422, %cst_139 [1] : vector<2x8x64xf32> to vector<2x64xf32>
    %424 = tpu.concatenate %423, %400, %369 in 1 : vector<2x64xf32>, vector<2x16xf32>, vector<2x32xf32> -> vector<2x112xf32>
    %cst_140 = arith.constant dense<0.000000e+00> : vector<2x128xf32>
    %425 = tpu.matmul %424, %4, %cst_140 {dimension_numbers = #tpu.dot_dimension_numbers<[1], [0], [0], [1], [0, 0, 1, 1], [], []>} : vector<2x112xf32>, vector<112x128xf32>, vector<2x128xf32> -> vector<2x128xf32>
    %426 = vector.broadcast %5 : vector<1x128xf32> to vector<2x128xf32>
    %427 = arith.addf %425, %426 : vector<2x128xf32>
    %428 = arith.negf %427 : vector<2x128xf32>
    %429 = math.exp %428 : vector<2x128xf32>
    %cst_141 = arith.constant 1.000000e+00 : f32
    %430 = vector.broadcast %cst_141 : f32 to vector<2x128xf32>
    %431 = arith.addf %430, %429 : vector<2x128xf32>
    %432 = arith.divf %430, %431 : vector<2x128xf32>
    %433 = vector.extract_strided_slice %432 {offsets = [0, 0], sizes = [2, 32], strides = [1, 1]} : vector<2x128xf32> to vector<2x32xf32>
    %434 = vector.extract_strided_slice %432 {offsets = [0, 32], sizes = [2, 32], strides = [1, 1]} : vector<2x128xf32> to vector<2x32xf32>
    %435 = vector.extract_strided_slice %432 {offsets = [0, 96], sizes = [2, 32], strides = [1, 1]} : vector<2x128xf32> to vector<2x32xf32>
    %436 = vector.extract_strided_slice %427 {offsets = [0, 64], sizes = [2, 32], strides = [1, 1]} : vector<2x128xf32> to vector<2x32xf32>
    %437 = math.tanh %436 : vector<2x32xf32>
    %438 = arith.mulf %434, %367 : vector<2x32xf32>
    %439 = arith.mulf %433, %437 : vector<2x32xf32>
    %440 = arith.addf %438, %439 : vector<2x32xf32>
    %441 = math.tanh %440 : vector<2x32xf32>
    %442 = arith.mulf %435, %441 : vector<2x32xf32>
    %cst_142 = arith.constant dense<0.000000e+00> : vector<2x128xf32>
    %443 = tpu.matmul %442, %6, %cst_142 {dimension_numbers = #tpu.dot_dimension_numbers<[1], [0], [0], [1], [0, 0, 1, 1], [], []>} : vector<2x32xf32>, vector<32x128xf32>, vector<2x128xf32> -> vector<2x128xf32>
    %444 = vector.broadcast %7 : vector<1x128xf32> to vector<2x128xf32>
    %445 = arith.addf %443, %444 : vector<2x128xf32>
    %c5_143 = arith.constant 5 : index
    %c0_144 = arith.constant 0 : index
    %c0_145 = arith.constant 0 : index
    %446 = vector.load %arg17[%c5_143, %c0_144, %c0_145] : memref<7x2x128xf32, #tpu.memory_space<vmem>>, vector<1x2x128xf32>
    %447 = vector.shape_cast %446 : vector<1x2x128xf32> to vector<2x128xf32>
    %448 = vector.shape_cast %445 : vector<2x128xf32> to vector<1x2x128xf32>
    tpu.vector_store %arg17[%c5_143, %c0_144, %c0_145], %448 {strides = array<i32>} : memref<7x2x128xf32, #tpu.memory_space<vmem>>, vector<1x2x128xf32>,
    %cst_146 = arith.constant dense<0xFF800000> : vector<2xf32>
    %449 = vector.multi_reduction <maximumf>, %445, %cst_146 [1] : vector<2x128xf32> to vector<2xf32>
    %450 = vector.shape_cast %449 : vector<2xf32> to vector<2x1xf32>
    %451 = tpu.iota {dimensions = array<i32: 1>} : vector<2x128xi32>
    %452 = vector.broadcast %450 : vector<2x1xf32> to vector<2x128xf32>
    %453 = arith.cmpf oeq, %445, %452 : vector<2x128xf32>
    %c128_i32_147 = arith.constant 128 : i32
    %454 = vector.broadcast %c128_i32_147 : i32 to vector<2x128xi32>
    %455 = arith.select %453, %451, %454 : vector<2x128xi1>, vector<2x128xi32>
    %cst_148 = arith.constant dense<2147483647> : vector<2xi32>
    %456 = vector.multi_reduction <minsi>, %455, %cst_148 [1] : vector<2x128xi32> to vector<2xi32>
    %457 = vector.shape_cast %456 : vector<2xi32> to vector<2x1xi32>
    %c5_149 = arith.constant 5 : index
    %458 = memref.load %arg0[%c5_149] : memref<7xi32, #tpu.memory_space<smem>>
    %459 = vector.broadcast %458 : i32 to vector<2x1xi32>
    %c1_i32_150 = arith.constant 1 : i32
    %460 = vector.broadcast %c1_i32_150 : i32 to vector<2x1xi32>
    %461 = arith.cmpi eq, %459, %460 : vector<2x1xi32>
    %c6 = arith.constant 6 : index
    %c0_151 = arith.constant 0 : index
    %462 = memref.load %arg1[%c6, %c0_151] : memref<8x2xi32, #tpu.memory_space<smem>>
    %463 = vector.broadcast %462 : i32 to vector<1x1xi32>
    %c6_152 = arith.constant 6 : index
    %c1_153 = arith.constant 1 : index
    %464 = memref.load %arg1[%c6_152, %c1_153] : memref<8x2xi32, #tpu.memory_space<smem>>
    %465 = vector.broadcast %464 : i32 to vector<1x1xi32>
    %466 = tpu.concatenate %463, %465 in 0 : vector<1x1xi32>, vector<1x1xi32> -> vector<2x1xi32>
    %467 = arith.select %461, %466, %457 : vector<2x1xi1>, vector<2x1xi32>
    %468 = tpu.iota {dimensions = array<i32: 1>} : vector<2x64xi32>
    %469 = vector.broadcast %467 : vector<2x1xi32> to vector<2x64xi32>
    %470 = arith.cmpi eq, %468, %469 : vector<2x64xi32>
    %471 = arith.extui %470 : vector<2x64xi1> to vector<2x64xi32>
    %472 = arith.sitofp %471 : vector<2x64xi32> to vector<2x64xf32>
    %cst_154 = arith.constant dense<0.000000e+00> : vector<2x16xf32>
    %473 = tpu.matmul %472, %3, %cst_154 {dimension_numbers = #tpu.dot_dimension_numbers<[1], [0], [0], [1], [0, 0, 1, 1], [], []>} : vector<2x64xf32>, vector<64x16xf32>, vector<2x16xf32> -> vector<2x16xf32>
    %474 = vector.broadcast %1 : vector<1x32xf32> to vector<2x32xf32>
    %475 = arith.mulf %442, %474 : vector<2x32xf32>
    %cst_155 = arith.constant dense<0.000000e+00> : vector<2xf32>
    %476 = vector.multi_reduction <add>, %475, %cst_155 [1] : vector<2x32xf32> to vector<2xf32>
    %477 = vector.shape_cast %476 : vector<2xf32> to vector<2x1xf32>
    %478 = vector.broadcast %477 : vector<2x1xf32> to vector<2x8xf32>
    %479 = arith.addf %24, %478 : vector<2x8xf32>
    %480 = vector.broadcast %2 : vector<1x1xf32> to vector<2x8xf32>
    %481 = arith.addf %479, %480 : vector<2x8xf32>
    %cst_156 = arith.constant 0.000000e+00 : f32
    %482 = vector.broadcast %cst_156 : f32 to vector<2x8xf32>
    %483 = arith.maximumf %481, %482 : vector<2x8xf32>
    %cst_157 = arith.constant dense<0xFF800000> : vector<2xf32>
    %484 = vector.multi_reduction <maximumf>, %483, %cst_157 [1] : vector<2x8xf32> to vector<2xf32>
    %485 = vector.shape_cast %484 : vector<2xf32> to vector<2x1xf32>
    %486 = vector.broadcast %485 : vector<2x1xf32> to vector<2x8xf32>
    %487 = arith.subf %483, %486 : vector<2x8xf32>
    %488 = math.exp %487 : vector<2x8xf32>
    %cst_158 = arith.constant dense<0.000000e+00> : vector<2xf32>
    %489 = vector.multi_reduction <add>, %488, %cst_158 [1] : vector<2x8xf32> to vector<2xf32>
    %490 = vector.shape_cast %489 : vector<2xf32> to vector<2x1xf32>
    %491 = vector.broadcast %490 : vector<2x1xf32> to vector<2x8xf32>
    %492 = arith.divf %488, %491 : vector<2x8xf32>
    %493 = vector.shape_cast %492 : vector<2x8xf32> to vector<2x8x1xf32>
    %494 = vector.broadcast %493 : vector<2x8x1xf32> to vector<2x8x64xf32>
    %495 = arith.mulf %494, %0 : vector<2x8x64xf32>
    %cst_159 = arith.constant dense<0.000000e+00> : vector<2x64xf32>
    %496 = vector.multi_reduction <add>, %495, %cst_159 [1] : vector<2x8x64xf32> to vector<2x64xf32>
    %497 = tpu.concatenate %496, %473, %442 in 1 : vector<2x64xf32>, vector<2x16xf32>, vector<2x32xf32> -> vector<2x112xf32>
    %cst_160 = arith.constant dense<0.000000e+00> : vector<2x128xf32>
    %498 = tpu.matmul %497, %4, %cst_160 {dimension_numbers = #tpu.dot_dimension_numbers<[1], [0], [0], [1], [0, 0, 1, 1], [], []>} : vector<2x112xf32>, vector<112x128xf32>, vector<2x128xf32> -> vector<2x128xf32>
    %499 = vector.broadcast %5 : vector<1x128xf32> to vector<2x128xf32>
    %500 = arith.addf %498, %499 : vector<2x128xf32>
    %501 = arith.negf %500 : vector<2x128xf32>
    %502 = math.exp %501 : vector<2x128xf32>
    %cst_161 = arith.constant 1.000000e+00 : f32
    %503 = vector.broadcast %cst_161 : f32 to vector<2x128xf32>
    %504 = arith.addf %503, %502 : vector<2x128xf32>
    %505 = arith.divf %503, %504 : vector<2x128xf32>
    %506 = vector.extract_strided_slice %505 {offsets = [0, 0], sizes = [2, 32], strides = [1, 1]} : vector<2x128xf32> to vector<2x32xf32>
    %507 = vector.extract_strided_slice %505 {offsets = [0, 32], sizes = [2, 32], strides = [1, 1]} : vector<2x128xf32> to vector<2x32xf32>
    %508 = vector.extract_strided_slice %505 {offsets = [0, 96], sizes = [2, 32], strides = [1, 1]} : vector<2x128xf32> to vector<2x32xf32>
    %509 = vector.extract_strided_slice %500 {offsets = [0, 64], sizes = [2, 32], strides = [1, 1]} : vector<2x128xf32> to vector<2x32xf32>
    %510 = math.tanh %509 : vector<2x32xf32>
    %511 = arith.mulf %507, %440 : vector<2x32xf32>
    %512 = arith.mulf %506, %510 : vector<2x32xf32>
    %513 = arith.addf %511, %512 : vector<2x32xf32>
    %514 = math.tanh %513 : vector<2x32xf32>
    %515 = arith.mulf %508, %514 : vector<2x32xf32>
    %cst_162 = arith.constant dense<0.000000e+00> : vector<2x128xf32>
    %516 = tpu.matmul %515, %6, %cst_162 {dimension_numbers = #tpu.dot_dimension_numbers<[1], [0], [0], [1], [0, 0, 1, 1], [], []>} : vector<2x32xf32>, vector<32x128xf32>, vector<2x128xf32> -> vector<2x128xf32>
    %517 = vector.broadcast %7 : vector<1x128xf32> to vector<2x128xf32>
    %518 = arith.addf %516, %517 : vector<2x128xf32>
    %c6_163 = arith.constant 6 : index
    %c0_164 = arith.constant 0 : index
    %c0_165 = arith.constant 0 : index
    %519 = vector.load %arg17[%c6_163, %c0_164, %c0_165] : memref<7x2x128xf32, #tpu.memory_space<vmem>>, vector<1x2x128xf32>
    %520 = vector.shape_cast %519 : vector<1x2x128xf32> to vector<2x128xf32>
    %521 = vector.shape_cast %518 : vector<2x128xf32> to vector<1x2x128xf32>
    tpu.vector_store %arg17[%c6_163, %c0_164, %c0_165], %521 {strides = array<i32>} : memref<7x2x128xf32, #tpu.memory_space<vmem>>, vector<1x2x128xf32>,
    return
  }
}

</mosaic_0001>

<bundles_post_ra>
// kernel: seq2seq_attention_forward.2
= control target key start
LH: loop header
LB: loop body
LE: loop exit
PB: predicated region body
PF: predicated region fallthrough
CT: control target
= control target key end

     0   :  { %s1434_s12 = smov 0   ;;  %s1623_s0 = inlined_call_operand.vmem [shape: f32[2,8,2,128], index: 0, kind: input, shape index: {}]   ;;  %s1624_s1 = inlined_call_operand.vmem [shape: f32[2,32,128], index: 1, kind: input, shape index: {}]   ;;  %s1625_s2 = inlined_call_operand.vmem [shape: f32[2,8,2,32], index: 2, kind: output, shape index: {0}]   ;;  %s1626_s3 = inlined_call_operand.vmem [shape: f32[2,2,32], index: 3, kind: output, shape index: {1}]  }
   0x1 LB: > { %s1150_s13 = sadd.s32 4294967295, %s1407_s12   ;;  %p1154_p0 = scmp.ge.s32.totalorder %s1407_s12, 1  ;;  %s1407_s12 = sphi %s1434_s12, %s14_s12  }
   0x2   : > { %p150_p1 = scmp.lt.s32.totalorder %s1407_s12, 3 }
   0x4   : > { %p151_p2 = pnand %p1154_p0, %p150_p1 }
   0x5   : > { %p183_p3 = scmp.lt.s32.totalorder (!%p151_p2), %s1150_s13, 1  ;;  %s1411_s22 = smov (!%p151_p2), 64  }
   0x6   : > { %154 = sbr.rel (%p151_p2) target bundleno = 5535 (0x159f), region = 28  ;;  %s1412_s23 = smov (!%p151_p2), 32  }
   0x7   : > { %s1413_s27 = smov (!%p151_p2), 96  }
   0xb   : > { %v1409_v0 = vmov 0.0   ;;  %vm1410_vm0 = vmmov 0   ;;  %s1628_s13 = smov (!%p183_p3, %s1150_s13), 1  ;;  %vm310_vm1 = vcmask 254976   ;;  %vm207_vm2 = vcmask 261120  }
   0xc   : > { %1236 = vmatprep.subr.mxu0 %v1409_v0  ;;  %1244 = vmatprep.mubr.msk.f32.mxu0 %vm1410_vm0, %v1409_v0  ;;  %s1194_s14 = sshll.u32 %s1628_s13, 5  ;;  %s1193_s18 = sshll.u32 %s1628_s13, 4 }
   0xd   : > { %1247 = vmatprep.subr.mxu1 %v1409_v0  ;;  %1255 = vmatprep.mubr.msk.f32.mxu1 %vm1410_vm0, %v1409_v0  ;;  %s192_s17 = scalar_lea.vmem %s1624_s1, %s1194_s14  ;;  %s1495_s21 = scalar_lea.vmem %s1623_s0, %s1193_s18 }
   0xe   : > { %v1454_v1 = vld [vmem:[%s192_s17 + $0x18] sm:$0xff]  ;;  %v1456_v2 = vld [vmem:[%s192_s17 + $0x10] sm:$0xff]  ;;  %v1461_v3 = vld [vmem:[%s192_s17 + $0x8] sm:$0xff]  ;;  %s1507_s26 = scalar_lea.vmem %s1625_s2, %s1193_s18  ;;  %s1161_s28 = sshll.u32 %s1628_s13, 1 }
   0xf   : > { %1237 = vmatpush3.msra.mxu0 %v1454_v1  ;;  %1248 = vmatpush3.msra.mxu1 %v1454_v1  ;;  %v1467_v4 = vld [vmem:[%s192_s17] sm:$0xff]  ;;  %s201_s4 = scalar_lea.vmem %s1626_s3, %s1161_s28 }
  0x10   : > { %1238 = vmatprep.subr.mxu0 %v1409_v0  ;;  %1249 = vmatprep.subr.mxu1 %v1409_v0  ;;  %v206_v5 = vld [vmem:[%s1495_s21] sm:$0x3]  ;;  %v1163_v23 = vld [vmem:[%s1495_s21 + $0x2] sm:$0x3]  ;;  %v1167_v41 = vld [vmem:[%s1495_s21 + $0x4] sm:$0x3] }
  0x11   : > { %1239 = vmatpush3.msra.mxu0 %v1456_v2  ;;  %1250 = vmatpush3.msra.mxu1 %v1456_v2  ;;  %v1171_v59 = vld [vmem:[%s1495_s21 + $0x6] sm:$0x3] }
  0x12   : > { %1240 = vmatprep.subr.mxu0 %v1409_v0  ;;  %1251 = vmatprep.subr.mxu1 %v1409_v0 }
  0x13   : > { %1241 = vmatpush3.msra.mxu0 %v1461_v3  ;;  %1252 = vmatpush3.msra.mxu1 %v1461_v3 }
  0x14   : > { %1242 = vmatprep.subr.mxu0 %v1409_v0  ;;  %1253 = vmatprep.subr.mxu1 %v1409_v0 }
  0x15   : > { %1243 = vmatpush3.msra.mxu0 %v1467_v4  ;;  %1254 = vmatpush3.msra.mxu1 %v1467_v4 }
  0x16   : > { %1245 = vmatmul.mubr.f32.vlgmr.msra.gmra.mxu0 %v1409_v0  ;;  %1258 = vmatprep.subr.mxu0 %v1409_v0 }
  0x17   : > { %1259 = vmatpush3.msra.mxu0 %v1454_v1  ;;  %1266 = vmatprep.mubr.msk.f32.mxu0 %vm1410_vm0, %v1409_v0 }
  0x18   : > { %1260 = vmatprep.subr.mxu0 %v1409_v0  ;;  %1269 = vmatprep.subr.mxu1 %v1409_v0 }
  0x19   : > { %1261 = vmatpush3.msra.mxu0 %v1456_v2 }
  0x1a   : > { %1262 = vmatprep.subr.mxu0 %v1409_v0 }
  0x1b   : > { %1263 = vmatpush3.msra.mxu0 %v1461_v3 }
  0x1c   : > { %1264 = vmatprep.subr.mxu0 %v1409_v0 }
  0x1d   : > { %1265 = vmatpush3.msra.mxu0 %v1467_v4 }
  0x1e   : > { %1280 = vmatprep.subr.mxu0 %v1409_v0 }
  0xd6   : > { %v277_v6 = vpop.f32.mrf.mxu0 }
  0xd7   : > { %v281_v7 = vadd.f32 %v277_v6, %v206_v5 }
  0xd8   : > { %v1246_v8 = vpop.f32.mrf.mxu0 }
  0xd9   : > { %1337 = vtanh.f32 %v281_v7  ;;  %v1162_v10 = vmul.f32 -1.442695, %v281_v7 }
  0xdb   : > { %1339 = vpow2.f32 %v1162_v10 }
  0xe6   : > { %v1338_v9 = vpop.eup %1337 }
  0xe7   : > { %291 = vrot.lane.b32.xlu0 %v1338_v9, %s1411_s22 }
  0xe8   : > { %v1340_v11 = vpop.eup %1339 }
  0xe9   : > { %v285_v12 = vadd.f32 1.0, %v1340_v11 }
  0xeb   : > { %1341 = vrcp.f32 %v285_v12 }
  0xf8   : > { %v1342_v13 = vpop.eup %1341 }
  0xf9   : > { %v289_v16 = vmul.f32 0.0, %v1342_v13 }
 0x159   : > { %v292_v14 = vpop.permute.xlu0 %291 }
 0x15a   : > { %v294_v15 = vmul.f32 %v1342_v13, %v292_v14 }
 0x15c   : > { %296 = vrot.lane.b32.xlu0 %v294_v15, %s1412_s23 }
 0x1ce   : > { %v297_v17 = vpop.permute.xlu0 %296 }
 0x1cf   : > { %v299_v18 = vadd.f32 %v297_v17, %v289_v16 }
 0x1d1   : > { %1343 = vtanh.f32 %v299_v18 }
 0x1de   : > { %v1344_v19 = vpop.eup %1343 }
 0x1df   : > { %302 = vrot.lane.b32.xlu1 %v1344_v19, %s1411_s22 }
 0x251   : > { %v303_v20 = vpop.permute.xlu1 %302 }
 0x252   : > { %v305_v21 = vmul.f32 %v1342_v13, %v303_v20 }
 0x254   : > { %307 = vrot.lane.b32.xlu1 %v305_v21, %s1412_s23 }
 0x2c6   : > { %v308_v22 = vpop.permute.xlu1 %307 }
 0x2c7   : > { %311 = vst.msk [vmem:[%s1507_s26] sm:$0x3] %vm310_vm1, %v308_v22  ;;  %1256 = vmatmul.mubr.msk.f32.vlgmr.msra.gmra.mxu1 %vm207_vm2, %v308_v22 }
 0x2c8   : > { %1270 = vmatpush3.msra.mxu1 %v1454_v1  ;;  %1277 = vmatprep.mubr.msk.f32.mxu1 %vm1410_vm0, %v1409_v0 }
 0x2c9   : > { %1271 = vmatprep.subr.mxu1 %v1409_v0 }
 0x2ca   : > { %1272 = vmatpush3.msra.mxu1 %v1456_v2 }
 0x2cb   : > { %1273 = vmatprep.subr.mxu1 %v1409_v0 }
 0x2cc   : > { %1274 = vmatpush3.msra.mxu1 %v1461_v3 }
 0x2cd   : > { %1275 = vmatprep.subr.mxu1 %v1409_v0 }
 0x2ce   : > { %1276 = vmatpush3.msra.mxu1 %v1467_v4 }
 0x2cf   : > { %1291 = vmatprep.subr.mxu1 %v1409_v0 }
 0x387   : > { %v382_v24 = vpop.f32.mrf.mxu1 }
 0x388   : > { %v386_v25 = vadd.f32 %v1163_v23, %v382_v24 }
 0x389   : > { %v1257_v26 = vpop.f32.mrf.mxu1 }
 0x38a   : > { %1345 = vtanh.f32 %v386_v25  ;;  %v1165_v28 = vmul.f32 -1.442695, %v386_v25 }
 0x38c   : > { %1347 = vpow2.f32 %v1165_v28 }
 0x397   : > { %v1346_v27 = vpop.eup %1345 }
 0x398   : > { %396 = vrot.lane.b32.xlu0 %v1346_v27, %s1411_s22 }
 0x399   : > { %v1348_v29 = vpop.eup %1347 }
 0x39a   : > { %v390_v30 = vadd.f32 1.0, %v1348_v29 }
 0x39c   : > { %1349 = vrcp.f32 %v390_v30 }
 0x3a9   : > { %v1350_v31 = vpop.eup %1349 }
 0x3aa   : > { %v394_v34 = vmul.f32 %v1350_v31, %v299_v18  ;;  %v1175_v18 = vld [vmem:[%s1495_s21 + $0x8] sm:$0x3] }
 0x40a   : > { %v397_v32 = vpop.permute.xlu0 %396 }
 0x40b   : > { %v399_v33 = vmul.f32 %v1350_v31, %v397_v32 }
 0x40d   : > { %401 = vrot.lane.b32.xlu1 %v399_v33, %s1412_s23 }
 0x47f   : > { %v402_v35 = vpop.permute.xlu1 %401 }
 0x480   : > { %v404_v36 = vadd.f32 %v402_v35, %v394_v34 }
 0x482   : > { %1351 = vtanh.f32 %v404_v36 }
 0x48f   : > { %v1352_v37 = vpop.eup %1351 }
 0x490   : > { %407 = vrot.lane.b32.xlu0 %v1352_v37, %s1411_s22 }
 0x502   : > { %v408_v38 = vpop.permute.xlu0 %407 }
 0x503   : > { %v410_v39 = vmul.f32 %v1350_v31, %v408_v38 }
 0x505   : > { %412 = vrot.lane.b32.xlu1 %v410_v39, %s1412_s23 }
 0x577   : > { %v413_v40 = vpop.permute.xlu1 %412 }
 0x578   : > { %1166 = vst.msk [vmem:[%s1507_s26 + $0x2] sm:$0x3] %vm310_vm1, %v413_v40  ;;  %1267 = vmatmul.mubr.msk.f32.vlgmr.msra.gmra.mxu0 %vm207_vm2, %v413_v40 }
 0x579   : > { %1281 = vmatpush3.msra.mxu0 %v1454_v1  ;;  %1288 = vmatprep.mubr.msk.f32.mxu0 %vm1410_vm0, %v1409_v0 }
 0x57a   : > { %1282 = vmatprep.subr.mxu0 %v1409_v0 }
 0x57b   : > { %1283 = vmatpush3.msra.mxu0 %v1456_v2 }
 0x57c   : > { %1284 = vmatprep.subr.mxu0 %v1409_v0 }
 0x57d   : > { %1285 = vmatpush3.msra.mxu0 %v1461_v3 }
 0x57e   : > { %1286 = vmatprep.subr.mxu0 %v1409_v0 }
 0x57f   : > { %1287 = vmatpush3.msra.mxu0 %v1467_v4 }
 0x580   : > { %1302 = vmatprep.subr.mxu0 %v1409_v0 }
 0x638   : > { %v487_v42 = vpop.f32.mrf.mxu0 }
 0x639   : > { %v491_v43 = vadd.f32 %v1167_v41, %v487_v42 }
 0x63a   : > { %v1268_v44 = vpop.f32.mrf.mxu0 }
 0x63b   : > { %1353 = vtanh.f32 %v491_v43  ;;  %v1169_v46 = vmul.f32 -1.442695, %v491_v43 }
 0x63d   : > { %1355 = vpow2.f32 %v1169_v46 }
 0x648   : > { %v1354_v45 = vpop.eup %1353 }
 0x649   : > { %501 = vrot.lane.b32.xlu0 %v1354_v45, %s1411_s22 }
 0x64a   : > { %v1356_v47 = vpop.eup %1355 }
 0x64b   : > { %v495_v48 = vadd.f32 1.0, %v1356_v47 }
 0x64d   : > { %1357 = vrcp.f32 %v495_v48 }
 0x65a   : > { %v1358_v49 = vpop.eup %1357 }
 0x65b   : > { %v499_v52 = vmul.f32 %v1358_v49, %v404_v36  ;;  %v1179_v36 = vld [vmem:[%s1495_s21 + $0xa] sm:$0x3] }
 0x6bb   : > { %v502_v50 = vpop.permute.xlu0 %501 }
 0x6bc   : > { %v504_v51 = vmul.f32 %v1358_v49, %v502_v50 }
 0x6be   : > { %506 = vrot.lane.b32.xlu1 %v504_v51, %s1412_s23 }
 0x730   : > { %v507_v53 = vpop.permute.xlu1 %506 }
 0x731   : > { %v509_v54 = vadd.f32 %v507_v53, %v499_v52 }
 0x733   : > { %1359 = vtanh.f32 %v509_v54 }
 0x740   : > { %v1360_v55 = vpop.eup %1359 }
 0x741   : > { %512 = vrot.lane.b32.xlu0 %v1360_v55, %s1411_s22 }
 0x7b3   : > { %v513_v56 = vpop.permute.xlu0 %512 }
 0x7b4   : > { %v515_v57 = vmul.f32 %v1358_v49, %v513_v56  ;;  %v1183_v49 = vld [vmem:[%s1495_s21 + $0xc] sm:$0x3] }
 0x7b6   : > { %517 = vrot.lane.b32.xlu1 %v515_v57, %s1412_s23 }
 0x828   : > { %v518_v58 = vpop.permute.xlu1 %517 }
 0x829   : > { %1170 = vst.msk [vmem:[%s1507_s26 + $0x4] sm:$0x3] %vm310_vm1, %v518_v58  ;;  %1278 = vmatmul.mubr.msk.f32.vlgmr.msra.gmra.mxu1 %vm207_vm2, %v518_v58 }
 0x82a   : > { %1292 = vmatpush3.msra.mxu1 %v1454_v1  ;;  %1299 = vmatprep.mubr.msk.f32.mxu1 %vm1410_vm0, %v1409_v0 }
 0x82b   : > { %1293 = vmatprep.subr.mxu1 %v1409_v0 }
 0x82c   : > { %1294 = vmatpush3.msra.mxu1 %v1456_v2 }
 0x82d   : > { %1295 = vmatprep.subr.mxu1 %v1409_v0 }
 0x82e   : > { %1296 = vmatpush3.msra.mxu1 %v1461_v3 }
 0x82f   : > { %1297 = vmatprep.subr.mxu1 %v1409_v0 }
 0x830   : > { %1298 = vmatpush3.msra.mxu1 %v1467_v4 }
 0x831   : > { %1313 = vmatprep.subr.mxu1 %v1409_v0 }
 0x8e9   : > { %v592_v60 = vpop.f32.mrf.mxu1 }
 0x8ea   : > { %v596_v61 = vadd.f32 %v1171_v59, %v592_v60 }
 0x8eb   : > { %v1279_v62 = vpop.f32.mrf.mxu1 }
 0x8ec   : > { %1361 = vtanh.f32 %v596_v61  ;;  %v1173_v5 = vmul.f32 -1.442695, %v596_v61 }
 0x8ee   : > { %1363 = vpow2.f32 %v1173_v5 }
 0x8f9   : > { %v1362_v63 = vpop.eup %1361 }
 0x8fa   : > { %606 = vrot.lane.b32.xlu0 %v1362_v63, %s1411_s22 }
 0x8fb   : > { %v1364_v6 = vpop.eup %1363 }
 0x8fc   : > { %v600_v7 = vadd.f32 1.0, %v1364_v6 }
 0x8fe   : > { %1365 = vrcp.f32 %v600_v7 }
 0x90b   : > { %v1366_v8 = vpop.eup %1365 }
 0x90c   : > { %v604_v11 = vmul.f32 %v1366_v8, %v509_v54 }
 0x96c   : > { %v607_v9 = vpop.permute.xlu0 %606 }
 0x96d   : > { %v609_v10 = vmul.f32 %v1366_v8, %v607_v9 }
 0x96f   : > { %611 = vrot.lane.b32.xlu1 %v609_v10, %s1412_s23 }
 0x9e1   : > { %v612_v12 = vpop.permute.xlu1 %611 }
 0x9e2   : > { %v614_v13 = vadd.f32 %v612_v12, %v604_v11 }
 0x9e4   : > { %1367 = vtanh.f32 %v614_v13 }
 0x9f1   : > { %v1368_v14 = vpop.eup %1367 }
 0x9f2   : > { %617 = vrot.lane.b32.xlu0 %v1368_v14, %s1411_s22 }
 0xa64   : > { %v618_v15 = vpop.permute.xlu0 %617 }
 0xa65   : > { %v620_v16 = vmul.f32 %v1366_v8, %v618_v15  ;;  %v1187_v8 = vld [vmem:[%s1495_s21 + $0xe] sm:$0x3] }
 0xa67   : > { %622 = vrot.lane.b32.xlu1 %v620_v16, %s1412_s23 }
 0xad9   : > { %v623_v17 = vpop.permute.xlu1 %622 }
 0xada   : > { %1174 = vst.msk [vmem:[%s1507_s26 + $0x6] sm:$0x3] %vm310_vm1, %v623_v17  ;;  %1289 = vmatmul.mubr.msk.f32.vlgmr.msra.gmra.mxu0 %vm207_vm2, %v623_v17 }
 0xadb   : > { %1303 = vmatpush3.msra.mxu0 %v1454_v1  ;;  %1310 = vmatprep.mubr.msk.f32.mxu0 %vm1410_vm0, %v1409_v0 }
 0xadc   : > { %1304 = vmatprep.subr.mxu0 %v1409_v0 }
 0xadd   : > { %1305 = vmatpush3.msra.mxu0 %v1456_v2 }
 0xade   : > { %1306 = vmatprep.subr.mxu0 %v1409_v0 }
 0xadf   : > { %1307 = vmatpush3.msra.mxu0 %v1461_v3 }
 0xae0   : > { %1308 = vmatprep.subr.mxu0 %v1409_v0 }
 0xae1   : > { %1309 = vmatpush3.msra.mxu0 %v1467_v4 }
 0xb9a   : > { %v697_v19 = vpop.f32.mrf.mxu0 }
 0xb9b   : > { %v701_v20 = vadd.f32 %v1175_v18, %v697_v19 }
 0xb9c   : > { %v1290_v21 = vpop.f32.mrf.mxu0 }
 0xb9d   : > { %1369 = vtanh.f32 %v701_v20  ;;  %v1177_v23 = vmul.f32 -1.442695, %v701_v20 }
 0xb9f   : > { %1371 = vpow2.f32 %v1177_v23 }
 0xbaa   : > { %v1370_v22 = vpop.eup %1369 }
 0xbab   : > { %711 = vrot.lane.b32.xlu0 %v1370_v22, %s1411_s22 }
 0xbac   : > { %v1372_v24 = vpop.eup %1371 }
 0xbad   : > { %v705_v25 = vadd.f32 1.0, %v1372_v24 }
 0xbaf   : > { %1373 = vrcp.f32 %v705_v25 }
 0xbbc   : > { %v1374_v26 = vpop.eup %1373 }
 0xbbd   : > { %v709_v29 = vmul.f32 %v1374_v26, %v614_v13 }
 0xc1d   : > { %v712_v27 = vpop.permute.xlu0 %711 }
 0xc1e   : > { %v714_v28 = vmul.f32 %v1374_v26, %v712_v27 }
 0xc20   : > { %716 = vrot.lane.b32.xlu1 %v714_v28, %s1412_s23 }
 0xc92   : > { %v717_v30 = vpop.permute.xlu1 %716 }
 0xc93   : > { %v719_v31 = vadd.f32 %v717_v30, %v709_v29 }
 0xc95   : > { %1375 = vtanh.f32 %v719_v31 }
 0xca2   : > { %v1376_v32 = vpop.eup %1375 }
 0xca3   : > { %722 = vrot.lane.b32.xlu0 %v1376_v32, %s1411_s22 }
 0xd15   : > { %v723_v33 = vpop.permute.xlu0 %722 }
 0xd16   : > { %v725_v34 = vmul.f32 %v1374_v26, %v723_v33 }
 0xd18   : > { %727 = vrot.lane.b32.xlu1 %v725_v34, %s1412_s23 }
 0xd8a   : > { %v728_v35 = vpop.permute.xlu1 %727 }
 0xd8b   : > { %1178 = vst.msk [vmem:[%s1507_s26 + $0x8] sm:$0x3] %vm310_vm1, %v728_v35  ;;  %1300 = vmatmul.mubr.msk.f32.vlgmr.msra.gmra.mxu1 %vm207_vm2, %v728_v35 }
 0xd8c   : > { %1314 = vmatpush3.msra.mxu1 %v1454_v1  ;;  %1321 = vmatprep.mubr.msk.f32.mxu1 %vm1410_vm0, %v1409_v0 }
 0xd8d   : > { %1315 = vmatprep.subr.mxu1 %v1409_v0 }
 0xd8e   : > { %1316 = vmatpush3.msra.mxu1 %v1456_v2 }
 0xd8f   : > { %1317 = vmatprep.subr.mxu1 %v1409_v0 }
 0xd90   : > { %1318 = vmatpush3.msra.mxu1 %v1461_v3 }
 0xd91   : > { %1319 = vmatprep.subr.mxu1 %v1409_v0 }
 0xd92   : > { %1320 = vmatpush3.msra.mxu1 %v1467_v4 }
 0xe4b   : > { %v802_v37 = vpop.f32.mrf.mxu1 }
 0xe4c   : > { %v806_v38 = vadd.f32 %v1179_v36, %v802_v37 }
 0xe4d   : > { %v1301_v39 = vpop.f32.mrf.mxu1 }
 0xe4e   : > { %1377 = vtanh.f32 %v806_v38  ;;  %v1181_v40 = vmul.f32 -1.442695, %v806_v38 }
 0xe50   : > { %1379 = vpow2.f32 %v1181_v40 }
 0xe5b   : > { %v1378_v1 = vpop.eup %1377 }
 0xe5c   : > { %816 = vrot.lane.b32.xlu0 %v1378_v1, %s1411_s22 }
 0xe5d   : > { %v1380_v41 = vpop.eup %1379 }
 0xe5e   : > { %v810_v2 = vadd.f32 1.0, %v1380_v41 }
 0xe60   : > { %1381 = vrcp.f32 %v810_v2 }
 0xe6d   : > { %v1382_v42 = vpop.eup %1381 }
 0xe6e   : > { %v814_v4 = vmul.f32 %v1382_v42, %v719_v31 }
 0xece   : > { %v817_v3 = vpop.permute.xlu0 %816 }
 0xecf   : > { %v819_v0 = vmul.f32 %v1382_v42, %v817_v3 }
 0xed1   : > { %821 = vrot.lane.b32.xlu1 %v819_v0, %s1412_s23 }
 0xf43   : > { %v822_v43 = vpop.permute.xlu1 %821 }
 0xf44   : > { %v824_v44 = vadd.f32 %v822_v43, %v814_v4 }
 0xf46   : > { %1383 = vtanh.f32 %v824_v44 }
 0xf53   : > { %v1384_v45 = vpop.eup %1383 }
 0xf54   : > { %827 = vrot.lane.b32.xlu0 %v1384_v45, %s1411_s22 }
 0xfc6   : > { %v828_v46 = vpop.permute.xlu0 %827 }
 0xfc7   : > { %v830_v47 = vmul.f32 %v1382_v42, %v828_v46 }
 0xfc9   : > { %832 = vrot.lane.b32.xlu1 %v830_v47, %s1412_s23 }
0x103b   : > { %v833_v48 = vpop.permute.xlu1 %832 }
0x103c   : > { %1182 = vst.msk [vmem:[%s1507_s26 + $0xa] sm:$0x3] %vm310_vm1, %v833_v48  ;;  %1311 = vmatmul.mubr.msk.f32.vlgmr.msra.gmra.mxu0 %vm207_vm2, %v833_v48 }
0x10fc   : > { %v907_v50 = vpop.f32.mrf.mxu0 }
0x10fd   : > { %v911_v51 = vadd.f32 %v1183_v49, %v907_v50 }
0x10fe   : > { %v1312_v52 = vpop.f32.mrf.mxu0 }
0x10ff   : > { %1385 = vtanh.f32 %v911_v51  ;;  %v1185_v54 = vmul.f32 -1.442695, %v911_v51 }
0x1101   : > { %1387 = vpow2.f32 %v1185_v54 }
0x110c   : > { %v1386_v53 = vpop.eup %1385 }
0x110d   : > { %921 = vrot.lane.b32.xlu0 %v1386_v53, %s1411_s22 }
0x110e   : > { %v1388_v55 = vpop.eup %1387 }
0x110f   : > { %v915_v56 = vadd.f32 1.0, %v1388_v55 }
0x1111   : > { %1389 = vrcp.f32 %v915_v56 }
0x111e   : > { %v1390_v57 = vpop.eup %1389 }
0x111f   : > { %v919_v60 = vmul.f32 %v1390_v57, %v824_v44 }
0x117f   : > { %v922_v58 = vpop.permute.xlu0 %921 }
0x1180   : > { %v924_v59 = vmul.f32 %v1390_v57, %v922_v58 }
0x1182   : > { %926 = vrot.lane.b32.xlu1 %v924_v59, %s1412_s23 }
0x11f4   : > { %v927_v61 = vpop.permute.xlu1 %926 }
0x11f5   : > { %v929_v62 = vadd.f32 %v927_v61, %v919_v60 }
0x11f7   : > { %1391 = vtanh.f32 %v929_v62 }
0x1204   : > { %v1392_v63 = vpop.eup %1391 }
0x1205   : > { %932 = vrot.lane.b32.xlu0 %v1392_v63, %s1411_s22 }
0x1277   : > { %v933_v5 = vpop.permute.xlu0 %932 }
0x1278   : > { %v935_v6 = vmul.f32 %v1390_v57, %v933_v5 }
0x127a   : > { %937 = vrot.lane.b32.xlu1 %v935_v6, %s1412_s23 }
0x12ec   : > { %v938_v7 = vpop.permute.xlu1 %937 }
0x12ed   : > { %1186 = vst.msk [vmem:[%s1507_s26 + $0xc] sm:$0x3] %vm310_vm1, %v938_v7  ;;  %1322 = vmatmul.mubr.msk.f32.vlgmr.msra.gmra.mxu1 %vm207_vm2, %v938_v7 }
0x13ad   : > { %v1012_v9 = vpop.f32.mrf.mxu1 }
0x13ae   : > { %v1016_v10 = vadd.f32 %v1187_v8, %v1012_v9 }
0x13af   : > { %v1323_v11 = vpop.f32.mrf.mxu1 }
0x13b0   : > { %1393 = vtanh.f32 %v1016_v10  ;;  %v1189_v13 = vmul.f32 -1.442695, %v1016_v10 }
0x13b2   : > { %1395 = vpow2.f32 %v1189_v13 }
0x13bd   : > { %v1394_v12 = vpop.eup %1393 }
0x13be   : > { %1026 = vrot.lane.b32.xlu0 %v1394_v12, %s1411_s22 }
0x13bf   : > { %v1396_v14 = vpop.eup %1395 }
0x13c0   : > { %v1020_v15 = vadd.f32 1.0, %v1396_v14 }
0x13c2   : > { %1397 = vrcp.f32 %v1020_v15 }
0x13cf   : > { %v1398_v16 = vpop.eup %1397 }
0x13d0   : > { %v1024_v19 = vmul.f32 %v1398_v16, %v929_v62 }
0x1430   : > { %v1027_v17 = vpop.permute.xlu0 %1026 }
0x1431   : > { %v1029_v18 = vmul.f32 %v1398_v16, %v1027_v17 }
0x1433   : > { %1031 = vrot.lane.b32.xlu1 %v1029_v18, %s1412_s23 }
0x14a5   : > { %v1032_v20 = vpop.permute.xlu1 %1031 }
0x14a6   : > { %v1034_v21 = vadd.f32 %v1032_v20, %v1024_v19 }
0x14a8   : > { %1399 = vtanh.f32 %v1034_v21 }
0x14b5   : > { %v1400_v22 = vpop.eup %1399 }
0x14b6   : > { %1037 = vrot.lane.b32.xlu0 %v1400_v22, %s1411_s22 }
0x14ba   : > { %1048 = vrot.lane.b32.xlu0 %v1034_v21, %s1413_s27 }
0x1528   : > { %v1038_v23 = vpop.permute.xlu0 %1037 }
0x1529   : > { %v1040_v24 = vmul.f32 %v1398_v16, %v1038_v23 }
0x152b   : > { %1042 = vrot.lane.b32.xlu1 %v1040_v24, %s1412_s23 }
0x152c   : > { %v1049_v25 = vpop.permute.xlu0 %1048 }
0x152d   : > { %1051 = vst.msk [vmem:[%s201_s4] sm:$0x3] %vm310_vm1, %v1049_v25 }
0x159d   : > { %v1043_v26 = vpop.permute.xlu1 %1042 }
0x159e   : > { %1190 = vst.msk [vmem:[%s1507_s26 + $0xe] sm:$0x3] %vm310_vm1, %v1043_v26 }
0x159f PF: > { %s14_s12 = sadd.s32 1, %s1407_s12  }
0x15a0   : > { %p11_p4 = scmp.ge.s32.totalorder %s14_s12, 4  }
0x15a2   :  { %13 = sbr.rel (!%p11_p4) target bundleno = 1 (0x1), region = 87 }

// kernel: seq2seq_attention_forward.3
= control target key start
LH: loop header
LB: loop body
LE: loop exit
PB: predicated region body
PF: predicated region fallthrough
CT: control target
= control target key end

     0   :  { %s5605_s0 = inlined_call_operand.vmem [shape: s32[7], index: 0, kind: input, shape index: {}]   ;;  %s5606_s1 = inlined_call_operand.vmem [shape: s32[8,2], index: 1, kind: input, shape index: {}]   ;;  %s5607_s2 = inlined_call_operand.vmem [shape: f32[2,64], index: 2, kind: input, shape index: {}]   ;;  %s5608_s3 = inlined_call_operand.vmem [shape: f32[2,64], index: 3, kind: input, shape index: {}]   ;;  %s5609_s4 = inlined_call_operand.vmem [shape: f32[2,8,64], index: 4, kind: input, shape index: {}]   ;;  %s5610_s5 = inlined_call_operand.vmem [shape: f32[64,32], index: 5, kind: input, shape index: {}]   ;;  %s5611_s6 = inlined_call_operand.vmem [shape: f32[1,32], index: 6, kind: input, shape index: {}]   ;;  %s5612_s7 = inlined_call_operand.vmem [shape: f32[64,32], index: 7, kind: input, shape index: {}]   ;;  %s5613_s8 = inlined_call_operand.vmem [shape: f32[1,32], index: 8, kind: input, shape index: {}]   ;;  %s5614_s9 = inlined_call_operand.vmem [shape: f32[1,32], index: 9, kind: input, shape index: {}]   ;;  %s5615_s10 = inlined_call_operand.vmem [shape: f32[1,64], index: 10, kind: input, shape index: {}]   ;;  %s5616_s11 = inlined_call_operand.<no memory space> [shape: f32[1,1], index: 11, kind: input, shape index: {}]   ;;  %s5617_s12 = inlined_call_operand.vmem [shape: f32[64,16], index: 12, kind: input, shape index: {}]   ;;  %s5618_s13 = inlined_call_operand.vmem [shape: f32[112,128], index: 13, kind: input, shape index: {}]   ;;  %s5619_s14 = inlined_call_operand.vmem [shape: f32[1,128], index: 14, kind: input, shape index: {}]   ;;  %s5620_s15 = inlined_call_operand.vmem [shape: f32[32,128], index: 15, kind: input, shape index: {}]   ;;  %s5621_s16 = inlined_call_operand.vmem [shape: f32[1,128], index: 16, kind: input, shape index: {}]   ;;  %s5622_s17 = inlined_call_operand.vmem [shape: f32[7,2,128], index: 17, kind: output, shape index: {}]  }
   0x1   :  { %5623 = sst [smem:[#allocation9_spill]] %s5605_s0  ;;  %v22_v0 = vstv %s5616_s11 }
   0x2   :  { %5624 = sst [smem:[#allocation10_spill]] %s5606_s1  ;;  %23 = vst [vmem:[#allocation2] sm:$0x1] %v22_v0 }
   0x3   :  { %24 = vsyncpa [#allocation4], 0  ;;  %s5625_s28 = sld [smem:[#allocation9_spill]] }
   0x9   :  { %s32_s29 = sshll.u32 %s5625_s28, 4  ;;  %s33_s29 = int_to_ptr.vmem [resolvable:$true] %s32_s29 }
   0xa   :  { %25 = vsyncpa [#allocation6], 0  ;;  %s5626_s18 = sld [smem:[#allocation10_spill]]  ;;  %s4191_s1 = scalar_lea.vmem %s33_s29, 16 }
   0xb   :  { %p4192_p0 = scmp.ne.s32.totalorder %s33_s29, %s4191_s1  ;;  %p4196_p1 = scmp.lt.s32.totalorder %s33_s29, %s33_s29 }
   0xc   :  { %p4197_p2 = scmp.lt.s32.totalorder %s4191_s1, %s4191_s1 }
   0xe   :  { %p4198_p3 = por %p4197_p2, %p4196_p1 }
  0x10   :  { %s42_s19 = sshll.u32 %s5626_s18, 4  ;;  %p4199_p4 = pnand %p4198_p3, %p4192_p0  ;;  %s43_s19 = int_to_ptr.vmem [resolvable:$true] %s42_s19 }
  0x12   :  { %4202 = shalt.err (!%p4199_p4)
}
  0x13   :  { %s4219_s11 = smov [#allocation3]   ;;  %s4203_s20 = scalar_lea.vmem %s43_s19, 128 }
  0x14   :  { %35 = dma.vmem_to_smem %s33_s29, 16, %s4219_s11, [#allocation4]  }
  0x15   :  { %p4204_p5 = scmp.ne.s32.totalorder %s43_s19, %s4203_s20  ;;  %p4208_p6 = scmp.lt.s32.totalorder %s43_s19, %s43_s19 }
  0x16   :  { %p4209_p7 = scmp.lt.s32.totalorder %s4203_s20, %s4203_s20 }
  0x18   :  { %p4210_p8 = por %p4209_p7, %p4208_p6 }
  0x1a   :  { %p4211_p9 = pnand %p4210_p8, %p4204_p5 }
  0x1c   :  { %4214 = shalt.err (!%p4211_p9)
}
  0x1d   :  { %s4220_s21 = smov [#allocation5]  }
  0x1e   :  { %45 = dma.vmem_to_smem %s43_s19, 128, %s4220_s21, [#allocation6]  }
  0x1f   :  { %4215 = dma.done.wait [#allocation4], 16  }
  0x20   :  { %4216 = vsyncadd [#allocation4], 4294967280 }
  0x21   :  { %4217 = dma.done.wait [#allocation6], 128  }
  0x22   :  { %4218 = vsyncadd [#allocation6], 4294967168 }
  0x23   :  { %82 = sfence }
  0x24   :  { %v123_v1 = vld [vmem:[%s5610_s5 + $0x38] sm:$0xff]  ;;  %v4221_v2 = vmov 0.0   ;;  %v122_v3 = vld [vmem:[%s5610_s5 + $0x30] sm:$0xff]  ;;  %vm4222_vm0 = vmmov 0   ;;  %v121_v4 = vld [vmem:[%s5610_s5 + $0x28] sm:$0xff]  ;;  %vm131_vm1 = vcmask 523264   ;;  %v315_v31 = vlaneseq }
  0x25   :  { %3560 = vmatprep.subr.mxu0 %v4221_v2  ;;  %3576 = vmatprep.mubr.msk.f32.mxu0 %vm4222_vm0, %v4221_v2  ;;  %v120_v5 = vld [vmem:[%s5610_s5 + $0x20] sm:$0xff]  ;;  %v119_v6 = vld [vmem:[%s5610_s5 + $0x18] sm:$0xff]  ;;  %v118_v7 = vld [vmem:[%s5610_s5 + $0x10] sm:$0xff]  ;;  %v4223_v15 = vmov 0   ;;  %vm403_vm2 = vcmask 254976   ;;  %s309_s21 = sld [smem:[#allocation5]] }
  0x26   :  { %3561 = vmatpush3.msra.mxu0 %v123_v1  ;;  %3579 = vmatprep.subr.mxu1 %v4221_v2  ;;  %v117_v8 = vld [vmem:[%s5610_s5 + $0x8] sm:$0xff]  ;;  %v116_v9 = vld [vmem:[%s5610_s5] sm:$0xff]  ;;  %v4405_v27 = vld [vmem:[%s5617_s12 + $0x38] sm:$0xff]  ;;  %v409_v32 = vshrl.u32 %v315_v31, 7  ;;  %s3276_s22 = sld [smem:[#allocation5 + $0x1]]  ;;  %vm313_vm3 = vcmask 1040384  }
  0x27   :  { %3562 = vmatprep.subr.mxu0 %v4221_v2  ;;  %3595 = vmatprep.mubr.msk.f32.mxu1 %vm4222_vm0, %v4221_v2  ;;  %v115_v10 = vld [vmem:[%s5607_s2] sm:$0x3]  ;;  %v4375_v11 = vld [vmem:[%s5609_s4 + $0x8] sm:$0xff]  ;;  %v4410_v28 = vld [vmem:[%s5617_s12 + $0x30] sm:$0xff]  ;;  %v4475_v54 = vand.u32 127, %v315_v31  ;;  %vm449_vm4 = vcmask 1041409  }
  0x28   :  { %3563 = vmatpush3.msra.mxu0 %v122_v3  ;;  %v3275_v12 = vld [vmem:[%s5615_s10] ss:$0 sm:$0xff]  ;;  %4035 = vset.pattern.permute.xlu1 %v4223_v15  ;;  %v4417_v29 = vld [vmem:[%s5617_s12 + $0x28] sm:$0xff]  ;;  %v4432_v34 = vsub.s32 1, %v409_v32  ;;  %v4434_v35 = vsub.s32 0, %v409_v32  ;;  %v4448_v44 = vld [vmem:[%s5617_s12 + $0x18] sm:$0xff] }
  0x29   :  { %3564 = vmatprep.subr.mxu0 %v4221_v2  ;;  %v302_v13 = vmul.f32 %v3275_v12, %v4375_v11  ;;  %4036 = vset.pattern.permute.xlu0 %v4223_v15  ;;  %v3280_v16 = vld [vmem:[#allocation2] ss:$0 sm:$0xff]  ;;  %v4456_v47 = vld [vmem:[%s5617_s12 + $0x10] sm:$0xff]  ;;  %v4461_v48 = vld [vmem:[%s5617_s12 + $0x8] sm:$0xff]  ;;  %v4478_v55 = vsub.s32 %v4475_v54, %v409_v32  ;;  %vm452_vm5 = vcmask 58368   ;;  %s4224_s23 = smov 64  }
  0x2a   :  { %3565 = vmatpush3.msra.mxu0 %v121_v4  ;;  %v3271_v17 = vld [vmem:[%s5611_s6] ss:$0 sm:$0xff]  ;;  %v208_v31 = vld [vmem:[%s5612_s7 + $0x10] sm:$0xff]  ;;  %v207_v32 = vld [vmem:[%s5612_s7 + $0x8] sm:$0xff]  ;;  %s4225_s2 = smov 80   ;;  %vm548_vm7 = vcmask 654336  }
  0x2b   :  { %3566 = vmatprep.subr.mxu0 %v4221_v2  ;;  %v306_v14 = vsel %vm131_vm1, %v302_v13, 0.0  ;;  %v4388_v19 = vld [vmem:[%s5614_s9] ss:$0 sm:$0xff]  ;;  %v310_v50 = vstv %s309_s21  ;;  %vm556_vm8 = vcmask 916480   ;;  %s4226_s18 = smov 32   ;;  %s4227_s25 = smov 96  }
  0x2c   :  { %3567 = vmatpush3.msra.mxu0 %v120_v5  ;;  %307 = vadd.xlane.f32.xlu1 %v306_v14  ;;  %v4393_v20 = vld [vmem:[%s5609_s4] sm:$0xff]  ;;  %v312_v51 = vstv %s3276_s22  ;;  %vm667_vm9 = vcmask 261120   ;;  %vm741_vm10 = vcmask 1041408   ;;  %s762_s28 = sld [smem:[#allocation3]] }
  0x2d   :  { %3568 = vmatprep.subr.mxu0 %v4221_v2  ;;  %v301_v24 = vmul.f32 %v3275_v12, %v4393_v20  ;;  %v4424_v30 = vld [vmem:[%s5617_s12 + $0x20] sm:$0xff]  ;;  %v314_v53 = vsel %vm313_vm3, %v310_v50, %v312_v51  ;;  %s3286_s29 = sld [smem:[#allocation5 + $0x80]] }
  0x2e   :  { %3569 = vmatpush3.msra.mxu0 %v119_v6  ;;  %v4470_v52 = vld [vmem:[%s5617_s12] sm:$0xff]  ;;  %s3294_s6 = sld [smem:[#allocation3 + $0x1]] }
  0x2f   :  { %3570 = vmatprep.subr.mxu0 %v4221_v2  ;;  %v303_v26 = vsel %vm131_vm1, %v301_v24, 0.0  ;;  %v211_v24 = vld [vmem:[%s5612_s7 + $0x28] sm:$0xff]  ;;  %s3295_s9 = sld [smem:[#allocation5 + $0x100]] }
  0x30   :  { %3571 = vmatpush3.msra.mxu0 %v118_v7  ;;  %s3296_s30 = sld [smem:[#allocation5 + $0x101]] }
  0x31   :  { %3572 = vmatprep.subr.mxu0 %v4221_v2  ;;  %s3303_s19 = sld [smem:[#allocation3 + $0x2]] }
  0x32   :  { %3573 = vmatpush3.msra.mxu0 %v117_v8  ;;  %s3304_s1 = sld [smem:[#allocation5 + $0x180]] }
  0x33   :  { %3574 = vmatprep.subr.mxu0 %v4221_v2  ;;  %s3305_s11 = sld [smem:[#allocation5 + $0x181]] }
  0x34   :  { %3575 = vmatpush3.msra.mxu0 %v116_v9  ;;  %s3312_s0 = sld [smem:[#allocation3 + $0x3]] }
  0x35   :  { %3577 = vmatmul.mubr.msk.f32.vlgmr.msra.gmra.mxu0 %vm131_vm1, %v115_v10  ;;  %3598 = vmatprep.subr.mxu0 %v4221_v2  ;;  %s3321_s22 = sld [smem:[#allocation3 + $0x4]] }
  0x36   :  { %3614 = vmatprep.mubr.msk.f32.mxu0 %vm4222_vm0, %v4221_v2  ;;  %3599 = vmatpush3.msra.mxu0 %v4405_v27  ;;  %s3322_s24 = sld [smem:[#allocation5 + $0x280]] }
  0x37   :  { %3600 = vmatprep.subr.mxu0 %v4221_v2 }
  0x38   :  { %3601 = vmatpush3.msra.mxu0 %v4410_v28 }
  0x39   :  { %3602 = vmatprep.subr.mxu0 %v4221_v2 }
  0x3a   :  { %3603 = vmatpush3.msra.mxu0 %v4417_v29 }
  0x3b   :  { %3604 = vmatprep.subr.mxu0 %v4221_v2 }
  0x3c   :  { %3605 = vmatpush3.msra.mxu0 %v4424_v30 }
  0x3d   :  { %426 = vperm.xlu1 %4035, %v3280_v16   ;;  %3606 = vmatprep.subr.mxu0 %v4221_v2 }
  0x3e   :  { %3607 = vmatpush3.msra.mxu0 %v4448_v44 }
  0x3f   :  { %3608 = vmatprep.subr.mxu0 %v4221_v2 }
  0x40   :  { %3609 = vmatpush3.msra.mxu0 %v4456_v47 }
  0x41   :  { %3610 = vmatprep.subr.mxu0 %v4221_v2 }
  0x42   :  { %3611 = vmatpush3.msra.mxu0 %v4461_v48 }
  0x43   :  { %3612 = vmatprep.subr.mxu0 %v4221_v2 }
  0x44   :  { %3613 = vmatpush3.msra.mxu0 %v4470_v52 }
  0x45   :  { %3659 = vmatprep.subr.mxu0 %v4221_v2 }
  0xb5   :  { %v4430_v33 = vpop.xlane.xlu1 %307 }
  0xb9   :  { %v4437_v38 = vpop.permute.xlu1 %426 }
  0xf5   :  { %v201_v18 = vpop.f32.mrf.mxu0 }
  0xf6   :  { %v4395_v21 = vadd.f32 %v3271_v17, %v201_v18 }
  0xf7   :  { %v3578_v22 = vpop.f32.mrf.mxu0 }
  0xf8   :  { %v402_v23 = vmul.f32 %v4388_v19, %v4395_v21  ;;  %v213_v22 = vld [vmem:[%s5612_s7 + $0x38] sm:$0xff] }
  0xf9   :  { %3580 = vmatpush3.msra.mxu1 %v213_v22 }
  0xfa   :  { %v404_v25 = vsel %vm403_vm2, %v402_v23, 0.0  ;;  %v212_v23 = vld [vmem:[%s5612_s7 + $0x30] sm:$0xff]  ;;  %3581 = vmatprep.subr.mxu1 %v4221_v2 }
  0xfb   :  { %405 = vadd.xlane.f32.xlu0 %v404_v25  ;;  %3582 = vmatpush3.msra.mxu1 %v212_v23  ;;  %v210_v25 = vld [vmem:[%s5612_s7 + $0x20] sm:$0xff] }
  0xfc   :  { %3583 = vmatprep.subr.mxu1 %v4221_v2 }
  0xfd   :  { %3584 = vmatpush3.msra.mxu1 %v211_v24 }
  0xfe   :  { %3585 = vmatprep.subr.mxu1 %v4221_v2 }
  0xff   :  { %304 = vadd.xlane.f32.xlu0 %v303_v26  ;;  %v209_v26 = vld [vmem:[%s5612_s7 + $0x18] sm:$0xff]  ;;  %3586 = vmatpush3.msra.mxu1 %v210_v25 }
 0x100   :  { %3587 = vmatprep.subr.mxu1 %v4221_v2 }
 0x101   :  { %3588 = vmatpush3.msra.mxu1 %v209_v26 }
 0x102   :  { %3589 = vmatprep.subr.mxu1 %v4221_v2 }
 0x103   :  { %3590 = vmatpush3.msra.mxu1 %v208_v31 }
 0x104   :  { %3591 = vmatprep.subr.mxu1 %v4221_v2 }
 0x105   :  { %3592 = vmatpush3.msra.mxu1 %v207_v32 }
 0x106   :  { %3593 = vmatprep.subr.mxu1 %v4221_v2 }
 0x184   :  { %v406_v36 = vpop.xlane.xlu0 %405 }
 0x185   :  { %v415_v37 = vrot.slane %v406_v36, %v4432_v34  ;;  %v411_v39 = vrot.slane %v406_v36, %v4434_v35  ;;  %v206_v36 = vld [vmem:[%s5612_s7] sm:$0xff]  ;;  %s4228_s7 = smov 112  }
 0x186   :  { %3594 = vmatpush3.msra.mxu1 %v206_v36 }
 0x187   :  { %v419_v40 = vadd.f32 %v415_v37, %v4430_v33  ;;  %v205_v37 = vld [vmem:[%s5608_s3] sm:$0x3]  ;;  %3617 = vmatprep.subr.mxu1 %v4221_v2  ;;  %s3287_s3 = sld [smem:[#allocation5 + $0x81]] }
 0x188   :  { %v4441_v41 = vpop.xlane.xlu0 %304  ;;  %3596 = vmatmul.mubr.msk.f32.vlgmr.msra.gmra.mxu1 %vm131_vm1, %v205_v37 }
 0x189   :  { %v430_v42 = vadd.f32 %v4437_v38, %v419_v40  ;;  %v418_v43 = vadd.f32 %v411_v39, %v4441_v41  ;;  %v4556_v39 = vld [vmem:[%s5618_s13 + $0x68] sm:$0xff]  ;;  %v4563_v40 = vld [vmem:[%s5618_s13 + $0x60] sm:$0xff]  ;;  %3645 = vmatprep.mubr.msk.f32.mxu1 %vm4222_vm0, %v4221_v2 }
 0x18a   :  { %3618 = vmatpush3.msra.mxu1 %v4556_v39 }
 0x18b   :  { %v432_v45 = vmax.f32 %v430_v42, 0.0  ;;  %v429_v46 = vadd.f32 %v4437_v38, %v418_v43  ;;  %3619 = vmatprep.subr.mxu1 %v4221_v2  ;;  %v4572_v42 = vld [vmem:[%s5618_s13 + $0x58] sm:$0xff]  ;;  %v4579_v43 = vld [vmem:[%s5618_s13 + $0x50] sm:$0xff] }
 0x18c   :  { %3620 = vmatpush3.msra.mxu1 %v4563_v40 }
 0x18d   :  { %439 = vperm.xlu1 %4035, %v432_v45   ;;  %v431_v49 = vmax.f32 %v429_v46, 0.0  ;;  %3621 = vmatprep.subr.mxu1 %v4221_v2 }
 0x18e   :  { %3622 = vmatpush3.msra.mxu1 %v4572_v42 }
 0x18f   :  { %436 = vperm.xlu0 %4036, %v431_v49   ;;  %3623 = vmatprep.subr.mxu1 %v4221_v2 }
 0x190   :  { %3624 = vmatpush3.msra.mxu1 %v4579_v43 }
 0x191   :  { %3625 = vmatprep.subr.mxu1 %v4221_v2 }
 0x193   :  { %318 = vperm.xlu0 %4036, %v314_v53   ;;  %v4597_v53 = vld [vmem:[%s5618_s13 + $0x40] sm:$0xff] }
 0x208   :  { %v440_v56 = vpop.permute.xlu1 %439 }
 0x209   :  { %v448_v58 = vrot.slane %v440_v56, %v4478_v55 }
 0x20a   :  { %v437_v57 = vpop.permute.xlu0 %436 }
 0x20b   :  { %v444_v59 = vrot.slane %v437_v57, %v4478_v55 }
 0x20d   :  { %v450_v60 = vsel %vm449_vm4, %v448_v58, %v444_v59  ;;  %v4606_v59 = vld [vmem:[%s5618_s13 + $0x38] sm:$0xff] }
 0x20e   :  { %v319_v61 = vpop.permute.xlu0 %318  ;;  %v453_v62 = vsel %vm452_vm5, %v450_v60, -inf  ;;  %v4613_v60 = vld [vmem:[%s5618_s13 + $0x30] sm:$0xff] }
 0x20f   :  { %vm320_vm6 = vcmp.eq.s32.totalorder %v4475_v54, %v319_v61  ;;  %454 = vmax.xlane.f32.xlu1 %v453_v62  ;;  %v4620_v61 = vld [vmem:[%s5618_s13 + $0x28] sm:$0xff]  ;;  %v4629_v62 = vld [vmem:[%s5618_s13 + $0x20] sm:$0xff] }
 0x210   :  { %v3277_v63 = vsel %vm320_vm6, 1.0, %v4221_v2 }
 0x211   :  { %3615 = vmatmul.mubr.msk.f32.vlgmr.msra.gmra.mxu0 %vm131_vm1, %v3277_v63  ;;  %v4636_v63 = vld [vmem:[%s5618_s13 + $0x18] sm:$0xff] }
 0x212   :  { %3660 = vmatpush3.msra.mxu0 %v4405_v27  ;;  %3675 = vmatprep.mubr.msk.f32.mxu0 %vm4222_vm0, %v4221_v2 }
 0x213   :  { %3661 = vmatprep.subr.mxu0 %v4221_v2 }
 0x214   :  { %3662 = vmatpush3.msra.mxu0 %v4410_v28 }
 0x215   :  { %3663 = vmatprep.subr.mxu0 %v4221_v2 }
 0x216   :  { %3664 = vmatpush3.msra.mxu0 %v4417_v29 }
 0x217   :  { %3665 = vmatprep.subr.mxu0 %v4221_v2 }
 0x218   :  { %3666 = vmatpush3.msra.mxu0 %v4424_v30 }
 0x219   :  { %3667 = vmatprep.subr.mxu0 %v4221_v2 }
 0x21a   :  { %3668 = vmatpush3.msra.mxu0 %v4448_v44 }
 0x21b   :  { %3669 = vmatprep.subr.mxu0 %v4221_v2 }
 0x21c   :  { %3670 = vmatpush3.msra.mxu0 %v4456_v47 }
 0x21d   :  { %3671 = vmatprep.subr.mxu0 %v4221_v2 }
 0x21e   :  { %3672 = vmatpush3.msra.mxu0 %v4461_v48 }
 0x21f   :  { %3673 = vmatprep.subr.mxu0 %v4221_v2 }
 0x220   :  { %3674 = vmatpush3.msra.mxu0 %v4470_v52 }
 0x221   :  { %3709 = vmatprep.subr.mxu0 %v4221_v2 }
 0x298   :  { %v455_v0 = vpop.xlane.xlu1 %454 }
 0x299   :  { %v460_v1 = vrot.slane %v455_v0, %v4434_v35  ;;  %v464_v3 = vrot.slane %v455_v0, %v4432_v34  ;;  %v4644_v0 = vld [vmem:[%s5618_s13 + $0x10] sm:$0xff] }
 0x29b   :  { %v467_v4 = vsub.f32 %v431_v49, %v460_v1  ;;  %v468_v5 = vsub.f32 %v432_v45, %v464_v3  ;;  %v4586_v45 = vld [vmem:[%s5618_s13 + $0x48] sm:$0xff]  ;;  %v290_v3 = vpop.f32.mrf.mxu1 }
 0x29c   :  { %3626 = vmatpush3.msra.mxu1 %v4586_v45  ;;  %v4651_v1 = vld [vmem:[%s5618_s13 + $0x8] sm:$0xff] }
 0x29d   :  { %v469_v6 = vmul.f32 1.442695, %v467_v4  ;;  %v471_v7 = vmul.f32 1.442695, %v468_v5  ;;  %3627 = vmatprep.subr.mxu1 %v4221_v2  ;;  %v3597_v4 = vpop.f32.mrf.mxu1 }
 0x29e   :  { %3628 = vmatpush3.msra.mxu1 %v4597_v53 }
 0x29f   :  { %4037 = vpow2.f32 %v469_v6  ;;  %3629 = vmatprep.subr.mxu1 %v4221_v2 }
 0x2a0   :  { %4039 = vpow2.f32 %v471_v7  ;;  %3630 = vmatpush3.msra.mxu1 %v4606_v59 }
 0x2a1   :  { %3631 = vmatprep.subr.mxu1 %v4221_v2 }
 0x2a2   :  { %3632 = vmatpush3.msra.mxu1 %v4613_v60 }
 0x2a3   :  { %3633 = vmatprep.subr.mxu1 %v4221_v2 }
 0x2a4   :  { %3634 = vmatpush3.msra.mxu1 %v4620_v61 }
 0x2a5   :  { %3635 = vmatprep.subr.mxu1 %v4221_v2 }
 0x2a6   :  { %3636 = vmatpush3.msra.mxu1 %v4629_v62 }
 0x2a7   :  { %3637 = vmatprep.subr.mxu1 %v4221_v2 }
 0x2a8   :  { %3638 = vmatpush3.msra.mxu1 %v4636_v63 }
 0x2a9   :  { %3639 = vmatprep.subr.mxu1 %v4221_v2 }
 0x2aa   :  { %3640 = vmatpush3.msra.mxu1 %v4644_v0 }
 0x2ab   :  { %3641 = vmatprep.subr.mxu1 %v4221_v2 }
 0x2ac   :  { %v4507_v8 = vpop.eup %4037  ;;  %3642 = vmatpush3.msra.mxu1 %v4651_v1 }
 0x2ad   :  { %476 = vperm.xlu0 %4036, %v4507_v8   ;;  %v4510_v9 = vpop.eup %4039  ;;  %3643 = vmatprep.subr.mxu1 %v4221_v2 }
 0x2b1   :  { %479 = vperm.xlu0 %4036, %v4510_v9  }
 0x2d1   :  { %v4513_v10 = vpop.f32.mrf.mxu0 }
 0x2d3   :  { %v3616_v12 = vpop.f32.mrf.mxu0 }
 0x328   :  { %v477_v13 = vpop.permute.xlu0 %476 }
 0x329   :  { %v484_v15 = vrot.slane %v477_v13, %v4478_v55 }
 0x32c   :  { %v480_v14 = vpop.permute.xlu0 %479 }
 0x32d   :  { %v488_v16 = vrot.slane %v480_v14, %v4478_v55 }
 0x32f   :  { %v489_v17 = vsel %vm449_vm4, %v488_v16, %v484_v15 }
 0x330   :  { %v491_v18 = vsel %vm452_vm5, %v489_v17, 0.0 }
 0x331   :  { %492 = vadd.xlane.f32.xlu1 %v491_v18 }
 0x3ba   :  { %v493_v46 = vpop.xlane.xlu1 %492 }
 0x3bb   :  { %v498_v49 = vrot.slane %v493_v46, %v4434_v35  ;;  %v502_v50 = vrot.slane %v493_v46, %v4432_v34 }
 0x3bd   :  { %4041 = vrcp.f32 %v498_v49  ;;  %v4675_v49 = vld [vmem:[%s5619_s14] ss:$0 sm:$0xff] }
 0x3be   :  { %4043 = vrcp.f32 %v502_v50 }
 0x3ca   :  { %v4042_v51 = vpop.eup %4041 }
 0x3cb   :  { %v4044_v56 = vpop.eup %4043  ;;  %v506_v57 = vmul.f32 %v4042_v51, %v4507_v8 }
 0x3cc   :  { %v508_v58 = vmul.f32 %v4044_v56, %v4510_v9 }
 0x3cd   :  { %511 = vperm.xlu0 %4036, %v506_v57  }
 0x3ce   :  { %516 = vperm.xlu1 %4035, %v508_v58   ;;  %v3273_v58 = vld [vmem:[%s5613_s8] ss:$0 sm:$0xff] }
 0x3cf   :  { %v291_v4 = vadd.f32 %v3273_v58, %v290_v3  ;;  %v4690_v3 = vld [vmem:[%s5620_s15 + $0x18] sm:$0xff] }
 0x3d1   :  { %540 = vrot.lane.b32.xlu0 %v4513_v10, %s4224_s23 }
 0x3d5   :  { %544 = vrot.lane.b32.xlu0 %v4395_v21, %s4225_s2  ;;  %v4658_v21 = vld [vmem:[%s5618_s13] sm:$0xff] }
 0x3d6   :  { %3644 = vmatpush3.msra.mxu1 %v4658_v21 }
 0x3d7   :  { %3648 = vmatprep.subr.mxu1 %v4221_v2 }
 0x448   :  { %v512_v5 = vpop.permute.xlu0 %511 }
 0x449   :  { %v517_v6 = vpop.permute.xlu1 %516  ;;  %v519_v7 = vmul.f32 %v512_v5, %v4393_v20 }
 0x44a   :  { %v520_v8 = vmul.f32 %v517_v6, %v4375_v11 }
 0x44b   :  { %v521_v9 = vsel %vm131_vm1, %v519_v7, 0.0 }
 0x44c   :  { %v528_v10 = vsel %vm131_vm1, %v520_v8, 0.0  ;;  %v522_v12 = vrot.slane %v521_v9, 4  ;;  %v541_v24 = vpop.permute.xlu0 %540 }
 0x44d   :  { %v529_v13 = vrot.slane %v528_v10, 4 }
 0x44e   :  { %v523_v14 = vadd.f32 %v522_v12, %v521_v9 }
 0x44f   :  { %v530_v15 = vadd.f32 %v529_v13, %v528_v10 }
 0x450   :  { %v524_v16 = vrot.slane %v523_v14, 2  ;;  %v545_v37 = vpop.permute.xlu0 %544 }
 0x451   :  { %v531_v17 = vrot.slane %v530_v15, 2 }
 0x452   :  { %v525_v18 = vadd.f32 %v524_v16, %v523_v14  ;;  %v4695_v16 = vld [vmem:[%s5620_s15 + $0x10] sm:$0xff] }
 0x453   :  { %v532_v22 = vadd.f32 %v531_v17, %v530_v15  ;;  %v4702_v17 = vld [vmem:[%s5620_s15 + $0x8] sm:$0xff] }
 0x454   :  { %v526_v23 = vrot.slane %v525_v18, 1 }
 0x455   :  { %v533_v25 = vrot.slane %v532_v22, 1 }
 0x456   :  { %v527_v26 = vadd.f32 %v526_v23, %v525_v18  ;;  %v4709_v18 = vld [vmem:[%s5620_s15] sm:$0xff] }
 0x457   :  { %v534_v31 = vadd.f32 %v533_v25, %v532_v22 }
 0x459   :  { %v537_v32 = vsel %vm449_vm4, %v534_v31, %v527_v26 }
 0x45a   :  { %v547_v36 = vsel %vm131_vm1, %v537_v32, %v541_v24 }
 0x45b   :  { %v549_v46 = vsel %vm548_vm7, %v547_v36, %v545_v37  ;;  %v4761_v36 = vld [vmem:[%s5621_s16] ss:$0 sm:$0xff] }
 0x45c   :  { %3646 = vmatmul.mubr.msk.f32.vlgmr.msra.gmra.mxu1 %vm556_vm8, %v549_v46 }
 0x45d   :  { %3656 = vmatprep.mubr.msk.f32.mxu1 %vm4222_vm0, %v4221_v2  ;;  %3649 = vmatpush3.msra.mxu1 %v4690_v3 }
 0x45e   :  { %3650 = vmatprep.subr.mxu1 %v4221_v2 }
 0x45f   :  { %3651 = vmatpush3.msra.mxu1 %v4695_v16 }
 0x460   :  { %3652 = vmatprep.subr.mxu1 %v4221_v2 }
 0x461   :  { %3653 = vmatpush3.msra.mxu1 %v4702_v17 }
 0x462   :  { %3654 = vmatprep.subr.mxu1 %v4221_v2 }
 0x463   :  { %3655 = vmatpush3.msra.mxu1 %v4709_v18 }
 0x464   :  { %3678 = vmatprep.subr.mxu1 %v4221_v2 }
 0x51c   :  { %v626_v50 = vpop.f32.mrf.mxu1 }
 0x51d   :  { %v627_v51 = vadd.f32 %v4675_v49, %v626_v50 }
 0x51e   :  { %v3647_v56 = vpop.f32.mrf.mxu1 }
 0x51f   :  { %4045 = vtanh.f32 %v627_v51  ;;  %v3283_v5 = vmul.f32 -1.442695, %v627_v51 }
 0x521   :  { %4047 = vpow2.f32 %v3283_v5 }
 0x52c   :  { %v4046_v57 = vpop.eup %4045 }
 0x52d   :  { %643 = vrot.lane.b32.xlu0 %v4046_v57, %s4224_s23 }
 0x52e   :  { %v4048_v6 = vpop.eup %4047 }
 0x52f   :  { %v633_v7 = vadd.f32 1.0, %v4048_v6 }
 0x531   :  { %638 = vrot.lane.b32.xlu0 %v291_v4, %s4226_s18  ;;  %4049 = vrcp.f32 %v633_v7 }
 0x53e   :  { %v4050_v8 = vpop.eup %4049 }
 0x59f   :  { %v644_v9 = vpop.permute.xlu0 %643 }
 0x5a0   :  { %v646_v10 = vmul.f32 %v4050_v8, %v644_v9 }
 0x5a2   :  { %648 = vrot.lane.b32.xlu1 %v646_v10, %s4226_s18 }
 0x5a3   :  { %v639_v12 = vpop.permute.xlu0 %638 }
 0x5a4   :  { %v641_v13 = vmul.f32 %v4050_v8, %v639_v12 }
 0x614   :  { %v649_v14 = vpop.permute.xlu1 %648 }
 0x615   :  { %v4684_v15 = vadd.f32 %v649_v14, %v641_v13 }
 0x617   :  { %4051 = vtanh.f32 %v4684_v15 }
 0x624   :  { %v4052_v22 = vpop.eup %4051 }
 0x625   :  { %654 = vrot.lane.b32.xlu0 %v4052_v22, %s4224_s23 }
 0x629   :  { %850 = vrot.lane.b32.xlu0 %v4388_v19, %s4227_s25  ;;  %s3323_s25 = sld [smem:[#allocation5 + $0x281]] }
 0x697   :  { %v655_v23 = vpop.permute.xlu0 %654 }
 0x698   :  { %v4717_v24 = vmul.f32 %v4050_v8, %v655_v23 }
 0x69a   :  { %665 = vrot.lane.b32.xlu1 %v4717_v24, %s4226_s18 }
 0x69b   :  { %v4721_v25 = vpop.permute.xlu0 %850 }
 0x69c   :  { %v853_v26 = vmul.f32 %v4721_v25, %v4717_v24 }
 0x69e   :  { %855 = vrot.lane.b32.xlu0 %v853_v26, %s4226_s18 }
 0x70c   :  { %v666_v31 = vpop.permute.xlu1 %665 }
 0x70d   :  { %3657 = vmatmul.mubr.msk.f32.vlgmr.msra.gmra.mxu1 %vm667_vm9, %v666_v31 }
 0x70e   :  { %3679 = vmatpush3.msra.mxu1 %v4556_v39  ;;  %3706 = vmatprep.mubr.msk.f32.mxu1 %vm4222_vm0, %v4221_v2 }
 0x70f   :  { %3680 = vmatprep.subr.mxu1 %v4221_v2 }
 0x710   :  { %v856_v19 = vpop.permute.xlu0 %855  ;;  %3681 = vmatpush3.msra.mxu1 %v4563_v40 }
 0x711   :  { %v858_v32 = vsel %vm403_vm2, %v856_v19, 0.0  ;;  %3682 = vmatprep.subr.mxu1 %v4221_v2 }
 0x712   :  { %859 = vadd.xlane.f32.xlu0 %v858_v32  ;;  %3683 = vmatpush3.msra.mxu1 %v4572_v42 }
 0x713   :  { %3684 = vmatprep.subr.mxu1 %v4221_v2 }
 0x714   :  { %3685 = vmatpush3.msra.mxu1 %v4579_v43 }
 0x715   :  { %3686 = vmatprep.subr.mxu1 %v4221_v2 }
 0x716   :  { %3687 = vmatpush3.msra.mxu1 %v4586_v45 }
 0x717   :  { %3688 = vmatprep.subr.mxu1 %v4221_v2 }
 0x718   :  { %3689 = vmatpush3.msra.mxu1 %v4597_v53 }
 0x719   :  { %3690 = vmatprep.subr.mxu1 %v4221_v2 }
 0x71a   :  { %3691 = vmatpush3.msra.mxu1 %v4606_v59 }
 0x71b   :  { %3692 = vmatprep.subr.mxu1 %v4221_v2 }
 0x71c   :  { %3693 = vmatpush3.msra.mxu1 %v4613_v60 }
 0x71d   :  { %3694 = vmatprep.subr.mxu1 %v4221_v2 }
 0x71e   :  { %3695 = vmatpush3.msra.mxu1 %v4620_v61 }
 0x71f   :  { %3696 = vmatprep.subr.mxu1 %v4221_v2 }
 0x720   :  { %3697 = vmatpush3.msra.mxu1 %v4629_v62 }
 0x721   :  { %3698 = vmatprep.subr.mxu1 %v4221_v2 }
 0x722   :  { %3699 = vmatpush3.msra.mxu1 %v4636_v63 }
 0x723   :  { %3700 = vmatprep.subr.mxu1 %v4221_v2 }
 0x724   :  { %3701 = vmatpush3.msra.mxu1 %v4644_v0 }
 0x725   :  { %3702 = vmatprep.subr.mxu1 %v4221_v2 }
 0x726   :  { %3703 = vmatpush3.msra.mxu1 %v4651_v1 }
 0x727   :  { %3704 = vmatprep.subr.mxu1 %v4221_v2 }
 0x728   :  { %3705 = vmatpush3.msra.mxu1 %v4658_v21 }
 0x729   :  { %3739 = vmatprep.subr.mxu1 %v4221_v2 }
 0x79b   :  { %v860_v6 = vpop.xlane.xlu0 %859 }
 0x79c   :  { %v865_v7 = vrot.slane %v860_v6, %v4434_v35  ;;  %v869_v23 = vrot.slane %v860_v6, %v4432_v34 }
 0x79e   :  { %v872_v8 = vadd.f32 %v865_v7, %v4441_v41  ;;  %v873_v26 = vadd.f32 %v869_v23, %v4430_v33 }
 0x7a0   :  { %v874_v9 = vadd.f32 %v872_v8, %v4437_v38  ;;  %v875_v31 = vadd.f32 %v873_v26, %v4437_v38 }
 0x7a2   :  { %v876_v10 = vmax.f32 %v874_v9, 0.0  ;;  %v877_v19 = vmax.f32 %v875_v31, 0.0 }
 0x7cd   :  { %v736_v37 = vpop.f32.mrf.mxu1 }
 0x7ce   :  { %v737_v46 = vadd.f32 %v4761_v36, %v736_v37  ;;  %v763_v37 = vstv %s762_s28 }
 0x7cf   :  { %v3658_v50 = vpop.f32.mrf.mxu1  ;;  %vm764_vm13 = vcmp.eq.s32.totalorder %v763_v37, 1 }
 0x7d0   :  { %740 = vst [vmem:[%s5622_s17] sm:$0x3] %v737_v46  ;;  %v742_v51 = vsel %vm741_vm10, %v737_v46, -inf  ;;  %v768_v50 = vstv %s3287_s3 }
 0x7d1   :  { %743 = vmax.xlane.f32.xlu1 %v742_v51 }
 0x85a   :  { %v744_v56 = vpop.xlane.xlu1 %743 }
 0x85b   :  { %vm745_vm11 = vcmp.eq.f32.partialorder %v737_v46, %v744_v56  ;;  %v766_v46 = vstv %s3286_s29 }
 0x85c   :  { %v746_v57 = vsel %vm745_vm11, %v4475_v54, 128 }
 0x85d   :  { %v747_v58 = vsel %vm741_vm10, %v746_v57, 2147483647 }
 0x85e   :  { %v749_v4 = vshra.s32 %v747_v58, 16  ;;  %v748_v12 = vand.u32 65535, %v747_v58  ;;  %v769_v58 = vsel %vm313_vm3, %v766_v46, %v768_v50 }
 0x860   :  { %v751_v5 = vcvt.s32.f32 %v749_v4  ;;  %v750_v14 = vcvt.s32.f32 %v748_v12 }
 0x862   :  { %752 = vmin.xlane.f32.xlu1 %v751_v5 }
 0x873   :  { %881 = vperm.xlu1 %4035, %v876_v10  }
 0x8eb   :  { %v753_v13 = vpop.xlane.xlu1 %752 }
 0x8ec   :  { %vm754_vm12 = vcmp.eq.f32.partialorder %v751_v5, %v753_v13  ;;  %v759_v32 = vcvt.f32.s32 %v753_v13 }
 0x8ed   :  { %v755_v22 = vsel %vm754_vm12, %v750_v14, inf }
 0x8ee   :  { %756 = vmin.xlane.f32.xlu0 %v755_v22  ;;  %v760_v56 = vshll.u32 %v759_v32, 16 }
 0x8ef   :  { %v882_v6 = vpop.permute.xlu1 %881 }
 0x8f0   :  { %v889_v8 = vrot.slane %v882_v6, %v4478_v55 }
 0x904   :  { %884 = vperm.xlu0 %4036, %v877_v19  }
 0x977   :  { %v757_v51 = vpop.xlane.xlu0 %756 }
 0x978   :  { %v758_v57 = vcvt.f32.s32 %v757_v51 }
 0x97a   :  { %v761_v4 = vadd.s32 %v760_v56, %v758_v57 }
 0x97c   :  { %v770_v5 = vsel %vm764_vm13, %v769_v58, %v761_v4 }
 0x97d   :  { %772 = vperm.xlu0 %4036, %v770_v5  }
 0x97f   :  { %v885_v7 = vpop.permute.xlu0 %884 }
 0x980   :  { %v893_v9 = vrot.slane %v885_v7, %v4478_v55 }
 0x982   :  { %v894_v12 = vsel %vm449_vm4, %v893_v9, %v889_v8 }
 0x983   :  { %v896_v13 = vsel %vm452_vm5, %v894_v12, -inf }
 0x984   :  { %897 = vmax.xlane.f32.xlu1 %v896_v13 }
 0x9f8   :  { %v773_v14 = vpop.permute.xlu0 %772 }
 0x9f9   :  { %vm774_vm14 = vcmp.eq.s32.totalorder %v4475_v54, %v773_v14 }
 0x9fa   :  { %v3288_v22 = vsel %vm774_vm14, 1.0, %v4221_v2 }
 0x9fb   :  { %3676 = vmatmul.mubr.msk.f32.vlgmr.msra.gmra.mxu0 %vm131_vm1, %v3288_v22 }
 0x9fc   :  { %3710 = vmatpush3.msra.mxu0 %v4690_v3  ;;  %3717 = vmatprep.mubr.msk.f32.mxu0 %vm4222_vm0, %v4221_v2 }
 0x9fd   :  { %3711 = vmatprep.subr.mxu0 %v4221_v2 }
 0x9fe   :  { %3712 = vmatpush3.msra.mxu0 %v4695_v16 }
 0x9ff   :  { %3713 = vmatprep.subr.mxu0 %v4221_v2 }
 0xa00   :  { %3714 = vmatpush3.msra.mxu0 %v4702_v17 }
 0xa01   :  { %3715 = vmatprep.subr.mxu0 %v4221_v2 }
 0xa02   :  { %3716 = vmatpush3.msra.mxu0 %v4709_v18 }
 0xa03   :  { %3720 = vmatprep.subr.mxu0 %v4221_v2 }
 0xa0d   :  { %v898_v23 = vpop.xlane.xlu1 %897 }
 0xa0e   :  { %v903_v26 = vrot.slane %v898_v23, %v4434_v35  ;;  %v907_v31 = vrot.slane %v898_v23, %v4432_v34 }
 0xa10   :  { %v910_v32 = vsub.f32 %v876_v10, %v903_v26  ;;  %v911_v37 = vsub.f32 %v877_v19, %v907_v31 }
 0xa12   :  { %v912_v46 = vmul.f32 1.442695, %v910_v32  ;;  %v914_v50 = vmul.f32 1.442695, %v911_v37 }
 0xa14   :  { %4053 = vpow2.f32 %v912_v46 }
 0xa15   :  { %4055 = vpow2.f32 %v914_v50 }
 0xa21   :  { %v4054_v51 = vpop.eup %4053 }
 0xa22   :  { %919 = vperm.xlu0 %4036, %v4054_v51   ;;  %v4056_v56 = vpop.eup %4055 }
 0xa26   :  { %922 = vperm.xlu0 %4036, %v4056_v56  }
 0xa9d   :  { %v920_v57 = vpop.permute.xlu0 %919 }
 0xa9e   :  { %v927_v4 = vrot.slane %v920_v57, %v4478_v55 }
 0xaa1   :  { %v923_v58 = vpop.permute.xlu0 %922 }
 0xaa2   :  { %v931_v5 = vrot.slane %v923_v58, %v4478_v55 }
 0xaa4   :  { %v932_v6 = vsel %vm449_vm4, %v931_v5, %v927_v4 }
 0xaa5   :  { %v934_v7 = vsel %vm452_vm5, %v932_v6, 0.0 }
 0xaa6   :  { %935 = vadd.xlane.f32.xlu0 %v934_v7 }
 0xabb   :  { %v846_v10 = vpop.f32.mrf.mxu0 }
 0xabd   :  { %v3677_v19 = vpop.f32.mrf.mxu0 }
 0xb2f   :  { %v936_v8 = vpop.xlane.xlu0 %935 }
 0xb30   :  { %v941_v9 = vrot.slane %v936_v8, %v4434_v35  ;;  %v945_v12 = vrot.slane %v936_v8, %v4432_v34 }
 0xb32   :  { %4057 = vrcp.f32 %v941_v9 }
 0xb33   :  { %4059 = vrcp.f32 %v945_v12 }
 0xb3f   :  { %v4058_v13 = vpop.eup %4057 }
 0xb40   :  { %v4060_v14 = vpop.eup %4059  ;;  %v949_v22 = vmul.f32 %v4058_v13, %v4054_v51 }
 0xb41   :  { %v951_v23 = vmul.f32 %v4060_v14, %v4056_v56 }
 0xb42   :  { %954 = vperm.xlu1 %4035, %v949_v22  }
 0xb43   :  { %959 = vperm.xlu0 %4036, %v951_v23  }
 0xb46   :  { %983 = vrot.lane.b32.xlu1 %v846_v10, %s4224_s23 }
 0xb4a   :  { %986 = vrot.lane.b32.xlu1 %v4717_v24, %s4228_s7 }
 0xbbd   :  { %v955_v26 = vpop.permute.xlu1 %954 }
 0xbbe   :  { %v960_v31 = vpop.permute.xlu0 %959  ;;  %v962_v32 = vmul.f32 %v955_v26, %v4393_v20 }
 0xbbf   :  { %v963_v37 = vmul.f32 %v960_v31, %v4375_v11 }
 0xbc0   :  { %v964_v46 = vsel %vm131_vm1, %v962_v32, 0.0 }
 0xbc1   :  { %v971_v50 = vsel %vm131_vm1, %v963_v37, 0.0  ;;  %v965_v51 = vrot.slane %v964_v46, 4  ;;  %v984_v24 = vpop.permute.xlu1 %983 }
 0xbc2   :  { %v972_v56 = vrot.slane %v971_v50, 4 }
 0xbc3   :  { %v966_v57 = vadd.f32 %v965_v51, %v964_v46 }
 0xbc4   :  { %v973_v58 = vadd.f32 %v972_v56, %v971_v50 }
 0xbc5   :  { %v967_v4 = vrot.slane %v966_v57, 2  ;;  %v987_v12 = vpop.permute.xlu1 %986 }
 0xbc6   :  { %v974_v5 = vrot.slane %v973_v58, 2 }
 0xbc7   :  { %v968_v6 = vadd.f32 %v967_v4, %v966_v57 }
 0xbc8   :  { %v975_v7 = vadd.f32 %v974_v5, %v973_v58 }
 0xbc9   :  { %v969_v10 = vrot.slane %v968_v6, 1 }
 0xbca   :  { %v976_v19 = vrot.slane %v975_v7, 1 }
 0xbcb   :  { %v970_v8 = vadd.f32 %v969_v10, %v968_v6 }
 0xbcc   :  { %v977_v9 = vadd.f32 %v976_v19, %v975_v7 }
 0xbce   :  { %v980_v20 = vsel %vm449_vm4, %v977_v9, %v970_v8 }
 0xbcf   :  { %v989_v11 = vsel %vm131_vm1, %v980_v20, %v984_v24 }
 0xbd0   :  { %v990_v13 = vsel %vm548_vm7, %v989_v11, %v987_v12 }
 0xbd1   :  { %3707 = vmatmul.mubr.msk.f32.vlgmr.msra.gmra.mxu1 %vm556_vm8, %v990_v13 }
 0xbd2   :  { %3740 = vmatpush3.msra.mxu1 %v4556_v39  ;;  %3767 = vmatprep.mubr.msk.f32.mxu1 %vm4222_vm0, %v4221_v2 }
 0xbd3   :  { %3741 = vmatprep.subr.mxu1 %v4221_v2 }
 0xbd4   :  { %3742 = vmatpush3.msra.mxu1 %v4563_v40 }
 0xbd5   :  { %3743 = vmatprep.subr.mxu1 %v4221_v2 }
 0xbd6   :  { %3744 = vmatpush3.msra.mxu1 %v4572_v42 }
 0xbd7   :  { %3745 = vmatprep.subr.mxu1 %v4221_v2 }
 0xbd8   :  { %3746 = vmatpush3.msra.mxu1 %v4579_v43 }
 0xbd9   :  { %3747 = vmatprep.subr.mxu1 %v4221_v2 }
 0xbda   :  { %3748 = vmatpush3.msra.mxu1 %v4586_v45 }
 0xbdb   :  { %3749 = vmatprep.subr.mxu1 %v4221_v2 }
 0xbdc   :  { %3750 = vmatpush3.msra.mxu1 %v4597_v53 }
 0xbdd   :  { %3751 = vmatprep.subr.mxu1 %v4221_v2 }
 0xbde   :  { %3752 = vmatpush3.msra.mxu1 %v4606_v59 }
 0xbdf   :  { %3753 = vmatprep.subr.mxu1 %v4221_v2 }
 0xbe0   :  { %3754 = vmatpush3.msra.mxu1 %v4613_v60 }
 0xbe1   :  { %3755 = vmatprep.subr.mxu1 %v4221_v2 }
 0xbe2   :  { %3756 = vmatpush3.msra.mxu1 %v4620_v61 }
 0xbe3   :  { %3757 = vmatprep.subr.mxu1 %v4221_v2 }
 0xbe4   :  { %3758 = vmatpush3.msra.mxu1 %v4629_v62 }
 0xbe5   :  { %3759 = vmatprep.subr.mxu1 %v4221_v2 }
 0xbe6   :  { %3760 = vmatpush3.msra.mxu1 %v4636_v63 }
 0xbe7   :  { %3761 = vmatprep.subr.mxu1 %v4221_v2 }
 0xbe8   :  { %3762 = vmatpush3.msra.mxu1 %v4644_v0 }
 0xbe9   :  { %3763 = vmatprep.subr.mxu1 %v4221_v2 }
 0xbea   :  { %3764 = vmatpush3.msra.mxu1 %v4651_v1 }
 0xbeb   :  { %3765 = vmatprep.subr.mxu1 %v4221_v2 }
 0xbec   :  { %3766 = vmatpush3.msra.mxu1 %v4658_v21 }
 0xbed   :  { %3800 = vmatprep.subr.mxu1 %v4221_v2 }
 0xc91   :  { %v1060_v14 = vpop.f32.mrf.mxu1 }
 0xc92   :  { %v1061_v22 = vadd.f32 %v4675_v49, %v1060_v14 }
 0xc93   :  { %v3708_v23 = vpop.f32.mrf.mxu1 }
 0xc94   :  { %4061 = vtanh.f32 %v1061_v22  ;;  %v3291_v31 = vmul.f32 -1.442695, %v1061_v22 }
 0xc96   :  { %4063 = vpow2.f32 %v3291_v31 }
 0xca1   :  { %v4062_v26 = vpop.eup %4061 }
 0xca2   :  { %1073 = vrot.lane.b32.xlu1 %v4062_v26, %s4224_s23 }
 0xca3   :  { %v4064_v32 = vpop.eup %4063 }
 0xca4   :  { %v1067_v37 = vadd.f32 1.0, %v4064_v32 }
 0xca6   :  { %4065 = vrcp.f32 %v1067_v37 }
 0xcb3   :  { %v4066_v46 = vpop.eup %4065 }
 0xcb4   :  { %v1071_v56 = vmul.f32 %v4066_v46, %v4684_v15 }
 0xd14   :  { %v1074_v50 = vpop.permute.xlu1 %1073 }
 0xd15   :  { %v1076_v51 = vmul.f32 %v4066_v46, %v1074_v50  ;;  %v1186_v50 = vstv %s3294_s6  ;;  %s3313_s6 = sld [smem:[#allocation5 + $0x200]] }
 0xd16   :  { %vm1187_vm11 = vcmp.eq.s32.totalorder %v1186_v50, 1 }
 0xd17   :  { %1078 = vrot.lane.b32.xlu1 %v1076_v51, %s4226_s18  ;;  %v1189_v51 = vstv %s3295_s9  ;;  %s3314_s9 = sld [smem:[#allocation5 + $0x201]] }
 0xd89   :  { %v1079_v57 = vpop.permute.xlu1 %1078 }
 0xd8a   :  { %v4847_v58 = vadd.f32 %v1079_v57, %v1071_v56  ;;  %v1191_v56 = vstv %s3296_s30 }
 0xd8c   :  { %4067 = vtanh.f32 %v4847_v58 }
 0xd99   :  { %v4068_v4 = vpop.eup %4067 }
 0xd9a   :  { %1084 = vrot.lane.b32.xlu1 %v4068_v4, %s4224_s23 }
 0xe0c   :  { %v1085_v5 = vpop.permute.xlu1 %1084 }
 0xe0d   :  { %v4851_v6 = vmul.f32 %v4066_v46, %v1085_v5 }
 0xe0f   :  { %1089 = vrot.lane.b32.xlu0 %v4851_v6, %s4226_s18  ;;  %v1273_v7 = vmul.f32 %v4851_v6, %v4721_v25 }
 0xe13   :  { %1275 = vrot.lane.b32.xlu0 %v1273_v7, %s4226_s18  ;;  %v1192_v7 = vsel %vm313_vm3, %v1189_v51, %v1191_v56 }
 0xe81   :  { %v1090_v15 = vpop.permute.xlu0 %1089 }
 0xe82   :  { %3718 = vmatmul.mubr.msk.f32.vlgmr.msra.gmra.mxu0 %vm667_vm9, %v1090_v15 }
 0xe83   :  { %3721 = vmatpush3.msra.mxu0 %v4405_v27  ;;  %3736 = vmatprep.mubr.msk.f32.mxu0 %vm4222_vm0, %v4221_v2 }
 0xe84   :  { %3722 = vmatprep.subr.mxu0 %v4221_v2 }
 0xe85   :  { %v1276_v10 = vpop.permute.xlu0 %1275  ;;  %3723 = vmatpush3.msra.mxu0 %v4410_v28 }
 0xe86   :  { %v1278_v24 = vsel %vm403_vm2, %v1276_v10, 0.0  ;;  %3724 = vmatprep.subr.mxu0 %v4221_v2 }
 0xe87   :  { %1279 = vadd.xlane.f32.xlu0 %v1278_v24  ;;  %3725 = vmatpush3.msra.mxu0 %v4417_v29 }
 0xe88   :  { %3726 = vmatprep.subr.mxu0 %v4221_v2 }
 0xe89   :  { %3727 = vmatpush3.msra.mxu0 %v4424_v30 }
 0xe8a   :  { %3728 = vmatprep.subr.mxu0 %v4221_v2 }
 0xe8b   :  { %3729 = vmatpush3.msra.mxu0 %v4448_v44 }
 0xe8c   :  { %3730 = vmatprep.subr.mxu0 %v4221_v2 }
 0xe8d   :  { %3731 = vmatpush3.msra.mxu0 %v4456_v47 }
 0xe8e   :  { %3732 = vmatprep.subr.mxu0 %v4221_v2 }
 0xe8f   :  { %3733 = vmatpush3.msra.mxu0 %v4461_v48 }
 0xe90   :  { %3734 = vmatprep.subr.mxu0 %v4221_v2 }
 0xe91   :  { %3735 = vmatpush3.msra.mxu0 %v4470_v52 }
 0xe92   :  { %3770 = vmatprep.subr.mxu0 %v4221_v2 }
 0xf10   :  { %v1280_v8 = vpop.xlane.xlu0 %1279 }
 0xf11   :  { %v1285_v9 = vrot.slane %v1280_v8, %v4434_v35  ;;  %v1289_v26 = vrot.slane %v1280_v8, %v4432_v34 }
 0xf13   :  { %v1292_v20 = vadd.f32 %v1285_v9, %v4441_v41  ;;  %v1293_v31 = vadd.f32 %v1289_v26, %v4430_v33 }
 0xf15   :  { %v1294_v11 = vadd.f32 %v1292_v20, %v4437_v38  ;;  %v1295_v32 = vadd.f32 %v1293_v31, %v4437_v38 }
 0xf17   :  { %v1296_v12 = vmax.f32 %v1294_v11, 0.0  ;;  %v1297_v37 = vmax.f32 %v1295_v32, 0.0 }
 0xf42   :  { %v1159_v27 = vpop.f32.mrf.mxu0 }
 0xf43   :  { %v1160_v28 = vadd.f32 %v4761_v36, %v1159_v27 }
 0xf44   :  { %v3719_v29 = vpop.f32.mrf.mxu0 }
 0xf45   :  { %3293 = vst [vmem:[%s5622_s17 + $0x2] sm:$0x3] %v1160_v28  ;;  %v1165_v30 = vsel %vm741_vm10, %v1160_v28, -inf }
 0xf46   :  { %1166 = vmax.xlane.f32.xlu1 %v1165_v30 }
 0xfcf   :  { %v1167_v44 = vpop.xlane.xlu1 %1166 }
 0xfd0   :  { %vm1168_vm15 = vcmp.eq.f32.partialorder %v1160_v28, %v1167_v44 }
 0xfd1   :  { %v1169_v47 = vsel %vm1168_vm15, %v4475_v54, 128 }
 0xfd2   :  { %v1170_v48 = vsel %vm741_vm10, %v1169_v47, 2147483647 }
 0xfd3   :  { %v1172_v52 = vshra.s32 %v1170_v48, 16  ;;  %v1171_v13 = vand.u32 65535, %v1170_v48 }
 0xfd5   :  { %v1174_v19 = vcvt.s32.f32 %v1172_v52  ;;  %v1173_v22 = vcvt.s32.f32 %v1171_v13 }
 0xfd7   :  { %1175 = vmin.xlane.f32.xlu1 %v1174_v19 }
 0xfe8   :  { %1301 = vperm.xlu1 %4035, %v1296_v12  }
0x1060   :  { %v1176_v14 = vpop.xlane.xlu1 %1175 }
0x1061   :  { %vm1177_vm6 = vcmp.eq.f32.partialorder %v1174_v19, %v1176_v14  ;;  %v1182_v46 = vcvt.f32.s32 %v1176_v14 }
0x1062   :  { %v1178_v23 = vsel %vm1177_vm6, %v1173_v22, inf }
0x1063   :  { %1179 = vmin.xlane.f32.xlu0 %v1178_v23  ;;  %v1183_v4 = vshll.u32 %v1182_v46, 16 }
0x1064   :  { %v1302_v24 = vpop.permute.xlu1 %1301 }
0x1065   :  { %v1309_v28 = vrot.slane %v1302_v24, %v4478_v55 }
0x1079   :  { %1304 = vperm.xlu0 %4036, %v1297_v37  }
0x10ec   :  { %v1180_v57 = vpop.xlane.xlu0 %1179 }
0x10ed   :  { %v1181_v5 = vcvt.f32.s32 %v1180_v57 }
0x10ef   :  { %v1184_v15 = vadd.s32 %v1183_v4, %v1181_v5 }
0x10f1   :  { %v1193_v10 = vsel %vm1187_vm11, %v1192_v7, %v1184_v15  ;;  %v4923_v7 = vld [vmem:[%s5609_s4] sm:$0xff] }
0x10f2   :  { %1195 = vperm.xlu0 %4036, %v1193_v10   ;;  %v4929_v10 = vld [vmem:[%s5609_s4 + $0x8] sm:$0xff] }
0x10f4   :  { %v1305_v27 = vpop.permute.xlu0 %1304 }
0x10f5   :  { %v1313_v29 = vrot.slane %v1305_v27, %v4478_v55 }
0x10f7   :  { %v1314_v30 = vsel %vm449_vm4, %v1313_v29, %v1309_v28 }
0x10f8   :  { %v1316_v44 = vsel %vm452_vm5, %v1314_v30, -inf }
0x10f9   :  { %1317 = vmax.xlane.f32.xlu1 %v1316_v44 }
0x116d   :  { %v1196_v47 = vpop.permute.xlu0 %1195 }
0x116e   :  { %vm1197_vm12 = vcmp.eq.s32.totalorder %v4475_v54, %v1196_v47 }
0x116f   :  { %v3297_v48 = vsel %vm1197_vm12, 1.0, %v4221_v2 }
0x1170   :  { %3737 = vmatmul.mubr.msk.f32.vlgmr.msra.gmra.mxu0 %vm131_vm1, %v3297_v48 }
0x1171   :  { %3771 = vmatpush3.msra.mxu0 %v4690_v3  ;;  %3778 = vmatprep.mubr.msk.f32.mxu0 %vm4222_vm0, %v4221_v2 }
0x1172   :  { %3772 = vmatprep.subr.mxu0 %v4221_v2 }
0x1173   :  { %3773 = vmatpush3.msra.mxu0 %v4695_v16 }
0x1174   :  { %3774 = vmatprep.subr.mxu0 %v4221_v2 }
0x1175   :  { %3775 = vmatpush3.msra.mxu0 %v4702_v17 }
0x1176   :  { %3776 = vmatprep.subr.mxu0 %v4221_v2 }
0x1177   :  { %3777 = vmatpush3.msra.mxu0 %v4709_v18 }
0x1178   :  { %3781 = vmatprep.subr.mxu0 %v4221_v2 }
0x1182   :  { %v1318_v52 = vpop.xlane.xlu1 %1317 }
0x1183   :  { %v1323_v3 = vrot.slane %v1318_v52, %v4434_v35  ;;  %v1327_v19 = vrot.slane %v1318_v52, %v4432_v34 }
0x1185   :  { %v1330_v8 = vsub.f32 %v1296_v12, %v1323_v3  ;;  %v1331_v9 = vsub.f32 %v1297_v37, %v1327_v19 }
0x1187   :  { %v1332_v20 = vmul.f32 1.442695, %v1330_v8  ;;  %v1334_v16 = vmul.f32 1.442695, %v1331_v9 }
0x1189   :  { %4069 = vpow2.f32 %v1332_v20 }
0x118a   :  { %4071 = vpow2.f32 %v1334_v16 }
0x1196   :  { %v4070_v11 = vpop.eup %4069 }
0x1197   :  { %1339 = vperm.xlu0 %4036, %v4070_v11   ;;  %v4072_v17 = vpop.eup %4071 }
0x119b   :  { %1342 = vperm.xlu0 %4036, %v4072_v17  }
0x1212   :  { %v1340_v13 = vpop.permute.xlu0 %1339 }
0x1213   :  { %v1347_v18 = vrot.slane %v1340_v13, %v4478_v55 }
0x1216   :  { %v1343_v14 = vpop.permute.xlu0 %1342 }
0x1217   :  { %v1351_v22 = vrot.slane %v1343_v14, %v4478_v55 }
0x1219   :  { %v1352_v23 = vsel %vm449_vm4, %v1351_v22, %v1347_v18 }
0x121a   :  { %v1354_v26 = vsel %vm452_vm5, %v1352_v23, 0.0  ;;  %v4987_v23 = vld [vmem:[%s5617_s12 + $0x38] sm:$0xff] }
0x121b   :  { %1355 = vadd.xlane.f32.xlu0 %v1354_v26 }
0x1230   :  { %v1269_v12 = vpop.f32.mrf.mxu0 }
0x1232   :  { %v3738_v31 = vpop.f32.mrf.mxu0 }
0x12a4   :  { %v1356_v32 = vpop.xlane.xlu0 %1355 }
0x12a5   :  { %v1361_v37 = vrot.slane %v1356_v32, %v4434_v35  ;;  %v1365_v46 = vrot.slane %v1356_v32, %v4432_v34  ;;  %v5004_v32 = vld [vmem:[%s5617_s12 + $0x28] sm:$0xff] }
0x12a7   :  { %4073 = vrcp.f32 %v1361_v37  ;;  %v5011_v37 = vld [vmem:[%s5617_s12 + $0x20] sm:$0xff] }
0x12a8   :  { %4075 = vrcp.f32 %v1365_v46  ;;  %v5018_v46 = vld [vmem:[%s5617_s12 + $0x18] sm:$0xff] }
0x12b4   :  { %v4074_v50 = vpop.eup %4073 }
0x12b5   :  { %v4076_v51 = vpop.eup %4075  ;;  %v1369_v56 = vmul.f32 %v4074_v50, %v4070_v11  ;;  %v5025_v50 = vld [vmem:[%s5617_s12 + $0x10] sm:$0xff] }
0x12b6   :  { %v1371_v57 = vmul.f32 %v4076_v51, %v4072_v17  ;;  %v5032_v51 = vld [vmem:[%s5617_s12 + $0x8] sm:$0xff] }
0x12b7   :  { %1374 = vperm.xlu1 %4035, %v1369_v56   ;;  %v5039_v56 = vld [vmem:[%s5617_s12] sm:$0xff] }
0x12b8   :  { %1379 = vperm.xlu0 %4036, %v1371_v57  }
0x12bb   :  { %1403 = vrot.lane.b32.xlu1 %v1269_v12, %s4224_s23  ;;  %v4996_v12 = vld [vmem:[%s5617_s12 + $0x30] sm:$0xff] }
0x12bf   :  { %1406 = vrot.lane.b32.xlu1 %v4851_v6, %s4228_s7 }
0x1332   :  { %v1375_v4 = vpop.permute.xlu1 %1374 }
0x1333   :  { %v1380_v5 = vpop.permute.xlu0 %1379  ;;  %v1382_v15 = vmul.f32 %v4923_v7, %v1375_v4 }
0x1334   :  { %v1383_v24 = vmul.f32 %v4929_v10, %v1380_v5 }
0x1335   :  { %v1384_v27 = vsel %vm131_vm1, %v1382_v15, 0.0 }
0x1336   :  { %v1391_v6 = vsel %vm131_vm1, %v1383_v24, 0.0  ;;  %v1385_v28 = vrot.slane %v1384_v27, 4  ;;  %v1404_v8 = vpop.permute.xlu1 %1403 }
0x1337   :  { %v1392_v29 = vrot.slane %v1391_v6, 4 }
0x1338   :  { %v1386_v30 = vadd.f32 %v1385_v28, %v1384_v27 }
0x1339   :  { %v1393_v44 = vadd.f32 %v1392_v29, %v1391_v6 }
0x133a   :  { %v1387_v47 = vrot.slane %v1386_v30, 2  ;;  %v1407_v13 = vpop.permute.xlu1 %1406 }
0x133b   :  { %v1394_v48 = vrot.slane %v1393_v44, 2 }
0x133c   :  { %v1388_v52 = vadd.f32 %v1387_v47, %v1386_v30 }
0x133d   :  { %v1395_v3 = vadd.f32 %v1394_v48, %v1393_v44 }
0x133e   :  { %v1389_v19 = vrot.slane %v1388_v52, 1 }
0x133f   :  { %v1396_v9 = vrot.slane %v1395_v3, 1 }
0x1340   :  { %v1390_v20 = vadd.f32 %v1389_v19, %v1388_v52 }
0x1341   :  { %v1397_v16 = vadd.f32 %v1396_v9, %v1395_v3 }
0x1343   :  { %v1400_v11 = vsel %vm449_vm4, %v1397_v16, %v1390_v20 }
0x1344   :  { %v1409_v17 = vsel %vm131_vm1, %v1400_v11, %v1404_v8 }
0x1345   :  { %v1410_v14 = vsel %vm548_vm7, %v1409_v17, %v1407_v13  ;;  %v1606_v13 = vstv %s3303_s19 }
0x1346   :  { %3768 = vmatmul.mubr.msk.f32.vlgmr.msra.gmra.mxu1 %vm556_vm8, %v1410_v14  ;;  %v1609_v14 = vstv %s3304_s1  ;;  %vm1607_vm15 = vcmp.eq.s32.totalorder %v1606_v13, 1 }
0x1347   :  { %3801 = vmatpush3.msra.mxu1 %v4556_v39  ;;  %3828 = vmatprep.mubr.msk.f32.mxu1 %vm4222_vm0, %v4221_v2 }
0x1348   :  { %3802 = vmatprep.subr.mxu1 %v4221_v2 }
0x1349   :  { %3803 = vmatpush3.msra.mxu1 %v4563_v40 }
0x134a   :  { %3804 = vmatprep.subr.mxu1 %v4221_v2 }
0x134b   :  { %3805 = vmatpush3.msra.mxu1 %v4572_v42 }
0x134c   :  { %3806 = vmatprep.subr.mxu1 %v4221_v2 }
0x134d   :  { %3807 = vmatpush3.msra.mxu1 %v4579_v43 }
0x134e   :  { %3808 = vmatprep.subr.mxu1 %v4221_v2 }
0x134f   :  { %3809 = vmatpush3.msra.mxu1 %v4586_v45 }
0x1350   :  { %3810 = vmatprep.subr.mxu1 %v4221_v2 }
0x1351   :  { %3811 = vmatpush3.msra.mxu1 %v4597_v53 }
0x1352   :  { %3812 = vmatprep.subr.mxu1 %v4221_v2 }
0x1353   :  { %3813 = vmatpush3.msra.mxu1 %v4606_v59 }
0x1354   :  { %3814 = vmatprep.subr.mxu1 %v4221_v2 }
0x1355   :  { %3815 = vmatpush3.msra.mxu1 %v4613_v60 }
0x1356   :  { %3816 = vmatprep.subr.mxu1 %v4221_v2 }
0x1357   :  { %3817 = vmatpush3.msra.mxu1 %v4620_v61 }
0x1358   :  { %3818 = vmatprep.subr.mxu1 %v4221_v2 }
0x1359   :  { %3819 = vmatpush3.msra.mxu1 %v4629_v62 }
0x135a   :  { %3820 = vmatprep.subr.mxu1 %v4221_v2 }
0x135b   :  { %3821 = vmatpush3.msra.mxu1 %v4636_v63 }
0x135c   :  { %3822 = vmatprep.subr.mxu1 %v4221_v2 }
0x135d   :  { %3823 = vmatpush3.msra.mxu1 %v4644_v0 }
0x135e   :  { %3824 = vmatprep.subr.mxu1 %v4221_v2 }
0x135f   :  { %3825 = vmatpush3.msra.mxu1 %v4651_v1 }
0x1360   :  { %3826 = vmatprep.subr.mxu1 %v4221_v2 }
0x1361   :  { %3827 = vmatpush3.msra.mxu1 %v4658_v21 }
0x1362   :  { %3892 = vmatprep.subr.mxu1 %v4221_v2 }
0x1406   :  { %v1480_v39 = vpop.f32.mrf.mxu1 }
0x1407   :  { %v1481_v40 = vadd.f32 %v4675_v49, %v1480_v39  ;;  %v1611_v39 = vstv %s3305_s11 }
0x1408   :  { %v3769_v42 = vpop.f32.mrf.mxu1 }
0x1409   :  { %4077 = vtanh.f32 %v1481_v40  ;;  %v3300_v45 = vmul.f32 -1.442695, %v1481_v40 }
0x140b   :  { %4079 = vpow2.f32 %v3300_v45  ;;  %v1612_v45 = vsel %vm313_vm3, %v1609_v14, %v1611_v39 }
0x1416   :  { %v4078_v43 = vpop.eup %4077 }
0x1417   :  { %1493 = vrot.lane.b32.xlu1 %v4078_v43, %s4224_s23 }
0x1418   :  { %v4080_v53 = vpop.eup %4079 }
0x1419   :  { %v1487_v59 = vadd.f32 1.0, %v4080_v53 }
0x141b   :  { %4081 = vrcp.f32 %v1487_v59 }
0x1428   :  { %v4082_v60 = vpop.eup %4081 }
0x1429   :  { %v1491_v63 = vmul.f32 %v4082_v60, %v4847_v58 }
0x1489   :  { %v1494_v61 = vpop.permute.xlu1 %1493 }
0x148a   :  { %v1496_v62 = vmul.f32 %v4082_v60, %v1494_v61 }
0x148c   :  { %1498 = vrot.lane.b32.xlu1 %v1496_v62, %s4226_s18 }
0x14fe   :  { %v1499_v0 = vpop.permute.xlu1 %1498 }
0x14ff   :  { %v4972_v1 = vadd.f32 %v1499_v0, %v1491_v63 }
0x1501   :  { %4083 = vtanh.f32 %v4972_v1 }
0x150e   :  { %v4084_v21 = vpop.eup %4083 }
0x150f   :  { %1504 = vrot.lane.b32.xlu1 %v4084_v21, %s4224_s23 }
0x1581   :  { %v1505_v49 = vpop.permute.xlu1 %1504 }
0x1582   :  { %v4976_v18 = vmul.f32 %v4082_v60, %v1505_v49 }
0x1584   :  { %1509 = vrot.lane.b32.xlu0 %v4976_v18, %s4226_s18  ;;  %v1693_v22 = vmul.f32 %v4976_v18, %v4721_v25 }
0x1588   :  { %1695 = vrot.lane.b32.xlu0 %v1693_v22, %s4226_s18 }
0x15f6   :  { %v1510_v58 = vpop.permute.xlu0 %1509 }
0x15f7   :  { %3779 = vmatmul.mubr.msk.f32.vlgmr.msra.gmra.mxu0 %vm667_vm9, %v1510_v58  ;;  %v5067_v58 = vld [vmem:[%s5620_s15 + $0x18] sm:$0xff] }
0x15f8   :  { %3782 = vmatpush3.msra.mxu0 %v4987_v23  ;;  %3797 = vmatprep.mubr.msk.f32.mxu0 %vm4222_vm0, %v4221_v2 }
0x15f9   :  { %3783 = vmatprep.subr.mxu0 %v4221_v2 }
0x15fa   :  { %v1696_v26 = vpop.permute.xlu0 %1695  ;;  %3784 = vmatpush3.msra.mxu0 %v4996_v12 }
0x15fb   :  { %v1698_v31 = vsel %vm403_vm2, %v1696_v26, 0.0  ;;  %3785 = vmatprep.subr.mxu0 %v4221_v2  ;;  %v5076_v26 = vld [vmem:[%s5620_s15 + $0x10] sm:$0xff] }
0x15fc   :  { %1699 = vadd.xlane.f32.xlu0 %v1698_v31  ;;  %3786 = vmatpush3.msra.mxu0 %v5004_v32  ;;  %v5083_v31 = vld [vmem:[%s5620_s15 + $0x8] sm:$0xff] }
0x15fd   :  { %3787 = vmatprep.subr.mxu0 %v4221_v2 }
0x15fe   :  { %3788 = vmatpush3.msra.mxu0 %v5011_v37 }
0x15ff   :  { %3789 = vmatprep.subr.mxu0 %v4221_v2 }
0x1600   :  { %3790 = vmatpush3.msra.mxu0 %v5018_v46 }
0x1601   :  { %3791 = vmatprep.subr.mxu0 %v4221_v2 }
0x1602   :  { %3792 = vmatpush3.msra.mxu0 %v5025_v50 }
0x1603   :  { %3793 = vmatprep.subr.mxu0 %v4221_v2 }
0x1604   :  { %3794 = vmatpush3.msra.mxu0 %v5032_v51 }
0x1605   :  { %3795 = vmatprep.subr.mxu0 %v4221_v2 }
0x1606   :  { %3796 = vmatpush3.msra.mxu0 %v5039_v56 }
0x1607   :  { %3831 = vmatprep.subr.mxu0 %v4221_v2 }
0x1685   :  { %v1700_v30 = vpop.xlane.xlu0 %1699 }
0x1686   :  { %v1709_v9 = vrot.slane %v1700_v30, %v4432_v34 }
0x1688   :  { %v1713_v20 = vadd.f32 %v1709_v9, %v4430_v33 }
0x168a   :  { %v1715_v16 = vadd.f32 %v1713_v20, %v4437_v38 }
0x168c   :  { %v1717_v11 = vmax.f32 %v1715_v16, 0.0 }
0x16b7   :  { %v1579_v57 = vpop.f32.mrf.mxu0 }
0x16b8   :  { %v1580_v4 = vadd.f32 %v4761_v36, %v1579_v57  ;;  %v1705_v36 = vrot.slane %v1700_v30, %v4434_v35  ;;  %v5090_v57 = vld [vmem:[%s5620_s15] sm:$0xff] }
0x16b9   :  { %v3780_v5 = vpop.f32.mrf.mxu0 }
0x16ba   :  { %3302 = vst [vmem:[%s5622_s17 + $0x4] sm:$0x3] %v1580_v4  ;;  %v1585_v15 = vsel %vm741_vm10, %v1580_v4, -inf  ;;  %v1712_v44 = vadd.f32 %v1705_v36, %v4441_v41 }
0x16bb   :  { %1586 = vmax.xlane.f32.xlu1 %v1585_v15 }
0x16bc   :  { %v1714_v47 = vadd.f32 %v1712_v44, %v4437_v38 }
0x16be   :  { %v1716_v48 = vmax.f32 %v1714_v47, 0.0 }
0x1744   :  { %v1587_v24 = vpop.xlane.xlu1 %1586 }
0x1745   :  { %vm1588_vm13 = vcmp.eq.f32.partialorder %v1580_v4, %v1587_v24 }
0x1746   :  { %v1589_v27 = vsel %vm1588_vm13, %v4475_v54, 128 }
0x1747   :  { %v1590_v6 = vsel %vm741_vm10, %v1589_v27, 2147483647 }
0x1748   :  { %v1592_v28 = vshra.s32 %v1590_v6, 16  ;;  %v1591_v52 = vand.u32 65535, %v1590_v6 }
0x174a   :  { %v1594_v29 = vcvt.s32.f32 %v1592_v28  ;;  %v1593_v19 = vcvt.s32.f32 %v1591_v52 }
0x174c   :  { %1595 = vmin.xlane.f32.xlu1 %v1594_v29 }
0x175d   :  { %1721 = vperm.xlu1 %4035, %v1716_v48  }
0x17d5   :  { %v1596_v3 = vpop.xlane.xlu1 %1595 }
0x17d6   :  { %vm1597_vm14 = vcmp.eq.f32.partialorder %v1594_v29, %v1596_v3  ;;  %v1602_v17 = vcvt.f32.s32 %v1596_v3 }
0x17d7   :  { %v1598_v8 = vsel %vm1597_vm14, %v1593_v19, inf }
0x17d8   :  { %1599 = vmin.xlane.f32.xlu0 %v1598_v8  ;;  %v1603_v42 = vshll.u32 %v1602_v17, 16 }
0x17d9   :  { %v1722_v60 = vpop.permute.xlu1 %1721 }
0x17da   :  { %v1729_v62 = vrot.slane %v1722_v60, %v4478_v55 }
0x17ee   :  { %1724 = vperm.xlu0 %4036, %v1717_v11  }
0x1861   :  { %v1600_v40 = vpop.xlane.xlu0 %1599 }
0x1862   :  { %v1601_v43 = vcvt.f32.s32 %v1600_v40 }
0x1864   :  { %v1604_v53 = vadd.s32 %v1603_v42, %v1601_v43 }
0x1866   :  { %v1613_v59 = vsel %vm1607_vm15, %v1612_v45, %v1604_v53 }
0x1867   :  { %1615 = vperm.xlu0 %4036, %v1613_v59  }
0x1869   :  { %v1725_v61 = vpop.permute.xlu0 %1724 }
0x186a   :  { %v1733_v63 = vrot.slane %v1725_v61, %v4478_v55 }
0x186c   :  { %v1734_v0 = vsel %vm449_vm4, %v1733_v63, %v1729_v62 }
0x186d   :  { %v1736_v21 = vsel %vm452_vm5, %v1734_v0, -inf }
0x186e   :  { %1737 = vmax.xlane.f32.xlu1 %v1736_v21 }
0x18e2   :  { %v1616_v49 = vpop.permute.xlu0 %1615 }
0x18e3   :  { %vm1617_vm6 = vcmp.eq.s32.totalorder %v4475_v54, %v1616_v49 }
0x18e4   :  { %v3306_v22 = vsel %vm1617_vm6, 1.0, %v4221_v2 }
0x18e5   :  { %3798 = vmatmul.mubr.msk.f32.vlgmr.msra.gmra.mxu0 %vm131_vm1, %v3306_v22 }
0x18e6   :  { %3832 = vmatpush3.msra.mxu0 %v5067_v58  ;;  %3839 = vmatprep.mubr.msk.f32.mxu0 %vm4222_vm0, %v4221_v2 }
0x18e7   :  { %3833 = vmatprep.subr.mxu0 %v4221_v2 }
0x18e8   :  { %3834 = vmatpush3.msra.mxu0 %v5076_v26 }
0x18e9   :  { %3835 = vmatprep.subr.mxu0 %v4221_v2 }
0x18ea   :  { %3836 = vmatpush3.msra.mxu0 %v5083_v31 }
0x18eb   :  { %3837 = vmatprep.subr.mxu0 %v4221_v2 }
0x18ec   :  { %3838 = vmatpush3.msra.mxu0 %v5090_v57 }
0x18ed   :  { %3842 = vmatprep.subr.mxu0 %v4221_v2 }
0x18f7   :  { %v1738_v4 = vpop.xlane.xlu1 %1737 }
0x18f8   :  { %v1743_v5 = vrot.slane %v1738_v4, %v4434_v35  ;;  %v1747_v15 = vrot.slane %v1738_v4, %v4432_v34 }
0x18fa   :  { %v1750_v24 = vsub.f32 %v1716_v48, %v1743_v5  ;;  %v1751_v27 = vsub.f32 %v1717_v11, %v1747_v15 }
0x18fc   :  { %v1752_v6 = vmul.f32 1.442695, %v1750_v24  ;;  %v1754_v28 = vmul.f32 1.442695, %v1751_v27 }
0x18fe   :  { %4085 = vpow2.f32 %v1752_v6 }
0x18ff   :  { %4087 = vpow2.f32 %v1754_v28 }
0x190b   :  { %v4086_v29 = vpop.eup %4085 }
0x190c   :  { %1759 = vperm.xlu0 %4036, %v4086_v29   ;;  %v4088_v30 = vpop.eup %4087 }
0x1910   :  { %1762 = vperm.xlu0 %4036, %v4088_v30  }
0x1987   :  { %v1760_v36 = vpop.permute.xlu0 %1759 }
0x1988   :  { %v1767_v47 = vrot.slane %v1760_v36, %v4478_v55 }
0x198b   :  { %v1763_v44 = vpop.permute.xlu0 %1762 }
0x198c   :  { %v1771_v52 = vrot.slane %v1763_v44, %v4478_v55 }
0x198e   :  { %v1772_v3 = vsel %vm449_vm4, %v1771_v52, %v1767_v47 }
0x198f   :  { %v1774_v19 = vsel %vm452_vm5, %v1772_v3, 0.0 }
0x1990   :  { %1775 = vadd.xlane.f32.xlu0 %v1774_v19 }
0x19a5   :  { %v1689_v48 = vpop.f32.mrf.mxu0 }
0x19a7   :  { %v3799_v8 = vpop.f32.mrf.mxu0 }
0x1a19   :  { %v1776_v9 = vpop.xlane.xlu0 %1775 }
0x1a1a   :  { %v1781_v20 = vrot.slane %v1776_v9, %v4434_v35  ;;  %v1785_v16 = vrot.slane %v1776_v9, %v4432_v34 }
0x1a1c   :  { %4089 = vrcp.f32 %v1781_v20 }
0x1a1d   :  { %4091 = vrcp.f32 %v1785_v16 }
0x1a29   :  { %v4090_v11 = vpop.eup %4089 }
0x1a2a   :  { %v4092_v17 = vpop.eup %4091  ;;  %v1789_v13 = vmul.f32 %v4090_v11, %v4086_v29 }
0x1a2b   :  { %v1791_v14 = vmul.f32 %v4092_v17, %v4088_v30  ;;  %v5126_v30 = vld [vmem:[%s5619_s14] ss:$0 sm:$0xff] }
0x1a2c   :  { %1794 = vperm.xlu1 %4035, %v1789_v13  }
0x1a2d   :  { %1799 = vperm.xlu0 %4036, %v1791_v14  }
0x1a30   :  { %1823 = vrot.lane.b32.xlu1 %v1689_v48, %s4224_s23 }
0x1a34   :  { %1826 = vrot.lane.b32.xlu1 %v4976_v18, %s4228_s7 }
0x1aa7   :  { %v1795_v39 = vpop.permute.xlu1 %1794 }
0x1aa8   :  { %v1800_v40 = vpop.permute.xlu0 %1799  ;;  %v1802_v42 = vmul.f32 %v4923_v7, %v1795_v39 }
0x1aa9   :  { %v1803_v43 = vmul.f32 %v4929_v10, %v1800_v40 }
0x1aaa   :  { %v1804_v45 = vsel %vm131_vm1, %v1802_v42, 0.0 }
0x1aab   :  { %v1811_v53 = vsel %vm131_vm1, %v1803_v43, 0.0  ;;  %v1805_v59 = vrot.slane %v1804_v45, 4  ;;  %v1824_v18 = vpop.permute.xlu1 %1823 }
0x1aac   :  { %v1812_v60 = vrot.slane %v1811_v53, 4 }
0x1aad   :  { %v1806_v61 = vadd.f32 %v1805_v59, %v1804_v45  ;;  %v5166_v45 = vld [vmem:[%s5621_s16] ss:$0 sm:$0xff] }
0x1aae   :  { %v1813_v62 = vadd.f32 %v1812_v60, %v1811_v53 }
0x1aaf   :  { %v1807_v63 = vrot.slane %v1806_v61, 2  ;;  %v1827_v6 = vpop.permute.xlu1 %1826 }
0x1ab0   :  { %v1814_v0 = vrot.slane %v1813_v62, 2 }
0x1ab1   :  { %v1808_v21 = vadd.f32 %v1807_v63, %v1806_v61 }
0x1ab2   :  { %v1815_v49 = vadd.f32 %v1814_v0, %v1813_v62 }
0x1ab3   :  { %v1809_v22 = vrot.slane %v1808_v21, 1 }
0x1ab4   :  { %v1816_v4 = vrot.slane %v1815_v49, 1 }
0x1ab5   :  { %v1810_v5 = vadd.f32 %v1809_v22, %v1808_v21 }
0x1ab6   :  { %v1817_v15 = vadd.f32 %v1816_v4, %v1815_v49 }
0x1ab8   :  { %v1820_v24 = vsel %vm449_vm4, %v1817_v15, %v1810_v5 }
0x1ab9   :  { %v1829_v27 = vsel %vm131_vm1, %v1820_v24, %v1824_v18 }
0x1aba   :  { %v1830_v28 = vsel %vm548_vm7, %v1829_v27, %v1827_v6 }
0x1abb   :  { %3829 = vmatmul.mubr.msk.f32.vlgmr.msra.gmra.mxu1 %vm556_vm8, %v1830_v28 }
0x1abc   :  { %3893 = vmatpush3.msra.mxu1 %v5067_v58  ;;  %3900 = vmatprep.mubr.msk.f32.mxu1 %vm4222_vm0, %v4221_v2 }
0x1abd   :  { %3894 = vmatprep.subr.mxu1 %v4221_v2 }
0x1abe   :  { %3895 = vmatpush3.msra.mxu1 %v5076_v26 }
0x1abf   :  { %3896 = vmatprep.subr.mxu1 %v4221_v2 }
0x1ac0   :  { %3897 = vmatpush3.msra.mxu1 %v5083_v31 }
0x1ac1   :  { %3898 = vmatprep.subr.mxu1 %v4221_v2 }
0x1ac2   :  { %3899 = vmatpush3.msra.mxu1 %v5090_v57 }
0x1ac3   :  { %3903 = vmatprep.subr.mxu1 %v4221_v2 }
0x1b7b   :  { %v1900_v29 = vpop.f32.mrf.mxu1 }
0x1b7c   :  { %v1901_v36 = vadd.f32 %v5126_v30, %v1900_v29 }
0x1b7d   :  { %v3830_v44 = vpop.f32.mrf.mxu1 }
0x1b7e   :  { %4093 = vtanh.f32 %v1901_v36  ;;  %v3309_v52 = vmul.f32 -1.442695, %v1901_v36 }
0x1b80   :  { %4095 = vpow2.f32 %v3309_v52  ;;  %v2026_v52 = vstv %s3312_s0 }
0x1b81   :  { %vm2027_vm13 = vcmp.eq.s32.totalorder %v2026_v52, 1 }
0x1b8b   :  { %v4094_v47 = vpop.eup %4093 }
0x1b8c   :  { %1913 = vrot.lane.b32.xlu1 %v4094_v47, %s4224_s23 }
0x1b8d   :  { %v4096_v3 = vpop.eup %4095 }
0x1b8e   :  { %v1907_v19 = vadd.f32 1.0, %v4096_v3  ;;  %v2029_v3 = vstv %s3313_s6 }
0x1b90   :  { %4097 = vrcp.f32 %v1907_v19  ;;  %v2031_v19 = vstv %s3314_s9 }
0x1b9d   :  { %v4098_v48 = vpop.eup %4097 }
0x1b9e   :  { %v1911_v20 = vmul.f32 %v4098_v48, %v4972_v1 }
0x1bfe   :  { %v1914_v8 = vpop.permute.xlu1 %1913 }
0x1bff   :  { %v1916_v9 = vmul.f32 %v4098_v48, %v1914_v8 }
0x1c01   :  { %1918 = vrot.lane.b32.xlu1 %v1916_v9, %s4226_s18 }
0x1c73   :  { %v1919_v16 = vpop.permute.xlu1 %1918 }
0x1c74   :  { %v5132_v11 = vadd.f32 %v1919_v16, %v1911_v20  ;;  %v2032_v20 = vsel %vm313_vm3, %v2029_v3, %v2031_v19  ;;  %v5287_v3 = vld [vmem:[%s5618_s13 + $0x10] sm:$0xff] }
0x1c76   :  { %4099 = vtanh.f32 %v5132_v11 }
0x1c83   :  { %v4100_v17 = vpop.eup %4099 }
0x1c84   :  { %1924 = vrot.lane.b32.xlu1 %v4100_v17, %s4224_s23 }
0x1cf6   :  { %v1925_v13 = vpop.permute.xlu1 %1924 }
0x1cf7   :  { %v5136_v14 = vmul.f32 %v4098_v48, %v1925_v13 }
0x1cf9   :  { %1929 = vrot.lane.b32.xlu0 %v5136_v14, %s4226_s18  ;;  %v2113_v39 = vmul.f32 %v5136_v14, %v4721_v25 }
0x1cfd   :  { %2115 = vrot.lane.b32.xlu0 %v2113_v39, %s4226_s18 }
0x1d6b   :  { %v1930_v1 = vpop.permute.xlu0 %1929 }
0x1d6c   :  { %3840 = vmatmul.mubr.msk.f32.vlgmr.msra.gmra.mxu0 %vm667_vm9, %v1930_v1 }
0x1d6d   :  { %3843 = vmatpush3.msra.mxu0 %v4987_v23  ;;  %3858 = vmatprep.mubr.msk.f32.mxu0 %vm4222_vm0, %v4221_v2 }
0x1d6e   :  { %3844 = vmatprep.subr.mxu0 %v4221_v2 }
0x1d6f   :  { %v2116_v40 = vpop.permute.xlu0 %2115  ;;  %3845 = vmatpush3.msra.mxu0 %v4996_v12 }
0x1d70   :  { %v2118_v42 = vsel %vm403_vm2, %v2116_v40, 0.0  ;;  %3846 = vmatprep.subr.mxu0 %v4221_v2 }
0x1d71   :  { %2119 = vadd.xlane.f32.xlu0 %v2118_v42  ;;  %3847 = vmatpush3.msra.mxu0 %v5004_v32 }
0x1d72   :  { %3848 = vmatprep.subr.mxu0 %v4221_v2 }
0x1d73   :  { %3849 = vmatpush3.msra.mxu0 %v5011_v37 }
0x1d74   :  { %3850 = vmatprep.subr.mxu0 %v4221_v2 }
0x1d75   :  { %3851 = vmatpush3.msra.mxu0 %v5018_v46 }
0x1d76   :  { %3852 = vmatprep.subr.mxu0 %v4221_v2 }
0x1d77   :  { %3853 = vmatpush3.msra.mxu0 %v5025_v50 }
0x1d78   :  { %3854 = vmatprep.subr.mxu0 %v4221_v2 }
0x1d79   :  { %3855 = vmatpush3.msra.mxu0 %v5032_v51 }
0x1d7a   :  { %3856 = vmatprep.subr.mxu0 %v4221_v2 }
0x1d7b   :  { %3857 = vmatpush3.msra.mxu0 %v5039_v56 }
0x1d7c   :  { %3861 = vmatprep.subr.mxu0 %v4221_v2 }
0x1dfa   :  { %v2120_v49 = vpop.xlane.xlu0 %2119 }
0x1dfb   :  { %v2125_v22 = vrot.slane %v2120_v49, %v4434_v35  ;;  %v2129_v28 = vrot.slane %v2120_v49, %v4432_v34  ;;  %v5246_v49 = vld [vmem:[%s5618_s13 + $0x38] sm:$0xff] }
0x1dfd   :  { %v2132_v18 = vadd.f32 %v2125_v22, %v4441_v41  ;;  %v2133_v29 = vadd.f32 %v2129_v28, %v4430_v33  ;;  %v5253_v22 = vld [vmem:[%s5618_s13 + $0x30] sm:$0xff] }
0x1dff   :  { %v5178_v4 = vadd.f32 %v2132_v18, %v4437_v38  ;;  %v5186_v36 = vadd.f32 %v2133_v29, %v4437_v38  ;;  %v5260_v18 = vld [vmem:[%s5618_s13 + $0x28] sm:$0xff] }
0x1e01   :  { %v2136_v5 = vmax.f32 %v5178_v4, 0.0  ;;  %v2137_v44 = vmax.f32 %v5186_v36, 0.0  ;;  %v5301_v36 = vld [vmem:[%s5618_s13] sm:$0xff] }
0x1e2c   :  { %v1999_v43 = vpop.f32.mrf.mxu0 }
0x1e2d   :  { %v2000_v53 = vadd.f32 %v5166_v45, %v1999_v43 }
0x1e2e   :  { %v3841_v59 = vpop.f32.mrf.mxu0 }
0x1e2f   :  { %3311 = vst [vmem:[%s5622_s17 + $0x6] sm:$0x3] %v2000_v53  ;;  %v2005_v60 = vsel %vm741_vm10, %v2000_v53, -inf }
0x1e30   :  { %2006 = vmax.xlane.f32.xlu1 %v2005_v60  ;;  %v5202_v60 = vld [vmem:[%s5618_s13 + $0x68] sm:$0xff] }
0x1eb9   :  { %v2007_v61 = vpop.xlane.xlu1 %2006 }
0x1eba   :  { %vm2008_vm11 = vcmp.eq.f32.partialorder %v2000_v53, %v2007_v61  ;;  %v5211_v61 = vld [vmem:[%s5618_s13 + $0x60] sm:$0xff] }
0x1ebb   :  { %v2009_v62 = vsel %vm2008_vm11, %v4475_v54, 128 }
0x1ebc   :  { %v2010_v63 = vsel %vm741_vm10, %v2009_v62, 2147483647  ;;  %v5218_v62 = vld [vmem:[%s5618_s13 + $0x58] sm:$0xff] }
0x1ebd   :  { %v2012_v0 = vshra.s32 %v2010_v63, 16  ;;  %v2011_v15 = vand.u32 65535, %v2010_v63  ;;  %v5225_v63 = vld [vmem:[%s5618_s13 + $0x50] sm:$0xff] }
0x1ebf   :  { %v2014_v21 = vcvt.s32.f32 %v2012_v0  ;;  %v2013_v27 = vcvt.s32.f32 %v2011_v15  ;;  %v5232_v0 = vld [vmem:[%s5618_s13 + $0x48] sm:$0xff] }
0x1ec1   :  { %2015 = vmin.xlane.f32.xlu1 %v2014_v21 }
0x1ed2   :  { %2141 = vperm.xlu1 %4035, %v2136_v5  }
0x1f4a   :  { %v2016_v24 = vpop.xlane.xlu1 %2015 }
0x1f4b   :  { %vm2017_vm12 = vcmp.eq.f32.partialorder %v2014_v21, %v2016_v24  ;;  %v2022_v47 = vcvt.f32.s32 %v2016_v24  ;;  %v5239_v21 = vld [vmem:[%s5618_s13 + $0x40] sm:$0xff] }
0x1f4c   :  { %v2018_v6 = vsel %vm2017_vm12, %v2013_v27, inf }
0x1f4d   :  { %2019 = vmin.xlane.f32.xlu0 %v2018_v6  ;;  %v2023_v8 = vshll.u32 %v2022_v47, 16  ;;  %v5269_v6 = vld [vmem:[%s5618_s13 + $0x20] sm:$0xff]  ;;  %v5280_v47 = vld [vmem:[%s5618_s13 + $0x18] sm:$0xff] }
0x1f4e   :  { %v2142_v13 = vpop.permute.xlu1 %2141 }
0x1f4f   :  { %v2149_v1 = vrot.slane %v2142_v13, %v4478_v55 }
0x1f63   :  { %2144 = vperm.xlu0 %4036, %v2137_v44  }
0x1fd6   :  { %v2020_v48 = vpop.xlane.xlu0 %2019 }
0x1fd7   :  { %v2021_v9 = vcvt.f32.s32 %v2020_v48 }
0x1fd9   :  { %v2024_v16 = vadd.s32 %v2023_v8, %v2021_v9 }
0x1fdb   :  { %v2033_v17 = vsel %vm2027_vm13, %v2032_v20, %v2024_v16 }
0x1fdc   :  { %2035 = vperm.xlu0 %4036, %v2033_v17  }
0x1fde   :  { %v2145_v39 = vpop.permute.xlu0 %2144 }
0x1fdf   :  { %v2153_v40 = vrot.slane %v2145_v39, %v4478_v55 }
0x1fe1   :  { %v2154_v42 = vsel %vm449_vm4, %v2153_v40, %v2149_v1 }
0x1fe2   :  { %v2156_v43 = vsel %vm452_vm5, %v2154_v42, -inf }
0x1fe3   :  { %2157 = vmax.xlane.f32.xlu1 %v2156_v43 }
0x2057   :  { %v2036_v53 = vpop.permute.xlu0 %2035 }
0x2058   :  { %vm2037_vm14 = vcmp.eq.s32.totalorder %v4475_v54, %v2036_v53 }
0x2059   :  { %v3315_v59 = vsel %vm2037_vm14, 1.0, %v4221_v2 }
0x205a   :  { %3859 = vmatmul.mubr.msk.f32.vlgmr.msra.gmra.mxu0 %vm131_vm1, %v3315_v59 }
0x205b   :  { %3862 = vmatpush3.msra.mxu0 %v5202_v60  ;;  %3889 = vmatprep.mubr.msk.f32.mxu0 %vm4222_vm0, %v4221_v2 }
0x205c   :  { %3863 = vmatprep.subr.mxu0 %v4221_v2 }
0x205d   :  { %3864 = vmatpush3.msra.mxu0 %v5211_v61 }
0x205e   :  { %3865 = vmatprep.subr.mxu0 %v4221_v2 }
0x205f   :  { %3866 = vmatpush3.msra.mxu0 %v5218_v62 }
0x2060   :  { %3867 = vmatprep.subr.mxu0 %v4221_v2 }
0x2061   :  { %3868 = vmatpush3.msra.mxu0 %v5225_v63 }
0x2062   :  { %3869 = vmatprep.subr.mxu0 %v4221_v2 }
0x2063   :  { %3870 = vmatpush3.msra.mxu0 %v5232_v0 }
0x2064   :  { %3871 = vmatprep.subr.mxu0 %v4221_v2 }
0x2065   :  { %3872 = vmatpush3.msra.mxu0 %v5239_v21 }
0x2066   :  { %3873 = vmatprep.subr.mxu0 %v4221_v2 }
0x2067   :  { %3874 = vmatpush3.msra.mxu0 %v5246_v49 }
0x2068   :  { %3875 = vmatprep.subr.mxu0 %v4221_v2 }
0x2069   :  { %3876 = vmatpush3.msra.mxu0 %v5253_v22 }
0x206a   :  { %3877 = vmatprep.subr.mxu0 %v4221_v2 }
0x206b   :  { %3878 = vmatpush3.msra.mxu0 %v5260_v18 }
0x206c   :  { %v2158_v15 = vpop.xlane.xlu1 %2157  ;;  %3879 = vmatprep.subr.mxu0 %v4221_v2 }
0x206d   :  { %v2163_v24 = vrot.slane %v2158_v15, %v4434_v35  ;;  %v2167_v27 = vrot.slane %v2158_v15, %v4432_v34  ;;  %3880 = vmatpush3.msra.mxu0 %v5269_v6 }
0x206e   :  { %3881 = vmatprep.subr.mxu0 %v4221_v2 }
0x206f   :  { %v2170_v28 = vsub.f32 %v2136_v5, %v2163_v24  ;;  %v2171_v29 = vsub.f32 %v2137_v44, %v2167_v27  ;;  %3882 = vmatpush3.msra.mxu0 %v5280_v47  ;;  %v5294_v5 = vld [vmem:[%s5618_s13 + $0x8] sm:$0xff] }
0x2070   :  { %3883 = vmatprep.subr.mxu0 %v4221_v2 }
0x2071   :  { %v2172_v52 = vmul.f32 1.442695, %v2170_v28  ;;  %3884 = vmatpush3.msra.mxu0 %v5287_v3  ;;  %v2174_v4 = vmul.f32 1.442695, %v2171_v29 }
0x2072   :  { %3885 = vmatprep.subr.mxu0 %v4221_v2 }
0x2073   :  { %4101 = vpow2.f32 %v2172_v52  ;;  %3886 = vmatpush3.msra.mxu0 %v5294_v5 }
0x2074   :  { %3887 = vmatprep.subr.mxu0 %v4221_v2  ;;  %4103 = vpow2.f32 %v2174_v4 }
0x2075   :  { %3888 = vmatpush3.msra.mxu0 %v5301_v36 }
0x2076   :  { %3953 = vmatprep.subr.mxu0 %v4221_v2 }
0x2080   :  { %v4102_v44 = vpop.eup %4101 }
0x2081   :  { %2179 = vperm.xlu0 %4036, %v4102_v44   ;;  %v4104_v19 = vpop.eup %4103 }
0x2085   :  { %2182 = vperm.xlu0 %4036, %v4104_v19  }
0x20fc   :  { %v2180_v48 = vpop.permute.xlu0 %2179 }
0x20fd   :  { %v2187_v9 = vrot.slane %v2180_v48, %v4478_v55 }
0x2100   :  { %v2183_v8 = vpop.permute.xlu0 %2182 }
0x2101   :  { %v2191_v20 = vrot.slane %v2183_v8, %v4478_v55 }
0x2103   :  { %v2192_v16 = vsel %vm449_vm4, %v2191_v20, %v2187_v9 }
0x2104   :  { %v2194_v17 = vsel %vm452_vm5, %v2192_v16, 0.0 }
0x2105   :  { %2195 = vadd.xlane.f32.xlu0 %v2194_v17 }
0x211a   :  { %v2109_v13 = vpop.f32.mrf.mxu0 }
0x211c   :  { %v3860_v39 = vpop.f32.mrf.mxu0 }
0x218e   :  { %v2196_v1 = vpop.xlane.xlu0 %2195 }
0x218f   :  { %v2201_v40 = vrot.slane %v2196_v1, %v4434_v35  ;;  %v2205_v42 = vrot.slane %v2196_v1, %v4432_v34 }
0x2191   :  { %4105 = vrcp.f32 %v2201_v40 }
0x2192   :  { %4107 = vrcp.f32 %v2205_v42 }
0x219e   :  { %v4106_v43 = vpop.eup %4105 }
0x219f   :  { %v4108_v53 = vpop.eup %4107  ;;  %v2209_v59 = vmul.f32 %v4106_v43, %v4102_v44 }
0x21a0   :  { %v2211_v15 = vmul.f32 %v4108_v53, %v4104_v19 }
0x21a1   :  { %2214 = vperm.xlu1 %4035, %v2209_v59  }
0x21a2   :  { %2219 = vperm.xlu0 %4036, %v2211_v15  }
0x21a5   :  { %2243 = vrot.lane.b32.xlu1 %v2109_v13, %s4224_s23 }
0x21a9   :  { %2246 = vrot.lane.b32.xlu1 %v5136_v14, %s4228_s7 }
0x221c   :  { %v2215_v24 = vpop.permute.xlu1 %2214 }
0x221d   :  { %v2220_v27 = vpop.permute.xlu0 %2219  ;;  %v2222_v28 = vmul.f32 %v4923_v7, %v2215_v24 }
0x221e   :  { %v2223_v29 = vmul.f32 %v4929_v10, %v2220_v27 }
0x221f   :  { %v2224_v52 = vsel %vm131_vm1, %v2222_v28, 0.0 }
0x2220   :  { %v2231_v4 = vsel %vm131_vm1, %v2223_v29, 0.0  ;;  %v2225_v48 = vrot.slane %v2224_v52, 4  ;;  %v2244_v14 = vpop.permute.xlu1 %2243 }
0x2221   :  { %v2232_v44 = vrot.slane %v2231_v4, 4 }
0x2222   :  { %v2226_v19 = vadd.f32 %v2225_v48, %v2224_v52 }
0x2223   :  { %v2233_v8 = vadd.f32 %v2232_v44, %v2231_v4 }
0x2224   :  { %v2227_v9 = vrot.slane %v2226_v19, 2  ;;  %v2247_v42 = vpop.permute.xlu1 %2246 }
0x2225   :  { %v2234_v20 = vrot.slane %v2233_v8, 2 }
0x2226   :  { %v2228_v16 = vadd.f32 %v2227_v9, %v2226_v19 }
0x2227   :  { %v2235_v17 = vadd.f32 %v2234_v20, %v2233_v8 }
0x2228   :  { %v2229_v13 = vrot.slane %v2228_v16, 1 }
0x2229   :  { %v2236_v39 = vrot.slane %v2235_v17, 1 }
0x222a   :  { %v2230_v1 = vadd.f32 %v2229_v13, %v2228_v16 }
0x222b   :  { %v2237_v40 = vadd.f32 %v2236_v39, %v2235_v17 }
0x222d   :  { %v2240_v7 = vsel %vm449_vm4, %v2237_v40, %v2230_v1 }
0x222e   :  { %v2249_v10 = vsel %vm131_vm1, %v2240_v7, %v2244_v14 }
0x222f   :  { %v2250_v43 = vsel %vm548_vm7, %v2249_v10, %v2247_v42 }
0x2230   :  { %3890 = vmatmul.mubr.msk.f32.vlgmr.msra.gmra.mxu0 %vm556_vm8, %v2250_v43 }
0x2231   :  { %3954 = vmatpush3.msra.mxu0 %v5067_v58  ;;  %3961 = vmatprep.mubr.msk.f32.mxu0 %vm4222_vm0, %v4221_v2 }
0x2232   :  { %3955 = vmatprep.subr.mxu0 %v4221_v2 }
0x2233   :  { %3956 = vmatpush3.msra.mxu0 %v5076_v26 }
0x2234   :  { %3957 = vmatprep.subr.mxu0 %v4221_v2 }
0x2235   :  { %3958 = vmatpush3.msra.mxu0 %v5083_v31 }
0x2236   :  { %3959 = vmatprep.subr.mxu0 %v4221_v2 }
0x2237   :  { %3960 = vmatpush3.msra.mxu0 %v5090_v57 }
0x2238   :  { %3964 = vmatprep.subr.mxu0 %v4221_v2 }
0x22f0   :  { %v2320_v53 = vpop.f32.mrf.mxu0 }
0x22f1   :  { %v2321_v59 = vadd.f32 %v5126_v30, %v2320_v53 }
0x22f2   :  { %v3891_v15 = vpop.f32.mrf.mxu0 }
0x22f3   :  { %4109 = vtanh.f32 %v2321_v59  ;;  %v3318_v27 = vmul.f32 -1.442695, %v2321_v59 }
0x22f5   :  { %4111 = vpow2.f32 %v3318_v27 }
0x2300   :  { %v4110_v24 = vpop.eup %4109 }
0x2301   :  { %2333 = vrot.lane.b32.xlu1 %v4110_v24, %s4224_s23 }
0x2302   :  { %v4112_v28 = vpop.eup %4111 }
0x2303   :  { %v2327_v29 = vadd.f32 1.0, %v4112_v28 }
0x2305   :  { %4113 = vrcp.f32 %v2327_v29 }
0x2312   :  { %v4114_v52 = vpop.eup %4113 }
0x2313   :  { %v2331_v44 = vmul.f32 %v4114_v52, %v5132_v11 }
0x2373   :  { %v2334_v4 = vpop.permute.xlu1 %2333 }
0x2374   :  { %v2336_v48 = vmul.f32 %v4114_v52, %v2334_v4  ;;  %v2446_v4 = vstv %s3321_s22 }
0x2375   :  { %vm2447_vm11 = vcmp.eq.s32.totalorder %v2446_v4, 1 }
0x2376   :  { %2338 = vrot.lane.b32.xlu1 %v2336_v48, %s4226_s18  ;;  %v2449_v48 = vstv %s3322_s24  ;;  %s3331_s24 = sld [smem:[#allocation5 + $0x300]] }
0x23e8   :  { %v2339_v19 = vpop.permute.xlu1 %2338 }
0x23e9   :  { %v5336_v8 = vadd.f32 %v2339_v19, %v2331_v44  ;;  %v2451_v44 = vstv %s3323_s25  ;;  %s3332_s25 = sld [smem:[#allocation5 + $0x301]] }
0x23eb   :  { %4115 = vtanh.f32 %v5336_v8 }
0x23f8   :  { %v4116_v9 = vpop.eup %4115 }
0x23f9   :  { %2344 = vrot.lane.b32.xlu1 %v4116_v9, %s4224_s23 }
0x246b   :  { %v2345_v20 = vpop.permute.xlu1 %2344 }
0x246c   :  { %v5340_v16 = vmul.f32 %v4114_v52, %v2345_v20 }
0x246e   :  { %2349 = vrot.lane.b32.xlu0 %v5340_v16, %s4226_s18  ;;  %v2533_v17 = vmul.f32 %v5340_v16, %v4721_v25 }
0x2472   :  { %2535 = vrot.lane.b32.xlu0 %v2533_v17, %s4226_s18  ;;  %v2452_v17 = vsel %vm313_vm3, %v2449_v48, %v2451_v44 }
0x24e0   :  { %v2350_v11 = vpop.permute.xlu0 %2349 }
0x24e1   :  { %3901 = vmatmul.mubr.msk.f32.vlgmr.msra.gmra.mxu1 %vm667_vm9, %v2350_v11 }
0x24e2   :  { %3904 = vmatpush3.msra.mxu1 %v4987_v23  ;;  %3919 = vmatprep.mubr.msk.f32.mxu1 %vm4222_vm0, %v4221_v2 }
0x24e3   :  { %3905 = vmatprep.subr.mxu1 %v4221_v2 }
0x24e4   :  { %v2536_v13 = vpop.permute.xlu0 %2535  ;;  %3906 = vmatpush3.msra.mxu1 %v4996_v12 }
0x24e5   :  { %v2538_v14 = vsel %vm403_vm2, %v2536_v13, 0.0  ;;  %3907 = vmatprep.subr.mxu1 %v4221_v2 }
0x24e6   :  { %2539 = vadd.xlane.f32.xlu0 %v2538_v14  ;;  %3908 = vmatpush3.msra.mxu1 %v5004_v32 }
0x24e7   :  { %3909 = vmatprep.subr.mxu1 %v4221_v2 }
0x24e8   :  { %3910 = vmatpush3.msra.mxu1 %v5011_v37 }
0x24e9   :  { %3911 = vmatprep.subr.mxu1 %v4221_v2 }
0x24ea   :  { %3912 = vmatpush3.msra.mxu1 %v5018_v46 }
0x24eb   :  { %3913 = vmatprep.subr.mxu1 %v4221_v2 }
0x24ec   :  { %3914 = vmatpush3.msra.mxu1 %v5025_v50 }
0x24ed   :  { %3915 = vmatprep.subr.mxu1 %v4221_v2 }
0x24ee   :  { %3916 = vmatpush3.msra.mxu1 %v5032_v51 }
0x24ef   :  { %3917 = vmatprep.subr.mxu1 %v4221_v2 }
0x24f0   :  { %3918 = vmatpush3.msra.mxu1 %v5039_v56 }
0x24f1   :  { %3922 = vmatprep.subr.mxu1 %v4221_v2 }
0x256f   :  { %v2540_v1 = vpop.xlane.xlu0 %2539 }
0x2570   :  { %v2545_v40 = vrot.slane %v2540_v1, %v4434_v35  ;;  %v2549_v24 = vrot.slane %v2540_v1, %v4432_v34 }
0x2572   :  { %v2552_v7 = vadd.f32 %v2545_v40, %v4441_v41  ;;  %v2553_v27 = vadd.f32 %v2549_v24, %v4430_v33 }
0x2574   :  { %v5377_v10 = vadd.f32 %v2552_v7, %v4437_v38  ;;  %v2555_v28 = vadd.f32 %v2553_v27, %v4437_v38 }
0x2576   :  { %v2556_v42 = vmax.f32 %v5377_v10, 0.0  ;;  %v2557_v29 = vmax.f32 %v2555_v28, 0.0 }
0x25a1   :  { %v2419_v23 = vpop.f32.mrf.mxu1 }
0x25a2   :  { %v2420_v12 = vadd.f32 %v5166_v45, %v2419_v23 }
0x25a3   :  { %v3902_v32 = vpop.f32.mrf.mxu1 }
0x25a4   :  { %3320 = vst [vmem:[%s5622_s17 + $0x8] sm:$0x3] %v2420_v12  ;;  %v2425_v37 = vsel %vm741_vm10, %v2420_v12, -inf }
0x25a5   :  { %2426 = vmax.xlane.f32.xlu1 %v2425_v37 }
0x262e   :  { %v2427_v46 = vpop.xlane.xlu1 %2426 }
0x262f   :  { %vm2428_vm15 = vcmp.eq.f32.partialorder %v2420_v12, %v2427_v46 }
0x2630   :  { %v2429_v50 = vsel %vm2428_vm15, %v4475_v54, 128 }
0x2631   :  { %v2430_v51 = vsel %vm741_vm10, %v2429_v50, 2147483647 }
0x2632   :  { %v2432_v56 = vshra.s32 %v2430_v51, 16  ;;  %v2431_v43 = vand.u32 65535, %v2430_v51 }
0x2634   :  { %v2434_v39 = vcvt.s32.f32 %v2432_v56  ;;  %v2433_v59 = vcvt.s32.f32 %v2431_v43 }
0x2636   :  { %2435 = vmin.xlane.f32.xlu1 %v2434_v39 }
0x2647   :  { %2561 = vperm.xlu1 %4035, %v2556_v42  }
0x26bf   :  { %v2436_v53 = vpop.xlane.xlu1 %2435 }
0x26c0   :  { %vm2437_vm6 = vcmp.eq.f32.partialorder %v2434_v39, %v2436_v53  ;;  %v2442_v52 = vcvt.f32.s32 %v2436_v53 }
0x26c1   :  { %v2438_v15 = vsel %vm2437_vm6, %v2433_v59, inf }
0x26c2   :  { %2439 = vmin.xlane.f32.xlu0 %v2438_v15  ;;  %v2443_v9 = vshll.u32 %v2442_v52, 16 }
0x26c3   :  { %v2562_v14 = vpop.permute.xlu1 %2561 }
0x26c4   :  { %v2569_v12 = vrot.slane %v2562_v14, %v4478_v55 }
0x26d8   :  { %2564 = vperm.xlu0 %4036, %v2557_v29  }
0x274b   :  { %v2440_v19 = vpop.xlane.xlu0 %2439 }
0x274c   :  { %v2441_v20 = vcvt.f32.s32 %v2440_v19 }
0x274e   :  { %v2444_v11 = vadd.s32 %v2443_v9, %v2441_v20 }
0x2750   :  { %v2453_v13 = vsel %vm2447_vm11, %v2452_v17, %v2444_v11 }
0x2751   :  { %2455 = vperm.xlu0 %4036, %v2453_v13  }
0x2753   :  { %v2565_v23 = vpop.permute.xlu0 %2564 }
0x2754   :  { %v2573_v32 = vrot.slane %v2565_v23, %v4478_v55  ;;  %v5439_v23 = vld [vmem:[%s5609_s4] sm:$0xff] }
0x2756   :  { %v2574_v37 = vsel %vm449_vm4, %v2573_v32, %v2569_v12  ;;  %v5445_v32 = vld [vmem:[%s5609_s4 + $0x8] sm:$0xff] }
0x2757   :  { %v2576_v46 = vsel %vm452_vm5, %v2574_v37, -inf }
0x2758   :  { %2577 = vmax.xlane.f32.xlu1 %v2576_v46 }
0x27cc   :  { %v2456_v50 = vpop.permute.xlu0 %2455 }
0x27cd   :  { %vm2457_vm12 = vcmp.eq.s32.totalorder %v4475_v54, %v2456_v50 }
0x27ce   :  { %v3324_v51 = vsel %vm2457_vm12, 1.0, %v4221_v2 }
0x27cf   :  { %3920 = vmatmul.mubr.msk.f32.vlgmr.msra.gmra.mxu1 %vm131_vm1, %v3324_v51 }
0x27d0   :  { %3923 = vmatpush3.msra.mxu1 %v5202_v60  ;;  %3950 = vmatprep.mubr.msk.f32.mxu1 %vm4222_vm0, %v4221_v2 }
0x27d1   :  { %3924 = vmatprep.subr.mxu1 %v4221_v2 }
0x27d2   :  { %3925 = vmatpush3.msra.mxu1 %v5211_v61 }
0x27d3   :  { %3926 = vmatprep.subr.mxu1 %v4221_v2 }
0x27d4   :  { %3927 = vmatpush3.msra.mxu1 %v5218_v62 }
0x27d5   :  { %3928 = vmatprep.subr.mxu1 %v4221_v2 }
0x27d6   :  { %3929 = vmatpush3.msra.mxu1 %v5225_v63 }
0x27d7   :  { %3930 = vmatprep.subr.mxu1 %v4221_v2 }
0x27d8   :  { %3931 = vmatpush3.msra.mxu1 %v5232_v0 }
0x27d9   :  { %3932 = vmatprep.subr.mxu1 %v4221_v2 }
0x27da   :  { %3933 = vmatpush3.msra.mxu1 %v5239_v21 }
0x27db   :  { %3934 = vmatprep.subr.mxu1 %v4221_v2 }
0x27dc   :  { %3935 = vmatpush3.msra.mxu1 %v5246_v49 }
0x27dd   :  { %3936 = vmatprep.subr.mxu1 %v4221_v2 }
0x27de   :  { %3937 = vmatpush3.msra.mxu1 %v5253_v22 }
0x27df   :  { %3938 = vmatprep.subr.mxu1 %v4221_v2 }
0x27e0   :  { %3939 = vmatpush3.msra.mxu1 %v5260_v18 }
0x27e1   :  { %v2578_v56 = vpop.xlane.xlu1 %2577  ;;  %3940 = vmatprep.subr.mxu1 %v4221_v2 }
0x27e2   :  { %v2583_v39 = vrot.slane %v2578_v56, %v4434_v35  ;;  %v2587_v1 = vrot.slane %v2578_v56, %v4432_v34  ;;  %3941 = vmatpush3.msra.mxu1 %v5269_v6 }
0x27e3   :  { %3942 = vmatprep.subr.mxu1 %v4221_v2 }
0x27e4   :  { %v2590_v40 = vsub.f32 %v2556_v42, %v2583_v39  ;;  %v2591_v7 = vsub.f32 %v2557_v29, %v2587_v1  ;;  %3943 = vmatpush3.msra.mxu1 %v5280_v47 }
0x27e5   :  { %3944 = vmatprep.subr.mxu1 %v4221_v2 }
0x27e6   :  { %v2592_v43 = vmul.f32 1.442695, %v2590_v40  ;;  %3945 = vmatpush3.msra.mxu1 %v5287_v3  ;;  %v2594_v53 = vmul.f32 1.442695, %v2591_v7 }
0x27e7   :  { %3946 = vmatprep.subr.mxu1 %v4221_v2 }
0x27e8   :  { %4117 = vpow2.f32 %v2592_v43  ;;  %3947 = vmatpush3.msra.mxu1 %v5294_v5 }
0x27e9   :  { %3948 = vmatprep.subr.mxu1 %v4221_v2  ;;  %4119 = vpow2.f32 %v2594_v53 }
0x27ea   :  { %3949 = vmatpush3.msra.mxu1 %v5301_v36 }
0x27eb   :  { %4014 = vmatprep.subr.mxu1 %v4221_v2 }
0x27f5   :  { %v4118_v10 = vpop.eup %4117 }
0x27f6   :  { %2599 = vperm.xlu0 %4036, %v4118_v10   ;;  %v4120_v42 = vpop.eup %4119 }
0x27fa   :  { %2602 = vperm.xlu0 %4036, %v4120_v42  }
0x2871   :  { %v2600_v59 = vpop.permute.xlu0 %2599 }
0x2872   :  { %v2607_v24 = vrot.slane %v2600_v59, %v4478_v55 }
0x2875   :  { %v2603_v15 = vpop.permute.xlu0 %2602 }
0x2876   :  { %v2611_v27 = vrot.slane %v2603_v15, %v4478_v55 }
0x2878   :  { %v2612_v28 = vsel %vm449_vm4, %v2611_v27, %v2607_v24 }
0x2879   :  { %v2614_v29 = vsel %vm452_vm5, %v2612_v28, 0.0 }
0x287a   :  { %2615 = vadd.xlane.f32.xlu0 %v2614_v29 }
0x288f   :  { %v2529_v52 = vpop.f32.mrf.mxu1 }
0x2891   :  { %v3921_v4 = vpop.f32.mrf.mxu1 }
0x2903   :  { %v2616_v48 = vpop.xlane.xlu0 %2615 }
0x2904   :  { %v2621_v44 = vrot.slane %v2616_v48, %v4434_v35  ;;  %v2625_v19 = vrot.slane %v2616_v48, %v4432_v34 }
0x2906   :  { %4121 = vrcp.f32 %v2621_v44 }
0x2907   :  { %4123 = vrcp.f32 %v2625_v19 }
0x2913   :  { %v4122_v9 = vpop.eup %4121 }
0x2914   :  { %v4124_v20 = vpop.eup %4123  ;;  %v2629_v17 = vmul.f32 %v4122_v9, %v4118_v10 }
0x2915   :  { %v2631_v11 = vmul.f32 %v4124_v20, %v4120_v42 }
0x2916   :  { %2634 = vperm.xlu1 %4035, %v2629_v17  }
0x2917   :  { %2639 = vperm.xlu0 %4036, %v2631_v11  }
0x291a   :  { %2663 = vrot.lane.b32.xlu1 %v2529_v52, %s4224_s23 }
0x291e   :  { %2666 = vrot.lane.b32.xlu1 %v5340_v16, %s4228_s7 }
0x2991   :  { %v2635_v13 = vpop.permute.xlu1 %2634 }
0x2992   :  { %v2640_v14 = vpop.permute.xlu0 %2639  ;;  %v2642_v12 = vmul.f32 %v5439_v23, %v2635_v13 }
0x2993   :  { %v2643_v37 = vmul.f32 %v5445_v32, %v2640_v14 }
0x2994   :  { %v2644_v46 = vsel %vm131_vm1, %v2642_v12, 0.0 }
0x2995   :  { %v2651_v16 = vsel %vm131_vm1, %v2643_v37, 0.0  ;;  %v2645_v50 = vrot.slane %v2644_v46, 4  ;;  %v2664_v10 = vpop.permute.xlu1 %2663  ;;  %v4181_v37 = vld [vmem:[%s5617_s12 + $0x38] sm:$0xff] }
0x2996   :  { %v2652_v51 = vrot.slane %v2651_v16, 4 }
0x2997   :  { %v2646_v56 = vadd.f32 %v2645_v50, %v2644_v46  ;;  %v4183_v50 = vld [vmem:[%s5617_s12 + $0x28] sm:$0xff] }
0x2998   :  { %v2653_v39 = vadd.f32 %v2652_v51, %v2651_v16  ;;  %v4184_v51 = vld [vmem:[%s5617_s12 + $0x20] sm:$0xff] }
0x2999   :  { %v2647_v1 = vrot.slane %v2646_v56, 2  ;;  %v2667_v28 = vpop.permute.xlu1 %2666 }
0x299a   :  { %v2654_v40 = vrot.slane %v2653_v39, 2 }
0x299b   :  { %v2648_v7 = vadd.f32 %v2647_v1, %v2646_v56  ;;  %v4185_v56 = vld [vmem:[%s5617_s12 + $0x18] sm:$0xff]  ;;  %v4187_v1 = vld [vmem:[%s5617_s12 + $0x8] sm:$0xff] }
0x299c   :  { %v2655_v43 = vadd.f32 %v2654_v40, %v2653_v39  ;;  %v4186_v39 = vld [vmem:[%s5617_s12 + $0x10] sm:$0xff]  ;;  %v4188_v40 = vld [vmem:[%s5617_s12] sm:$0xff] }
0x299d   :  { %v2649_v53 = vrot.slane %v2648_v7, 1 }
0x299e   :  { %v2656_v42 = vrot.slane %v2655_v43, 1 }
0x299f   :  { %v2650_v59 = vadd.f32 %v2649_v53, %v2648_v7 }
0x29a0   :  { %v2657_v15 = vadd.f32 %v2656_v42, %v2655_v43 }
0x29a2   :  { %v2660_v24 = vsel %vm449_vm4, %v2657_v15, %v2650_v59 }
0x29a3   :  { %v2669_v27 = vsel %vm131_vm1, %v2660_v24, %v2664_v10 }
0x29a4   :  { %v2670_v29 = vsel %vm548_vm7, %v2669_v27, %v2667_v28 }
0x29a5   :  { %3951 = vmatmul.mubr.msk.f32.vlgmr.msra.gmra.mxu1 %vm556_vm8, %v2670_v29 }
0x29a6   :  { %4015 = vmatpush3.msra.mxu1 %v5067_v58  ;;  %4022 = vmatprep.mubr.msk.f32.mxu1 %vm4222_vm0, %v4221_v2 }
0x29a7   :  { %4016 = vmatprep.subr.mxu1 %v4221_v2 }
0x29a8   :  { %4017 = vmatpush3.msra.mxu1 %v5076_v26 }
0x29a9   :  { %4018 = vmatprep.subr.mxu1 %v4221_v2 }
0x29aa   :  { %4019 = vmatpush3.msra.mxu1 %v5083_v31 }
0x29ab   :  { %4020 = vmatprep.subr.mxu1 %v4221_v2 }
0x29ac   :  { %4021 = vmatpush3.msra.mxu1 %v5090_v57 }
0x2a65   :  { %v2740_v52 = vpop.f32.mrf.mxu1 }
0x2a66   :  { %v2741_v4 = vadd.f32 %v5126_v30, %v2740_v52 }
0x2a67   :  { %v3952_v48 = vpop.f32.mrf.mxu1 }
0x2a68   :  { %4125 = vtanh.f32 %v2741_v4  ;;  %v3327_v44 = vmul.f32 -1.442695, %v2741_v4 }
0x2a6a   :  { %4127 = vpow2.f32 %v3327_v44 }
0x2a75   :  { %v4126_v58 = vpop.eup %4125 }
0x2a76   :  { %2753 = vrot.lane.b32.xlu1 %v4126_v58, %s4224_s23 }
0x2a77   :  { %v4128_v19 = vpop.eup %4127 }
0x2a78   :  { %v2747_v26 = vadd.f32 1.0, %v4128_v19 }
0x2a7a   :  { %4129 = vrcp.f32 %v2747_v26 }
0x2a87   :  { %v4130_v9 = vpop.eup %4129 }
0x2a88   :  { %v2751_v57 = vmul.f32 %v4130_v9, %v5336_v8 }
0x2ae8   :  { %v2754_v20 = vpop.permute.xlu1 %2753 }
0x2ae9   :  { %v2756_v31 = vmul.f32 %v4130_v9, %v2754_v20 }
0x2aeb   :  { %2758 = vrot.lane.b32.xlu1 %v2756_v31, %s4226_s18 }
0x2b5d   :  { %v2759_v17 = vpop.permute.xlu1 %2758 }
0x2b5e   :  { %v5467_v11 = vadd.f32 %v2759_v17, %v2751_v57  ;;  %v2869_v17 = vstv %s3331_s24 }
0x2b60   :  { %4131 = vtanh.f32 %v5467_v11 }
0x2b6d   :  { %v4132_v30 = vpop.eup %4131 }
0x2b6e   :  { %2764 = vrot.lane.b32.xlu1 %v4132_v30, %s4224_s23  ;;  %v2871_v30 = vstv %s3332_s25 }
0x2be0   :  { %v2765_v13 = vpop.permute.xlu1 %2764 }
0x2be1   :  { %v5471_v14 = vmul.f32 %v4130_v9, %v2765_v13 }
0x2be3   :  { %2769 = vrot.lane.b32.xlu0 %v5471_v14, %s4226_s18  ;;  %v2953_v12 = vmul.f32 %v5471_v14, %v4721_v25  ;;  %v4182_v25 = vld [vmem:[%s5617_s12 + $0x30] sm:$0xff]  ;;  %s3330_s12 = sld [smem:[#allocation3 + $0x5]] }
0x2be7   :  { %2955 = vrot.lane.b32.xlu0 %v2953_v12, %s4226_s18 }
0x2be9   :  { %v2866_v57 = vstv %s3330_s12 }
0x2bea   :  { %vm2867_vm13 = vcmp.eq.s32.totalorder %v2866_v57, 1 }
0x2c55   :  { %v2770_v8 = vpop.permute.xlu0 %2769 }
0x2c56   :  { %3962 = vmatmul.mubr.msk.f32.vlgmr.msra.gmra.mxu0 %vm667_vm9, %v2770_v8 }
0x2c57   :  { %3965 = vmatpush3.msra.mxu0 %v4181_v37  ;;  %3980 = vmatprep.mubr.msk.f32.mxu0 %vm4222_vm0, %v4221_v2  ;;  %v2872_v37 = vsel %vm313_vm3, %v2869_v17, %v2871_v30  ;;  %v4189_v30 = vld [vmem:[%s5619_s14] ss:$0 sm:$0xff] }
0x2c58   :  { %3966 = vmatprep.subr.mxu0 %v4221_v2 }
0x2c59   :  { %v2956_v46 = vpop.permute.xlu0 %2955  ;;  %3967 = vmatpush3.msra.mxu0 %v4182_v25 }
0x2c5a   :  { %v2958_v16 = vsel %vm403_vm2, %v2956_v46, 0.0  ;;  %3968 = vmatprep.subr.mxu0 %v4221_v2 }
0x2c5b   :  { %2959 = vadd.xlane.f32.xlu0 %v2958_v16  ;;  %3969 = vmatpush3.msra.mxu0 %v4183_v50 }
0x2c5c   :  { %3970 = vmatprep.subr.mxu0 %v4221_v2 }
0x2c5d   :  { %3971 = vmatpush3.msra.mxu0 %v4184_v51 }
0x2c5e   :  { %3972 = vmatprep.subr.mxu0 %v4221_v2 }
0x2c5f   :  { %3973 = vmatpush3.msra.mxu0 %v4185_v56 }
0x2c60   :  { %3974 = vmatprep.subr.mxu0 %v4221_v2 }
0x2c61   :  { %3975 = vmatpush3.msra.mxu0 %v4186_v39 }
0x2c62   :  { %3976 = vmatprep.subr.mxu0 %v4221_v2 }
0x2c63   :  { %3977 = vmatpush3.msra.mxu0 %v4187_v1 }
0x2c64   :  { %3978 = vmatprep.subr.mxu0 %v4221_v2 }
0x2c65   :  { %3979 = vmatpush3.msra.mxu0 %v4188_v40 }
0x2c66   :  { %3983 = vmatprep.subr.mxu0 %v4221_v2 }
0x2ce4   :  { %v2960_v28 = vpop.xlane.xlu0 %2959 }
0x2ce5   :  { %v2969_v26 = vrot.slane %v2960_v28, %v4432_v34 }
0x2ce7   :  { %v2973_v9 = vadd.f32 %v2969_v26, %v4430_v33 }
0x2d16   :  { %v2839_v7 = vpop.f32.mrf.mxu0 }
0x2d17   :  { %v2840_v43 = vadd.f32 %v5166_v45, %v2839_v7  ;;  %v2965_v45 = vrot.slane %v2960_v28, %v4434_v35 }
0x2d18   :  { %v3963_v53 = vpop.f32.mrf.mxu0 }
0x2d19   :  { %3329 = vst [vmem:[%s5622_s17 + $0xa] sm:$0x3] %v2840_v43  ;;  %v2845_v10 = vsel %vm741_vm10, %v2840_v43, -inf  ;;  %v2972_v29 = vadd.f32 %v2965_v45, %v4441_v41  ;;  %v2975_v41 = vadd.f32 %v2973_v9, %v4437_v38 }
0x2d1a   :  { %2846 = vmax.xlane.f32.xlu1 %v2845_v10 }
0x2d1b   :  { %v5524_v52 = vadd.f32 %v2972_v29, %v4437_v38  ;;  %v2977_v20 = vmax.f32 %v2975_v41, 0.0 }
0x2d1d   :  { %v2976_v4 = vmax.f32 %v5524_v52, 0.0 }
0x2da3   :  { %v2847_v42 = vpop.xlane.xlu1 %2846 }
0x2da4   :  { %vm2848_vm2 = vcmp.eq.f32.partialorder %v2840_v43, %v2847_v42 }
0x2da5   :  { %v2849_v59 = vsel %vm2848_vm2, %v4475_v54, 128 }
0x2da6   :  { %v2850_v15 = vsel %vm741_vm10, %v2849_v59, 2147483647 }
0x2da7   :  { %v2852_v24 = vshra.s32 %v2850_v15, 16  ;;  %v2851_v48 = vand.u32 65535, %v2850_v15 }
0x2da9   :  { %v2854_v27 = vcvt.s32.f32 %v2852_v24  ;;  %v2853_v44 = vcvt.s32.f32 %v2851_v48 }
0x2dab   :  { %2855 = vmin.xlane.f32.xlu1 %v2854_v27 }
0x2dbc   :  { %2981 = vperm.xlu1 %4035, %v2976_v4  }
0x2e34   :  { %v2856_v58 = vpop.xlane.xlu1 %2855 }
0x2e35   :  { %vm2857_vm10 = vcmp.eq.f32.partialorder %v2854_v27, %v2856_v58  ;;  %v2862_v31 = vcvt.f32.s32 %v2856_v58 }
0x2e36   :  { %v2858_v19 = vsel %vm2857_vm10, %v2853_v44, inf }
0x2e37   :  { %2859 = vmin.xlane.f32.xlu0 %v2858_v19  ;;  %v2863_v12 = vshll.u32 %v2862_v31, 16 }
0x2e38   :  { %v2982_v33 = vpop.permute.xlu1 %2981 }
0x2e39   :  { %v2989_v16 = vrot.slane %v2982_v33, %v4478_v55 }
0x2e4d   :  { %2984 = vperm.xlu0 %4036, %v2977_v20  }
0x2ec0   :  { %v2860_v13 = vpop.xlane.xlu0 %2859 }
0x2ec1   :  { %v2861_v8 = vcvt.f32.s32 %v2860_v13 }
0x2ec3   :  { %v2864_v46 = vadd.s32 %v2863_v12, %v2861_v8 }
0x2ec5   :  { %v2873_v25 = vsel %vm2867_vm13, %v2872_v37, %v2864_v46 }
0x2ec6   :  { %2875 = vperm.xlu0 %4036, %v2873_v25  }
0x2ec8   :  { %v2985_v38 = vpop.permute.xlu0 %2984 }
0x2ec9   :  { %v2993_v50 = vrot.slane %v2985_v38, %v4478_v55 }
0x2ecb   :  { %v2994_v51 = vsel %vm449_vm4, %v2993_v50, %v2989_v16 }
0x2ecc   :  { %v2996_v56 = vsel %vm452_vm5, %v2994_v51, -inf }
0x2ecd   :  { %2997 = vmax.xlane.f32.xlu1 %v2996_v56 }
0x2f41   :  { %v2876_v39 = vpop.permute.xlu0 %2875 }
0x2f42   :  { %vm2877_vm14 = vcmp.eq.s32.totalorder %v4475_v54, %v2876_v39 }
0x2f43   :  { %v3333_v1 = vsel %vm2877_vm14, 1.0, %v4221_v2 }
0x2f44   :  { %3981 = vmatmul.mubr.msk.f32.vlgmr.msra.gmra.mxu0 %vm131_vm1, %v3333_v1 }
0x2f45   :  { %3984 = vmatpush3.msra.mxu0 %v5202_v60  ;;  %4011 = vmatprep.mubr.msk.f32.mxu0 %vm4222_vm0, %v4221_v2 }
0x2f46   :  { %3985 = vmatprep.subr.mxu0 %v4221_v2 }
0x2f47   :  { %3986 = vmatpush3.msra.mxu0 %v5211_v61 }
0x2f48   :  { %3987 = vmatprep.subr.mxu0 %v4221_v2 }
0x2f49   :  { %3988 = vmatpush3.msra.mxu0 %v5218_v62 }
0x2f4a   :  { %3989 = vmatprep.subr.mxu0 %v4221_v2 }
0x2f4b   :  { %3990 = vmatpush3.msra.mxu0 %v5225_v63 }
0x2f4c   :  { %3991 = vmatprep.subr.mxu0 %v4221_v2 }
0x2f4d   :  { %3992 = vmatpush3.msra.mxu0 %v5232_v0 }
0x2f4e   :  { %3993 = vmatprep.subr.mxu0 %v4221_v2 }
0x2f4f   :  { %3994 = vmatpush3.msra.mxu0 %v5239_v21 }
0x2f50   :  { %3995 = vmatprep.subr.mxu0 %v4221_v2 }
0x2f51   :  { %3996 = vmatpush3.msra.mxu0 %v5246_v49 }
0x2f52   :  { %3997 = vmatprep.subr.mxu0 %v4221_v2 }
0x2f53   :  { %3998 = vmatpush3.msra.mxu0 %v5253_v22 }
0x2f54   :  { %3999 = vmatprep.subr.mxu0 %v4221_v2 }
0x2f55   :  { %4000 = vmatpush3.msra.mxu0 %v5260_v18 }
0x2f56   :  { %v2998_v54 = vpop.xlane.xlu1 %2997  ;;  %4001 = vmatprep.subr.mxu0 %v4221_v2 }
0x2f57   :  { %v3003_v60 = vrot.slane %v2998_v54, %v4434_v35  ;;  %v3007_v61 = vrot.slane %v2998_v54, %v4432_v34  ;;  %4002 = vmatpush3.msra.mxu0 %v5269_v6 }
0x2f58   :  { %4003 = vmatprep.subr.mxu0 %v4221_v2 }
0x2f59   :  { %v3010_v62 = vsub.f32 %v2976_v4, %v3003_v60  ;;  %v3011_v63 = vsub.f32 %v2977_v20, %v3007_v61  ;;  %4004 = vmatpush3.msra.mxu0 %v5280_v47 }
0x2f5a   :  { %4005 = vmatprep.subr.mxu0 %v4221_v2 }
0x2f5b   :  { %v3012_v0 = vmul.f32 1.442695, %v3010_v62  ;;  %4006 = vmatpush3.msra.mxu0 %v5287_v3  ;;  %v3014_v21 = vmul.f32 1.442695, %v3011_v63  ;;  %v4190_v62 = vld [vmem:[%s5621_s16] ss:$0 sm:$0xff] }
0x2f5c   :  { %4007 = vmatprep.subr.mxu0 %v4221_v2 }
0x2f5d   :  { %4133 = vpow2.f32 %v3012_v0  ;;  %4008 = vmatpush3.msra.mxu0 %v5294_v5 }
0x2f5e   :  { %4009 = vmatprep.subr.mxu0 %v4221_v2  ;;  %4135 = vpow2.f32 %v3014_v21 }
0x2f5f   :  { %4010 = vmatpush3.msra.mxu0 %v5301_v36 }
0x2f6a   :  { %v4134_v49 = vpop.eup %4133 }
0x2f6b   :  { %3019 = vperm.xlu0 %4036, %v4134_v49   ;;  %v4136_v22 = vpop.eup %4135 }
0x2f6f   :  { %3022 = vperm.xlu0 %4036, %v4136_v22  }
0x2fe6   :  { %v3020_v18 = vpop.permute.xlu0 %3019 }
0x2fe7   :  { %v3027_v47 = vrot.slane %v3020_v18, %v4478_v55 }
0x2fea   :  { %v3023_v6 = vpop.permute.xlu0 %3022 }
0x2feb   :  { %v3031_v3 = vrot.slane %v3023_v6, %v4478_v55 }
0x2fed   :  { %v3032_v40 = vsel %vm449_vm4, %v3031_v3, %v3027_v47 }
0x2fee   :  { %v3034_v7 = vsel %vm452_vm5, %v3032_v40, 0.0 }
0x2fef   :  { %3035 = vadd.xlane.f32.xlu0 %v3034_v7 }
0x3004   :  { %v2949_v5 = vpop.f32.mrf.mxu0 }
0x3006   :  { %v3982_v2 = vpop.f32.mrf.mxu0 }
0x3078   :  { %v3036_v43 = vpop.xlane.xlu0 %3035 }
0x3079   :  { %v3041_v36 = vrot.slane %v3036_v43, %v4434_v35  ;;  %v3045_v53 = vrot.slane %v3036_v43, %v4432_v34 }
0x307b   :  { %4137 = vrcp.f32 %v3041_v36 }
0x307c   :  { %4139 = vrcp.f32 %v3045_v53 }
0x3088   :  { %v4138_v10 = vpop.eup %4137 }
0x3089   :  { %v4140_v42 = vpop.eup %4139  ;;  %v3049_v59 = vmul.f32 %v4138_v10, %v4134_v49 }
0x308a   :  { %v3051_v15 = vmul.f32 %v4140_v42, %v4136_v22 }
0x308b   :  { %3054 = vperm.xlu1 %4035, %v3049_v59  }
0x308c   :  { %3059 = vperm.xlu0 %4036, %v3051_v15  }
0x308f   :  { %3083 = vrot.lane.b32.xlu1 %v2949_v5, %s4224_s23 }
0x3093   :  { %3086 = vrot.lane.b32.xlu1 %v5471_v14, %s4228_s7 }
0x3106   :  { %v3055_v55 = vpop.permute.xlu1 %3054 }
0x3107   :  { %v3060_v24 = vpop.permute.xlu0 %3059  ;;  %v3062_v27 = vmul.f32 %v5439_v23, %v3055_v55 }
0x3108   :  { %v3063_v35 = vmul.f32 %v5445_v32, %v3060_v24 }
0x3109   :  { %v3064_v34 = vsel %vm131_vm1, %v3062_v27, 0.0 }
0x310a   :  { %v3071_v28 = vsel %vm131_vm1, %v3063_v35, 0.0  ;;  %v3065_v45 = vrot.slane %v3064_v34, 4  ;;  %v3084_v14 = vpop.permute.xlu1 %3083 }
0x310b   :  { %v3072_v29 = vrot.slane %v3071_v28, 4 }
0x310c   :  { %v3066_v52 = vadd.f32 %v3065_v45, %v3064_v34 }
0x310d   :  { %v3073_v4 = vadd.f32 %v3072_v29, %v3071_v28 }
0x310e   :  { %v3067_v48 = vrot.slane %v3066_v52, 2  ;;  %v3087_v31 = vpop.permute.xlu1 %3086 }
0x310f   :  { %v3074_v58 = vrot.slane %v3073_v4, 2 }
0x3110   :  { %v3068_v44 = vadd.f32 %v3067_v48, %v3066_v52 }
0x3111   :  { %v3075_v19 = vadd.f32 %v3074_v58, %v3073_v4 }
0x3112   :  { %v3069_v26 = vrot.slane %v3068_v44, 1 }
0x3113   :  { %v3076_v9 = vrot.slane %v3075_v19, 1 }
0x3114   :  { %v3070_v41 = vadd.f32 %v3069_v26, %v3068_v44 }
0x3115   :  { %v3077_v20 = vadd.f32 %v3076_v9, %v3075_v19 }
0x3117   :  { %v3080_v23 = vsel %vm449_vm4, %v3077_v20, %v3070_v41 }
0x3118   :  { %v3089_v32 = vsel %vm131_vm1, %v3080_v23, %v3084_v14 }
0x3119   :  { %v3090_v57 = vsel %vm548_vm7, %v3089_v32, %v3087_v31 }
0x311a   :  { %4012 = vmatmul.mubr.msk.f32.vlgmr.msra.gmra.mxu0 %vm556_vm8, %v3090_v57 }
0x31da   :  { %v3160_v17 = vpop.f32.mrf.mxu0 }
0x31db   :  { %v3161_v13 = vadd.f32 %v4189_v30, %v3160_v17 }
0x31dc   :  { %v4013_v12 = vpop.f32.mrf.mxu0 }
0x31dd   :  { %4141 = vtanh.f32 %v3161_v13  ;;  %v3336_v37 = vmul.f32 -1.442695, %v3161_v13 }
0x31df   :  { %4143 = vpow2.f32 %v3336_v37 }
0x31ea   :  { %v4142_v8 = vpop.eup %4141 }
0x31eb   :  { %3173 = vrot.lane.b32.xlu1 %v4142_v8, %s4224_s23 }
0x31ec   :  { %v4144_v46 = vpop.eup %4143 }
0x31ed   :  { %v3167_v25 = vadd.f32 1.0, %v4144_v46 }
0x31ef   :  { %4145 = vrcp.f32 %v3167_v25 }
0x31fc   :  { %v4146_v33 = vpop.eup %4145 }
0x31fd   :  { %v3171_v50 = vmul.f32 %v4146_v33, %v5467_v11 }
0x325d   :  { %v3174_v38 = vpop.permute.xlu1 %3173 }
0x325e   :  { %v3176_v16 = vmul.f32 %v4146_v33, %v3174_v38 }
0x3260   :  { %3178 = vrot.lane.b32.xlu1 %v3176_v16, %s4226_s18 }
0x32d2   :  { %v3179_v51 = vpop.permute.xlu1 %3178 }
0x32d3   :  { %v3181_v56 = vadd.f32 %v3179_v51, %v3171_v50 }
0x32d5   :  { %4147 = vtanh.f32 %v3181_v56 }
0x32e2   :  { %v4148_v39 = vpop.eup %4147 }
0x32e3   :  { %3184 = vrot.lane.b32.xlu1 %v4148_v39, %s4224_s23 }
0x3355   :  { %v3185_v1 = vpop.permute.xlu1 %3184 }
0x3356   :  { %v3187_v54 = vmul.f32 %v4146_v33, %v3185_v1 }
0x3358   :  { %3189 = vrot.lane.b32.xlu0 %v3187_v54, %s4226_s18 }
0x33ca   :  { %v3190_v60 = vpop.permute.xlu0 %3189 }
0x33cb   :  { %4023 = vmatmul.mubr.msk.f32.vlgmr.msra.gmra.mxu1 %vm667_vm9, %v3190_v60 }
0x348b   :  { %v3259_v61 = vpop.f32.mrf.mxu1 }
0x348c   :  { %v3260_v63 = vadd.f32 %v4190_v62, %v3259_v61 }
0x348d   :  { %v4024_v11 = vpop.f32.mrf.mxu1 }
0x348e   :  { %3338 = vst [vmem:[%s5622_s17 + $0xc] sm:$0x3] %v3260_v63 }
0x348f   :  { %3269 = vsyncpa [#allocation4], 1 }
0x3490   :  { %3270 = vsyncpa [#allocation6], 1 }

</bundles_post_ra>
